<compile_context>
chip_gen: v7x
topology: tpu7x:2x2x1
jax: 0.10.0
libtpu: 0.0.40
codegen_flags: <defaults>
</compile_context>

<pallas_src>
import functools

import jax
import jax.numpy as jnp
from jax.experimental import pallas as pl
from jax.experimental.pallas import tpu as pltpu


def _round_up(x, m):
    return (x + m - 1) // m * m


def _chip_config():
    """Per-generation defaults: (tile_n, tile_v, vmem_limit_bytes)."""
    vmem_cap = 128 * 1024 * 1024
    try:
        info = pltpu.get_tpu_info()
        vmem_cap = int(getattr(info, "vmem_capacity_bytes", vmem_cap))
    except Exception:
        pass
    kind = ""
    try:
        kind = jax.devices()[0].device_kind.lower()
    except Exception:
        pass
    # Leave headroom for compiler-internal scratch: ~85% of physical VMEM,
    # never above 110 MiB.  On 64-MiB parts (v7x) this lands around 54 MiB.
    vmem_limit = min(int(vmem_cap * 0.85), 110 * 1024 * 1024)
    if vmem_cap <= 80 * 1024 * 1024:
        # v7x-class (64 MiB / TC): smaller vocab tile, spend the VMEM on rows.
        return 1024, 1024, vmem_limit
    if "v5" in kind:
        # v5e reaches the compute/DMA balance earlier; bigger tiles only add
        # VMEM pressure and per-iteration latency.
        return 512, 2048, vmem_limit
    return 1024, 2048, vmem_limit  # v6e and default


def _mlp_kernel(x_ref, mask_ref, labels_ref, w1_ref, b1_ref, w2_ref, b2_ref,
                logits_ref, row_loss_ref,
                h_ref, m_ref, l_ref, t_ref,
                *, apply_mask, compute_loss, write_logits):
    v = pl.program_id(1)
    num_v = pl.num_programs(1)

    # First vocab tile of this row tile: compute + cache the hidden activations
    # and reset the online-softmax state.
    @pl.when(v == 0)
    def _():
        x = x_ref[...]                                   # bf16
        if apply_mask:
            x = x * mask_ref[...].astype(x.dtype)
        h = jnp.dot(x, w1_ref[...],
                    preferred_element_type=jnp.float32) + b1_ref[...]
        h_ref[...] = jnp.maximum(h, 0.0).astype(jnp.bfloat16)
        if compute_loss:
            m_ref[...] = jnp.full_like(m_ref, -jnp.inf)
            l_ref[...] = jnp.zeros_like(l_ref)
            t_ref[...] = jnp.zeros_like(t_ref)

    # Second matmul for this (row tile, vocab tile): bf16 MXU, f32 accumulation.
    logits = jnp.dot(h_ref[...], w2_ref[...],
                     preferred_element_type=jnp.float32) + b2_ref[...]
    if write_logits:
        logits_ref[...] = logits.astype(logits_ref.dtype)

    if compute_loss:
        # Online softmax statistics across vocab tiles.
        m_prev = m_ref[...]
        m_new = jnp.maximum(m_prev, jnp.max(logits, axis=-1, keepdims=True))
        alpha = jnp.exp(m_prev - m_new)
        l_ref[...] = alpha * l_ref[...] + jnp.sum(
            jnp.exp(logits - m_new), axis=-1, keepdims=True)
        m_ref[...] = m_new

        # Target logit: select-and-reduce (no one-hot materialization).
        tile_v = logits.shape[1]
        col = jax.lax.broadcasted_iota(jnp.int32, logits.shape, 1) + v * tile_v
        t_ref[...] += jnp.sum(
            jnp.where(col == labels_ref[...], logits, 0.0),
            axis=-1, keepdims=True)

        @pl.when(v == num_v - 1)
        def _():
            lse = m_ref[...] + jnp.log(l_ref[...])
            active = (mask_ref[...] > 0.5).astype(jnp.float32)
            row_loss_ref[...] = (lse - t_ref[...]) * active
    else:
        @pl.when(v == num_v - 1)
        def _():
            row_loss_ref[...] = jnp.zeros_like(row_loss_ref)


@functools.partial(
    jax.jit,
    static_argnames=("tile_n", "tile_v", "apply_mask", "compute_loss",
                     "write_logits", "logits_dtype", "single_buffer_w1",
                     "vmem_limit"))
def _run_kernel(xf, mask, labels, w1, b1, w2, b2, *,
                tile_n, tile_v, apply_mask, compute_loss, write_logits,
                logits_dtype, single_buffer_w1, vmem_limit):
    n_pad, h_dim = xf.shape
    hid = w1.shape[1]
    v_pad = w2.shape[1]
    grid = (n_pad // tile_n, v_pad // tile_v)

    kernel = functools.partial(_mlp_kernel, apply_mask=apply_mask,
                               compute_loss=compute_loss,
                               write_logits=write_logits)

    # Resident weights (constant index_map): single-buffer to reclaim VMEM.
    if single_buffer_w1:
        w1_spec = pl.BlockSpec((h_dim, hid), lambda i, v: (0, 0),
                               pipeline_mode=pl.Buffered(1))
        b1_spec = pl.BlockSpec((1, hid), lambda i, v: (0, 0),
                               pipeline_mode=pl.Buffered(1))
    else:
        w1_spec = pl.BlockSpec((h_dim, hid), lambda i, v: (0, 0))
        b1_spec = pl.BlockSpec((1, hid), lambda i, v: (0, 0))

    if write_logits:
        logits_shape = jax.ShapeDtypeStruct((n_pad, v_pad), logits_dtype)
        logits_spec = pl.BlockSpec((tile_n, tile_v), lambda i, v: (i, v))
    else:
        # Loss-only path: no logits stream; tiny per-row-tile dummy output so
        # no HBM write traffic and no revisit across the parallel row axis.
        logits_shape = jax.ShapeDtypeStruct((grid[0] * 8, 128), logits_dtype)
        logits_spec = pl.BlockSpec((8, 128), lambda i, v: (i, 0))

    grid_spec = pltpu.PrefetchScalarGridSpec(
        num_scalar_prefetch=0,
        grid=grid,
        in_specs=[
            pl.BlockSpec((tile_n, h_dim), lambda i, v: (i, 0)),   # x rows (bf16)
            pl.BlockSpec((tile_n, 1), lambda i, v: (i, 0)),       # mask rows
            pl.BlockSpec((tile_n, 1), lambda i, v: (i, 0)),       # labels rows
            w1_spec,                                              # w1 (resident)
            b1_spec,                                              # b1 (resident)
            pl.BlockSpec((hid, tile_v), lambda i, v: (0, v)),     # w2 (streamed)
            pl.BlockSpec((1, tile_v), lambda i, v: (0, v)),       # b2 (streamed)
        ],
        out_specs=[
            logits_spec,                                          # logits tile
            pl.BlockSpec((tile_n, 1), lambda i, v: (i, 0)),       # masked CE/row
        ],
        scratch_shapes=[
            pltpu.VMEM((tile_n, hid), jnp.bfloat16),  # cached hidden activations
            pltpu.VMEM((tile_n, 1), jnp.float32),     # running max
            pltpu.VMEM((tile_n, 1), jnp.float32),     # running sum-exp
            pltpu.VMEM((tile_n, 1), jnp.float32),     # running target logit
        ],
    )

    return pl.pallas_call(
        kernel,
        out_shape=(
            logits_shape,
            jax.ShapeDtypeStruct((n_pad, 1), jnp.float32),
        ),
        grid_spec=grid_spec,
        compiler_params=pltpu.CompilerParams(
            dimension_semantics=("parallel", "arbitrary"),
            vmem_limit_bytes=vmem_limit),
    )(xf, mask, labels, w1, b1, w2, b2)


def inversion_mlp_forward(x, params, labels=None, attention_mask=None,
                          tile_n=None, tile_v=None,
                          logits_dtype=jnp.bfloat16, return_logits=True):
    """Mirrors InversionMLP.forward: returns (logits, loss).

    return_logits=False (only meaningful when labels are given) removes the
    whole logits write stream; logits is then returned as None.
    """
    w1, b1, w2, b2 = params
    B, S, H = x.shape
    hid = w1.shape[1]
    V = w2.shape[1]
    N = B * S

    default_tn, default_tv, vmem_limit = _chip_config()
    if tile_n is None:
        tile_n = min(default_tn, _round_up(N, 16))
    if tile_v is None:
        tile_v = min(default_tv, _round_up(V, 128))
    n_pad = _round_up(N, tile_n)
    v_pad = _round_up(V, tile_v)

    compute_loss = labels is not None
    write_logits = bool(return_logits) or not compute_loss

    # x in bf16 (MXU input dtype) -> half the DMA / VMEM for the activations.
    xf = x.reshape(N, H).astype(jnp.bfloat16)
    if attention_mask is not None:
        mask = attention_mask.reshape(N, 1).astype(jnp.float32)
    else:
        mask = jnp.ones((N, 1), jnp.float32)
    if compute_loss:
        labels_arr = labels.reshape(N, 1).astype(jnp.int32)
    else:
        labels_arr = jnp.zeros((N, 1), jnp.int32)

    # Pad token rows to the row-tile size; padded rows are inactive (mask=0).
    if n_pad > N:
        pad_n = n_pad - N
        xf = jnp.pad(xf, ((0, pad_n), (0, 0)))
        mask = jnp.pad(mask, ((0, pad_n), (0, 0)))
        labels_arr = jnp.pad(labels_arr, ((0, pad_n), (0, 0)))

    # Weights: bf16 for the MXU, biases in f32. Pad vocab columns; a very
    # negative bias keeps the padded columns out of the log-sum-exp.
    w1_bf = w1.astype(jnp.bfloat16)
    b1_row = b1.reshape(1, hid).astype(jnp.float32)
    w2_bf = w2.astype(jnp.bfloat16)
    b2_row = b2.reshape(1, V).astype(jnp.float32)
    if v_pad > V:
        pad_v = v_pad - V
        w2_bf = jnp.pad(w2_bf, ((0, 0), (0, pad_v)))
        b2_row = jnp.pad(b2_row, ((0, 0), (0, pad_v)), constant_values=-1e30)

    run = functools.partial(
        _run_kernel, xf, mask, labels_arr, w1_bf, b1_row, w2_bf, b2_row,
        tile_n=tile_n, tile_v=tile_v,
        apply_mask=attention_mask is not None,
        compute_loss=compute_loss,
        write_logits=write_logits,
        logits_dtype=logits_dtype,
        vmem_limit=vmem_limit)
    try:
        logits_pad, row_loss = run(single_buffer_w1=True)
    except Exception:
        # pipeline_mode=pl.Buffered(1) not supported on this jax/libtpu build:
        # fall back to default double-buffered resident weights.
        logits_pad, row_loss = run(single_buffer_w1=False)

    loss = None
    if compute_loss:
        count = jnp.sum((mask > 0.5).astype(jnp.float32))
        loss = jnp.sum(row_loss) / jnp.maximum(count, 1.0)

    logits = None
    if write_logits:
        logits_2d = logits_pad
        if n_pad > N or v_pad > V:      # only pay the unpadding copy if needed
            logits_2d = logits_2d[:N, :V]
        logits = logits_2d.reshape(B, S, V)
    return logits, loss


def _reference_forward(x, params, labels, attention_mask):
    """Plain-JAX f32 reference for correctness checking."""
    w1, b1, w2, b2 = params
    xm = x * attention_mask[:, :, None].astype(x.dtype)
    h = jnp.maximum(xm @ w1 + b1, 0.0)
    logits = h @ w2 + b2
    V = w2.shape[1]
    lf = logits.reshape(-1, V)
    lab = labels.reshape(-1)
    lse = jax.nn.logsumexp(lf, axis=-1)
    tgt = jnp.take_along_axis(lf, lab[:, None], axis=-1)[:, 0]
    per_tok = lse - tgt
    active = (attention_mask.reshape(-1) == 1).astype(jnp.float32)
    loss = jnp.sum(per_tok * active) / jnp.maximum(jnp.sum(active), 1.0)
    return logits, loss


if __name__ == "__main__":
    # Small config (config.hidden_size=32, config.vocab_size=200); the 2048
    # intermediate hidden size is hard-coded in the module.  S=24 / V=200 so
    # the explicit small tiles below exercise row + vocab padding, a multi-tile
    # grid, and the online-softmax accumulation across vocab tiles.
    B, S, H, HID, V = 2, 24, 32, 2048, 200

    key = jax.random.PRNGKey(0)
    kx, kw1, kb1, kw2, kb2, klab, kmask = jax.random.split(key, 7)

    x = jax.random.normal(kx, (B, S, H), dtype=jnp.float32)
    w1 = jax.random.normal(kw1, (H, HID), dtype=jnp.float32) * 0.02
    b1 = jax.random.normal(kb1, (HID,), dtype=jnp.float32) * 0.02
    w2 = jax.random.normal(kw2, (HID, V), dtype=jnp.float32) * 0.02
    b2 = jax.random.normal(kb2, (V,), dtype=jnp.float32) * 0.02
    params = (w1, b1, w2, b2)

    labels = jax.random.randint(klab, (B, S), 0, V, dtype=jnp.int32)
    attention_mask = (jax.random.uniform(kmask, (B, S)) > 0.25).astype(jnp.int32)
    attention_mask = attention_mask.at[0, 0].set(1)  # at least one active token

    ref_logits, ref_loss = _reference_forward(x, params, labels, attention_mask)

    # (1) Training-style call (mask + labels) with explicit small tiles:
    #     multi-tile grid, online softmax across vocab tiles, bf16 logits out.
    logits, loss = inversion_mlp_forward(
        x, params, labels=labels, attention_mask=attention_mask,
        tile_n=16, tile_v=128)
    jax.block_until_ready((logits, loss))
    assert logits.shape == (B, S, V)
    # bf16 MXU inputs + bf16 logits output -> slightly looser logits tolerance.
    assert jnp.allclose(logits.astype(jnp.float32), ref_logits,
                        rtol=2e-2, atol=2e-2), "logits mismatch"
    assert jnp.allclose(loss, ref_loss, rtol=1e-2, atol=1e-2), "loss mismatch"

    # (2) Loss-only call: logits write stream statically removed.
    logits_none, loss_only = inversion_mlp_forward(
        x, params, labels=labels, attention_mask=attention_mask,
        return_logits=False)
    jax.block_until_ready(loss_only)
    assert logits_none is None
    assert jnp.allclose(loss_only, ref_loss, rtol=1e-2, atol=1e-2), \
        "loss-only mismatch"

    # (3) Inference-style call (no mask, no labels): CE block statically
    #     removed, generation-tuned default tiles.
    logits2, loss2 = inversion_mlp_forward(x, params)
    jax.block_until_ready(logits2)
    ref_logits2 = jnp.maximum(x @ w1 + b1, 0.0) @ w2 + b2
    assert loss2 is None
    assert logits2.shape == (B, S, V)
    assert jnp.allclose(logits2.astype(jnp.float32), ref_logits2,
                        rtol=2e-2, atol=2e-2), "logits (no-mask) mismatch"

    print("KERNEL_OK")
</pallas_src>

<mosaic_0001>
module attributes {stable_mosaic.version = 11 : i64} {
  func.func @_mlp_kernel(%arg0: i32, %arg1: i32, %arg2: memref<16x32xbf16, #tpu.memory_space<vmem>>, %arg3: memref<16x1xf32, #tpu.memory_space<vmem>>, %arg4: memref<16x1xi32, #tpu.memory_space<vmem>>, %arg5: memref<32x2048xbf16, #tpu.memory_space<vmem>>, %arg6: memref<1x2048xf32, #tpu.memory_space<vmem>>, %arg7: memref<2048x128xbf16, #tpu.memory_space<vmem>>, %arg8: memref<1x128xf32, #tpu.memory_space<vmem>>, %arg9: memref<16x128xbf16, #tpu.memory_space<vmem>>, %arg10: memref<16x1xf32, #tpu.memory_space<vmem>>, %arg11: memref<16x2048xbf16, #tpu.memory_space<vmem>>, %arg12: memref<16x1xf32, #tpu.memory_space<vmem>>, %arg13: memref<16x1xf32, #tpu.memory_space<vmem>>, %arg14: memref<16x1xf32, #tpu.memory_space<vmem>>) attributes {dimension_semantics = [#tpu.dimension_semantics<parallel>, #tpu.dimension_semantics<arbitrary>], iteration_bounds = array<i64: 3, 2>, scalar_prefetch = 0 : i64, scratch_operands = 4 : i64, tpu.core_type = #tpu.core_type<tc>, window_params = [{transform_indices = @transform_0, window_bounds = array<i64: 16, 32>}, {transform_indices = @transform_1, window_bounds = array<i64: 16, 1>}, {transform_indices = @transform_2, window_bounds = array<i64: 16, 1>}, {pipeline_mode = #tpu.pipeline_mode<synchronous>, transform_indices = @transform_3, window_bounds = array<i64: 32, 2048>}, {pipeline_mode = #tpu.pipeline_mode<synchronous>, transform_indices = @transform_4, window_bounds = array<i64: 1, 2048>}, {transform_indices = @transform_5, window_bounds = array<i64: 2048, 128>}, {transform_indices = @transform_6, window_bounds = array<i64: 1, 128>}, {transform_indices = @transform_7, window_bounds = array<i64: 16, 128>}, {transform_indices = @transform_8, window_bounds = array<i64: 16, 1>}]} {
    %c0_i32 = arith.constant 0 : i32
    %0 = arith.cmpi eq, %arg1, %c0_i32 : i32
    %1 = arith.extui %0 : i1 to i32
    %c0_i32_0 = arith.constant 0 : i32
    %2 = arith.cmpi ne, %1, %c0_i32_0 : i32
    scf.if %2 {
      %c0_27 = arith.constant 0 : index
      %c0_28 = arith.constant 0 : index
      %44 = vector.load %arg2[%c0_27, %c0_28] : memref<16x32xbf16, #tpu.memory_space<vmem>>, vector<16x32xbf16>
      %c0_29 = arith.constant 0 : index
      %c0_30 = arith.constant 0 : index
      %45 = vector.load %arg3[%c0_29, %c0_30] : memref<16x1xf32, #tpu.memory_space<vmem>>, vector<16x1xf32>
      %46 = arith.truncf %45 : vector<16x1xf32> to vector<16x1xbf16>
      %47 = vector.broadcast %46 : vector<16x1xbf16> to vector<16x32xbf16>
      %48 = arith.mulf %44, %47 : vector<16x32xbf16>
      %c0_31 = arith.constant 0 : index
      %c0_32 = arith.constant 0 : index
      %49 = vector.load %arg5[%c0_31, %c0_32] : memref<32x2048xbf16, #tpu.memory_space<vmem>>, vector<32x2048xbf16>
      %cst_33 = arith.constant dense<0.000000e+00> : vector<16x2048xf32>
      %50 = tpu.matmul %48, %49, %cst_33 {dimension_numbers = #tpu.dot_dimension_numbers<[1], [0], [0], [1], [0, 0, 1, 1], [], []>} : vector<16x32xbf16>, vector<32x2048xbf16>, vector<16x2048xf32> -> vector<16x2048xf32>
      %c0_34 = arith.constant 0 : index
      %c0_35 = arith.constant 0 : index
      %51 = vector.load %arg6[%c0_34, %c0_35] : memref<1x2048xf32, #tpu.memory_space<vmem>>, vector<1x2048xf32>
      %52 = vector.broadcast %51 : vector<1x2048xf32> to vector<16x2048xf32>
      %53 = arith.addf %50, %52 : vector<16x2048xf32>
      %cst_36 = arith.constant 0.000000e+00 : f32
      %54 = vector.broadcast %cst_36 : f32 to vector<16x2048xf32>
      %55 = arith.maximumf %53, %54 : vector<16x2048xf32>
      %56 = arith.truncf %55 : vector<16x2048xf32> to vector<16x2048xbf16>
      %c0_37 = arith.constant 0 : index
      %c0_38 = arith.constant 0 : index
      %57 = vector.load %arg11[%c0_37, %c0_38] : memref<16x2048xbf16, #tpu.memory_space<vmem>>, vector<16x2048xbf16>
      tpu.vector_store %arg11[%c0_37, %c0_38], %56 {strides = array<i32>} : memref<16x2048xbf16, #tpu.memory_space<vmem>>, vector<16x2048xbf16>,
      %cst_39 = arith.constant 0xFF800000 : f32
      %58 = vector.broadcast %cst_39 : f32 to vector<16x1xf32>
      %c0_40 = arith.constant 0 : index
      %c0_41 = arith.constant 0 : index
      %59 = vector.load %arg12[%c0_40, %c0_41] : memref<16x1xf32, #tpu.memory_space<vmem>>, vector<16x1xf32>
      tpu.vector_store %arg12[%c0_40, %c0_41], %58 {strides = array<i32>} : memref<16x1xf32, #tpu.memory_space<vmem>>, vector<16x1xf32>,
      %cst_42 = arith.constant 0.000000e+00 : f32
      %60 = vector.broadcast %cst_42 : f32 to vector<16x1xf32>
      %c0_43 = arith.constant 0 : index
      %c0_44 = arith.constant 0 : index
      %61 = vector.load %arg13[%c0_43, %c0_44] : memref<16x1xf32, #tpu.memory_space<vmem>>, vector<16x1xf32>
      tpu.vector_store %arg13[%c0_43, %c0_44], %60 {strides = array<i32>} : memref<16x1xf32, #tpu.memory_space<vmem>>, vector<16x1xf32>,
      %cst_45 = arith.constant 0.000000e+00 : f32
      %62 = vector.broadcast %cst_45 : f32 to vector<16x1xf32>
      %c0_46 = arith.constant 0 : index
      %c0_47 = arith.constant 0 : index
      %63 = vector.load %arg14[%c0_46, %c0_47] : memref<16x1xf32, #tpu.memory_space<vmem>>, vector<16x1xf32>
      tpu.vector_store %arg14[%c0_46, %c0_47], %62 {strides = array<i32>} : memref<16x1xf32, #tpu.memory_space<vmem>>, vector<16x1xf32>,
    } else {
    }
    %c0 = arith.constant 0 : index
    %c0_1 = arith.constant 0 : index
    %3 = vector.load %arg11[%c0, %c0_1] : memref<16x2048xbf16, #tpu.memory_space<vmem>>, vector<16x2048xbf16>
    %c0_2 = arith.constant 0 : index
    %c0_3 = arith.constant 0 : index
    %4 = vector.load %arg7[%c0_2, %c0_3] : memref<2048x128xbf16, #tpu.memory_space<vmem>>, vector<2048x128xbf16>
    %cst = arith.constant dense<0.000000e+00> : vector<16x128xf32>
    %5 = tpu.matmul %3, %4, %cst {dimension_numbers = #tpu.dot_dimension_numbers<[1], [0], [0], [1], [0, 0, 1, 1], [], []>} : vector<16x2048xbf16>, vector<2048x128xbf16>, vector<16x128xf32> -> vector<16x128xf32>
    %c0_4 = arith.constant 0 : index
    %c0_5 = arith.constant 0 : index
    %6 = vector.load %arg8[%c0_4, %c0_5] : memref<1x128xf32, #tpu.memory_space<vmem>>, vector<1x128xf32>
    %7 = vector.broadcast %6 : vector<1x128xf32> to vector<16x128xf32>
    %8 = arith.addf %5, %7 : vector<16x128xf32>
    %9 = arith.truncf %8 : vector<16x128xf32> to vector<16x128xbf16>
    %c0_6 = arith.constant 0 : index
    %c0_7 = arith.constant 0 : index
    %10 = vector.load %arg9[%c0_6, %c0_7] : memref<16x128xbf16, #tpu.memory_space<vmem>>, vector<16x128xbf16>
    tpu.vector_store %arg9[%c0_6, %c0_7], %9 {strides = array<i32>} : memref<16x128xbf16, #tpu.memory_space<vmem>>, vector<16x128xbf16>,
    %c0_8 = arith.constant 0 : index
    %c0_9 = arith.constant 0 : index
    %11 = vector.load %arg12[%c0_8, %c0_9] : memref<16x1xf32, #tpu.memory_space<vmem>>, vector<16x1xf32>
    %cst_10 = arith.constant dense<0xFF800000> : vector<16xf32>
    %12 = vector.multi_reduction <maximumf>, %8, %cst_10 [1] : vector<16x128xf32> to vector<16xf32>
    %13 = vector.shape_cast %12 : vector<16xf32> to vector<16x1xf32>
    %14 = arith.maximumf %11, %13 : vector<16x1xf32>
    %15 = arith.subf %11, %14 : vector<16x1xf32>
    %16 = math.exp %15 : vector<16x1xf32>
    %c0_11 = arith.constant 0 : index
    %c0_12 = arith.constant 0 : index
    %17 = vector.load %arg13[%c0_11, %c0_12] : memref<16x1xf32, #tpu.memory_space<vmem>>, vector<16x1xf32>
    %18 = arith.mulf %16, %17 : vector<16x1xf32>
    %19 = vector.broadcast %14 : vector<16x1xf32> to vector<16x128xf32>
    %20 = arith.subf %8, %19 : vector<16x128xf32>
    %21 = math.exp %20 : vector<16x128xf32>
    %cst_13 = arith.constant dense<0.000000e+00> : vector<16xf32>
    %22 = vector.multi_reduction <add>, %21, %cst_13 [1] : vector<16x128xf32> to vector<16xf32>
    %23 = vector.shape_cast %22 : vector<16xf32> to vector<16x1xf32>
    %24 = arith.addf %18, %23 : vector<16x1xf32>
    %c0_14 = arith.constant 0 : index
    %c0_15 = arith.constant 0 : index
    %25 = vector.load %arg13[%c0_14, %c0_15] : memref<16x1xf32, #tpu.memory_space<vmem>>, vector<16x1xf32>
    tpu.vector_store %arg13[%c0_14, %c0_15], %24 {strides = array<i32>} : memref<16x1xf32, #tpu.memory_space<vmem>>, vector<16x1xf32>,
    %c0_16 = arith.constant 0 : index
    %c0_17 = arith.constant 0 : index
    %26 = vector.load %arg12[%c0_16, %c0_17] : memref<16x1xf32, #tpu.memory_space<vmem>>, vector<16x1xf32>
    tpu.vector_store %arg12[%c0_16, %c0_17], %14 {strides = array<i32>} : memref<16x1xf32, #tpu.memory_space<vmem>>, vector<16x1xf32>,
    %27 = tpu.iota {dimensions = array<i32: 1>} : vector<16x128xi32>
    %c128_i32 = arith.constant 128 : i32
    %28 = arith.muli %arg1, %c128_i32 : i32
    %29 = vector.broadcast %28 : i32 to vector<16x128xi32>
    %30 = arith.addi %27, %29 : vector<16x128xi32>
    %c0_18 = arith.constant 0 : index
    %c0_19 = arith.constant 0 : index
    %31 = vector.load %arg14[%c0_18, %c0_19] : memref<16x1xf32, #tpu.memory_space<vmem>>, vector<16x1xf32>
    %c0_20 = arith.constant 0 : index
    %c0_21 = arith.constant 0 : index
    %32 = vector.load %arg4[%c0_20, %c0_21] : memref<16x1xi32, #tpu.memory_space<vmem>>, vector<16x1xi32>
    %33 = vector.broadcast %32 : vector<16x1xi32> to vector<16x128xi32>
    %34 = arith.cmpi eq, %30, %33 : vector<16x128xi32>
    %cst_22 = arith.constant 0.000000e+00 : f32
    %35 = vector.broadcast %cst_22 : f32 to vector<16x128xf32>
    %36 = arith.select %34, %8, %35 : vector<16x128xi1>, vector<16x128xf32>
    %cst_23 = arith.constant dense<0.000000e+00> : vector<16xf32>
    %37 = vector.multi_reduction <add>, %36, %cst_23 [1] : vector<16x128xf32> to vector<16xf32>
    %38 = vector.shape_cast %37 : vector<16xf32> to vector<16x1xf32>
    %39 = arith.addf %31, %38 : vector<16x1xf32>
    %c0_24 = arith.constant 0 : index
    %c0_25 = arith.constant 0 : index
    %40 = vector.load %arg14[%c0_24, %c0_25] : memref<16x1xf32, #tpu.memory_space<vmem>>, vector<16x1xf32>
    tpu.vector_store %arg14[%c0_24, %c0_25], %39 {strides = array<i32>} : memref<16x1xf32, #tpu.memory_space<vmem>>, vector<16x1xf32>,
    %c1_i32 = arith.constant 1 : i32
    %41 = arith.cmpi eq, %arg1, %c1_i32 : i32
    %42 = arith.extui %41 : i1 to i32
    %c0_i32_26 = arith.constant 0 : i32
    %43 = arith.cmpi ne, %42, %c0_i32_26 : i32
    scf.if %43 {
      %c0_27 = arith.constant 0 : index
      %c0_28 = arith.constant 0 : index
      %44 = vector.load %arg12[%c0_27, %c0_28] : memref<16x1xf32, #tpu.memory_space<vmem>>, vector<16x1xf32>
      %c0_29 = arith.constant 0 : index
      %c0_30 = arith.constant 0 : index
      %45 = vector.load %arg13[%c0_29, %c0_30] : memref<16x1xf32, #tpu.memory_space<vmem>>, vector<16x1xf32>
      %46 = math.log %45 : vector<16x1xf32>
      %47 = arith.addf %44, %46 : vector<16x1xf32>
      %c0_31 = arith.constant 0 : index
      %c0_32 = arith.constant 0 : index
      %48 = vector.load %arg3[%c0_31, %c0_32] : memref<16x1xf32, #tpu.memory_space<vmem>>, vector<16x1xf32>
      %cst_33 = arith.constant 5.000000e-01 : f32
      %49 = vector.broadcast %cst_33 : f32 to vector<16x1xf32>
      %50 = arith.cmpf ogt, %48, %49 : vector<16x1xf32>
      %51 = arith.extui %50 : vector<16x1xi1> to vector<16x1xi32>
      %52 = arith.sitofp %51 : vector<16x1xi32> to vector<16x1xf32>
      %c0_34 = arith.constant 0 : index
      %c0_35 = arith.constant 0 : index
      %53 = vector.load %arg14[%c0_34, %c0_35] : memref<16x1xf32, #tpu.memory_space<vmem>>, vector<16x1xf32>
      %54 = arith.subf %47, %53 : vector<16x1xf32>
      %55 = arith.mulf %54, %52 : vector<16x1xf32>
      %c0_36 = arith.constant 0 : index
      %c0_37 = arith.constant 0 : index
      %56 = vector.load %arg10[%c0_36, %c0_37] : memref<16x1xf32, #tpu.memory_space<vmem>>, vector<16x1xf32>
      tpu.vector_store %arg10[%c0_36, %c0_37], %55 {strides = array<i32>} : memref<16x1xf32, #tpu.memory_space<vmem>>, vector<16x1xf32>,
    } else {
    }
    return
  }
  func.func @transform_0(%arg0: i32, %arg1: i32) -> (i32, i32) {
    %c0_i32 = arith.constant 0 : i32
    %c0_i32_0 = arith.constant 0 : i32
    return %arg0, %c0_i32 : i32, i32
  }
  func.func @transform_1(%arg0: i32, %arg1: i32) -> (i32, i32) {
    %c0_i32 = arith.constant 0 : i32
    %c0_i32_0 = arith.constant 0 : i32
    return %arg0, %c0_i32 : i32, i32
  }
  func.func @transform_2(%arg0: i32, %arg1: i32) -> (i32, i32) {
    %c0_i32 = arith.constant 0 : i32
    %c0_i32_0 = arith.constant 0 : i32
    return %arg0, %c0_i32 : i32, i32
  }
  func.func @transform_3(%arg0: i32, %arg1: i32) -> (i32, i32) {
    %c0_i32 = arith.constant 0 : i32
    %c0_i32_0 = arith.constant 0 : i32
    %c0_i32_1 = arith.constant 0 : i32
    return %c0_i32, %c0_i32_0 : i32, i32
  }
  func.func @transform_4(%arg0: i32, %arg1: i32) -> (i32, i32) {
    %c0_i32 = arith.constant 0 : i32
    %c0_i32_0 = arith.constant 0 : i32
    %c0_i32_1 = arith.constant 0 : i32
    return %c0_i32, %c0_i32_0 : i32, i32
  }
  func.func @transform_5(%arg0: i32, %arg1: i32) -> (i32, i32) {
    %c0_i32 = arith.constant 0 : i32
    %c0_i32_0 = arith.constant 0 : i32
    return %c0_i32, %arg1 : i32, i32
  }
  func.func @transform_6(%arg0: i32, %arg1: i32) -> (i32, i32) {
    %c0_i32 = arith.constant 0 : i32
    %c0_i32_0 = arith.constant 0 : i32
    return %c0_i32, %arg1 : i32, i32
  }
  func.func @transform_7(%arg0: i32, %arg1: i32) -> (i32, i32) {
    %c0_i32 = arith.constant 0 : i32
    return %arg0, %arg1 : i32, i32
  }
  func.func @transform_8(%arg0: i32, %arg1: i32) -> (i32, i32) {
    %c0_i32 = arith.constant 0 : i32
    %c0_i32_0 = arith.constant 0 : i32
    return %arg0, %c0_i32 : i32, i32
  }
}

module attributes {stable_mosaic.version = 11 : i64} {
  func.func @_mlp_kernel(%arg0: i32, %arg1: i32, %arg2: memref<16x32xbf16, #tpu.memory_space<vmem>>, %arg3: memref<16x1xf32, #tpu.memory_space<vmem>>, %arg4: memref<16x1xi32, #tpu.memory_space<vmem>>, %arg5: memref<32x2048xbf16, #tpu.memory_space<vmem>>, %arg6: memref<1x2048xf32, #tpu.memory_space<vmem>>, %arg7: memref<2048x128xbf16, #tpu.memory_space<vmem>>, %arg8: memref<1x128xf32, #tpu.memory_space<vmem>>, %arg9: memref<16x128xbf16, #tpu.memory_space<vmem>>, %arg10: memref<16x1xf32, #tpu.memory_space<vmem>>, %arg11: memref<16x2048xbf16, #tpu.memory_space<vmem>>, %arg12: memref<16x1xf32, #tpu.memory_space<vmem>>, %arg13: memref<16x1xf32, #tpu.memory_space<vmem>>, %arg14: memref<16x1xf32, #tpu.memory_space<vmem>>) attributes {dimension_semantics = [#tpu.dimension_semantics<parallel>, #tpu.dimension_semantics<arbitrary>], iteration_bounds = array<i64: 3, 2>, scalar_prefetch = 0 : i64, scratch_operands = 4 : i64, tpu.core_type = #tpu.core_type<tc>, window_params = [{transform_indices = @transform_0, window_bounds = array<i64: 16, 32>}, {transform_indices = @transform_1, window_bounds = array<i64: 16, 1>}, {transform_indices = @transform_2, window_bounds = array<i64: 16, 1>}, {pipeline_mode = #tpu.pipeline_mode<synchronous>, transform_indices = @transform_3, window_bounds = array<i64: 32, 2048>}, {pipeline_mode = #tpu.pipeline_mode<synchronous>, transform_indices = @transform_4, window_bounds = array<i64: 1, 2048>}, {transform_indices = @transform_5, window_bounds = array<i64: 2048, 128>}, {transform_indices = @transform_6, window_bounds = array<i64: 1, 128>}, {transform_indices = @transform_7, window_bounds = array<i64: 16, 128>}, {transform_indices = @transform_8, window_bounds = array<i64: 16, 1>}]} {
    %c0_i32 = arith.constant 0 : i32
    %0 = arith.cmpi eq, %arg1, %c0_i32 : i32
    %1 = arith.extui %0 : i1 to i32
    %c0_i32_0 = arith.constant 0 : i32
    %2 = arith.cmpi ne, %1, %c0_i32_0 : i32
    scf.if %2 {
      %c0_27 = arith.constant 0 : index
      %c0_28 = arith.constant 0 : index
      %44 = vector.load %arg2[%c0_27, %c0_28] : memref<16x32xbf16, #tpu.memory_space<vmem>>, vector<16x32xbf16>
      %c0_29 = arith.constant 0 : index
      %c0_30 = arith.constant 0 : index
      %45 = vector.load %arg3[%c0_29, %c0_30] : memref<16x1xf32, #tpu.memory_space<vmem>>, vector<16x1xf32>
      %46 = arith.truncf %45 : vector<16x1xf32> to vector<16x1xbf16>
      %47 = vector.broadcast %46 : vector<16x1xbf16> to vector<16x32xbf16>
      %48 = arith.mulf %44, %47 : vector<16x32xbf16>
      %c0_31 = arith.constant 0 : index
      %c0_32 = arith.constant 0 : index
      %49 = vector.load %arg5[%c0_31, %c0_32] : memref<32x2048xbf16, #tpu.memory_space<vmem>>, vector<32x2048xbf16>
      %cst_33 = arith.constant dense<0.000000e+00> : vector<16x2048xf32>
      %50 = tpu.matmul %48, %49, %cst_33 {dimension_numbers = #tpu.dot_dimension_numbers<[1], [0], [0], [1], [0, 0, 1, 1], [], []>} : vector<16x32xbf16>, vector<32x2048xbf16>, vector<16x2048xf32> -> vector<16x2048xf32>
      %c0_34 = arith.constant 0 : index
      %c0_35 = arith.constant 0 : index
      %51 = vector.load %arg6[%c0_34, %c0_35] : memref<1x2048xf32, #tpu.memory_space<vmem>>, vector<1x2048xf32>
      %52 = vector.broadcast %51 : vector<1x2048xf32> to vector<16x2048xf32>
      %53 = arith.addf %50, %52 : vector<16x2048xf32>
      %cst_36 = arith.constant 0.000000e+00 : f32
      %54 = vector.broadcast %cst_36 : f32 to vector<16x2048xf32>
      %55 = arith.maximumf %53, %54 : vector<16x2048xf32>
      %56 = arith.truncf %55 : vector<16x2048xf32> to vector<16x2048xbf16>
      %c0_37 = arith.constant 0 : index
      %c0_38 = arith.constant 0 : index
      %57 = vector.load %arg11[%c0_37, %c0_38] : memref<16x2048xbf16, #tpu.memory_space<vmem>>, vector<16x2048xbf16>
      tpu.vector_store %arg11[%c0_37, %c0_38], %56 {strides = array<i32>} : memref<16x2048xbf16, #tpu.memory_space<vmem>>, vector<16x2048xbf16>,
      %cst_39 = arith.constant 0xFF800000 : f32
      %58 = vector.broadcast %cst_39 : f32 to vector<16x1xf32>
      %c0_40 = arith.constant 0 : index
      %c0_41 = arith.constant 0 : index
      %59 = vector.load %arg12[%c0_40, %c0_41] : memref<16x1xf32, #tpu.memory_space<vmem>>, vector<16x1xf32>
      tpu.vector_store %arg12[%c0_40, %c0_41], %58 {strides = array<i32>} : memref<16x1xf32, #tpu.memory_space<vmem>>, vector<16x1xf32>,
      %cst_42 = arith.constant 0.000000e+00 : f32
      %60 = vector.broadcast %cst_42 : f32 to vector<16x1xf32>
      %c0_43 = arith.constant 0 : index
      %c0_44 = arith.constant 0 : index
      %61 = vector.load %arg13[%c0_43, %c0_44] : memref<16x1xf32, #tpu.memory_space<vmem>>, vector<16x1xf32>
      tpu.vector_store %arg13[%c0_43, %c0_44], %60 {strides = array<i32>} : memref<16x1xf32, #tpu.memory_space<vmem>>, vector<16x1xf32>,
      %cst_45 = arith.constant 0.000000e+00 : f32
      %62 = vector.broadcast %cst_45 : f32 to vector<16x1xf32>
      %c0_46 = arith.constant 0 : index
      %c0_47 = arith.constant 0 : index
      %63 = vector.load %arg14[%c0_46, %c0_47] : memref<16x1xf32, #tpu.memory_space<vmem>>, vector<16x1xf32>
      tpu.vector_store %arg14[%c0_46, %c0_47], %62 {strides = array<i32>} : memref<16x1xf32, #tpu.memory_space<vmem>>, vector<16x1xf32>,
    } else {
    }
    %c0 = arith.constant 0 : index
    %c0_1 = arith.constant 0 : index
    %3 = vector.load %arg11[%c0, %c0_1] : memref<16x2048xbf16, #tpu.memory_space<vmem>>, vector<16x2048xbf16>
    %c0_2 = arith.constant 0 : index
    %c0_3 = arith.constant 0 : index
    %4 = vector.load %arg7[%c0_2, %c0_3] : memref<2048x128xbf16, #tpu.memory_space<vmem>>, vector<2048x128xbf16>
    %cst = arith.constant dense<0.000000e+00> : vector<16x128xf32>
    %5 = tpu.matmul %3, %4, %cst {dimension_numbers = #tpu.dot_dimension_numbers<[1], [0], [0], [1], [0, 0, 1, 1], [], []>} : vector<16x2048xbf16>, vector<2048x128xbf16>, vector<16x128xf32> -> vector<16x128xf32>
    %c0_4 = arith.constant 0 : index
    %c0_5 = arith.constant 0 : index
    %6 = vector.load %arg8[%c0_4, %c0_5] : memref<1x128xf32, #tpu.memory_space<vmem>>, vector<1x128xf32>
    %7 = vector.broadcast %6 : vector<1x128xf32> to vector<16x128xf32>
    %8 = arith.addf %5, %7 : vector<16x128xf32>
    %9 = arith.truncf %8 : vector<16x128xf32> to vector<16x128xbf16>
    %c0_6 = arith.constant 0 : index
    %c0_7 = arith.constant 0 : index
    %10 = vector.load %arg9[%c0_6, %c0_7] : memref<16x128xbf16, #tpu.memory_space<vmem>>, vector<16x128xbf16>
    tpu.vector_store %arg9[%c0_6, %c0_7], %9 {strides = array<i32>} : memref<16x128xbf16, #tpu.memory_space<vmem>>, vector<16x128xbf16>,
    %c0_8 = arith.constant 0 : index
    %c0_9 = arith.constant 0 : index
    %11 = vector.load %arg12[%c0_8, %c0_9] : memref<16x1xf32, #tpu.memory_space<vmem>>, vector<16x1xf32>
    %cst_10 = arith.constant dense<0xFF800000> : vector<16xf32>
    %12 = vector.multi_reduction <maximumf>, %8, %cst_10 [1] : vector<16x128xf32> to vector<16xf32>
    %13 = vector.shape_cast %12 : vector<16xf32> to vector<16x1xf32>
    %14 = arith.maximumf %11, %13 : vector<16x1xf32>
    %15 = arith.subf %11, %14 : vector<16x1xf32>
    %16 = math.exp %15 : vector<16x1xf32>
    %c0_11 = arith.constant 0 : index
    %c0_12 = arith.constant 0 : index
    %17 = vector.load %arg13[%c0_11, %c0_12] : memref<16x1xf32, #tpu.memory_space<vmem>>, vector<16x1xf32>
    %18 = arith.mulf %16, %17 : vector<16x1xf32>
    %19 = vector.broadcast %14 : vector<16x1xf32> to vector<16x128xf32>
    %20 = arith.subf %8, %19 : vector<16x128xf32>
    %21 = math.exp %20 : vector<16x128xf32>
    %cst_13 = arith.constant dense<0.000000e+00> : vector<16xf32>
    %22 = vector.multi_reduction <add>, %21, %cst_13 [1] : vector<16x128xf32> to vector<16xf32>
    %23 = vector.shape_cast %22 : vector<16xf32> to vector<16x1xf32>
    %24 = arith.addf %18, %23 : vector<16x1xf32>
    %c0_14 = arith.constant 0 : index
    %c0_15 = arith.constant 0 : index
    %25 = vector.load %arg13[%c0_14, %c0_15] : memref<16x1xf32, #tpu.memory_space<vmem>>, vector<16x1xf32>
    tpu.vector_store %arg13[%c0_14, %c0_15], %24 {strides = array<i32>} : memref<16x1xf32, #tpu.memory_space<vmem>>, vector<16x1xf32>,
    %c0_16 = arith.constant 0 : index
    %c0_17 = arith.constant 0 : index
    %26 = vector.load %arg12[%c0_16, %c0_17] : memref<16x1xf32, #tpu.memory_space<vmem>>, vector<16x1xf32>
    tpu.vector_store %arg12[%c0_16, %c0_17], %14 {strides = array<i32>} : memref<16x1xf32, #tpu.memory_space<vmem>>, vector<16x1xf32>,
    %27 = tpu.iota {dimensions = array<i32: 1>} : vector<16x128xi32>
    %c128_i32 = arith.constant 128 : i32
    %28 = arith.muli %arg1, %c128_i32 : i32
    %29 = vector.broadcast %28 : i32 to vector<16x128xi32>
    %30 = arith.addi %27, %29 : vector<16x128xi32>
    %c0_18 = arith.constant 0 : index
    %c0_19 = arith.constant 0 : index
    %31 = vector.load %arg14[%c0_18, %c0_19] : memref<16x1xf32, #tpu.memory_space<vmem>>, vector<16x1xf32>
    %c0_20 = arith.constant 0 : index
    %c0_21 = arith.constant 0 : index
    %32 = vector.load %arg4[%c0_20, %c0_21] : memref<16x1xi32, #tpu.memory_space<vmem>>, vector<16x1xi32>
    %33 = vector.broadcast %32 : vector<16x1xi32> to vector<16x128xi32>
    %34 = arith.cmpi eq, %30, %33 : vector<16x128xi32>
    %cst_22 = arith.constant 0.000000e+00 : f32
    %35 = vector.broadcast %cst_22 : f32 to vector<16x128xf32>
    %36 = arith.select %34, %8, %35 : vector<16x128xi1>, vector<16x128xf32>
    %cst_23 = arith.constant dense<0.000000e+00> : vector<16xf32>
    %37 = vector.multi_reduction <add>, %36, %cst_23 [1] : vector<16x128xf32> to vector<16xf32>
    %38 = vector.shape_cast %37 : vector<16xf32> to vector<16x1xf32>
    %39 = arith.addf %31, %38 : vector<16x1xf32>
    %c0_24 = arith.constant 0 : index
    %c0_25 = arith.constant 0 : index
    %40 = vector.load %arg14[%c0_24, %c0_25] : memref<16x1xf32, #tpu.memory_space<vmem>>, vector<16x1xf32>
    tpu.vector_store %arg14[%c0_24, %c0_25], %39 {strides = array<i32>} : memref<16x1xf32, #tpu.memory_space<vmem>>, vector<16x1xf32>,
    %c1_i32 = arith.constant 1 : i32
    %41 = arith.cmpi eq, %arg1, %c1_i32 : i32
    %42 = arith.extui %41 : i1 to i32
    %c0_i32_26 = arith.constant 0 : i32
    %43 = arith.cmpi ne, %42, %c0_i32_26 : i32
    scf.if %43 {
      %c0_27 = arith.constant 0 : index
      %c0_28 = arith.constant 0 : index
      %44 = vector.load %arg12[%c0_27, %c0_28] : memref<16x1xf32, #tpu.memory_space<vmem>>, vector<16x1xf32>
      %c0_29 = arith.constant 0 : index
      %c0_30 = arith.constant 0 : index
      %45 = vector.load %arg13[%c0_29, %c0_30] : memref<16x1xf32, #tpu.memory_space<vmem>>, vector<16x1xf32>
      %46 = math.log %45 : vector<16x1xf32>
      %47 = arith.addf %44, %46 : vector<16x1xf32>
      %c0_31 = arith.constant 0 : index
      %c0_32 = arith.constant 0 : index
      %48 = vector.load %arg3[%c0_31, %c0_32] : memref<16x1xf32, #tpu.memory_space<vmem>>, vector<16x1xf32>
      %cst_33 = arith.constant 5.000000e-01 : f32
      %49 = vector.broadcast %cst_33 : f32 to vector<16x1xf32>
      %50 = arith.cmpf ogt, %48, %49 : vector<16x1xf32>
      %51 = arith.extui %50 : vector<16x1xi1> to vector<16x1xi32>
      %52 = arith.sitofp %51 : vector<16x1xi32> to vector<16x1xf32>
      %c0_34 = arith.constant 0 : index
      %c0_35 = arith.constant 0 : index
      %53 = vector.load %arg14[%c0_34, %c0_35] : memref<16x1xf32, #tpu.memory_space<vmem>>, vector<16x1xf32>
      %54 = arith.subf %47, %53 : vector<16x1xf32>
      %55 = arith.mulf %54, %52 : vector<16x1xf32>
      %c0_36 = arith.constant 0 : index
      %c0_37 = arith.constant 0 : index
      %56 = vector.load %arg10[%c0_36, %c0_37] : memref<16x1xf32, #tpu.memory_space<vmem>>, vector<16x1xf32>
      tpu.vector_store %arg10[%c0_36, %c0_37], %55 {strides = array<i32>} : memref<16x1xf32, #tpu.memory_space<vmem>>, vector<16x1xf32>,
    } else {
    }
    return
  }
  func.func @transform_0(%arg0: i32, %arg1: i32) -> (i32, i32) {
    %c0_i32 = arith.constant 0 : i32
    %c0_i32_0 = arith.constant 0 : i32
    return %arg0, %c0_i32 : i32, i32
  }
  func.func @transform_1(%arg0: i32, %arg1: i32) -> (i32, i32) {
    %c0_i32 = arith.constant 0 : i32
    %c0_i32_0 = arith.constant 0 : i32
    return %arg0, %c0_i32 : i32, i32
  }
  func.func @transform_2(%arg0: i32, %arg1: i32) -> (i32, i32) {
    %c0_i32 = arith.constant 0 : i32
    %c0_i32_0 = arith.constant 0 : i32
    return %arg0, %c0_i32 : i32, i32
  }
  func.func @transform_3(%arg0: i32, %arg1: i32) -> (i32, i32) {
    %c0_i32 = arith.constant 0 : i32
    %c0_i32_0 = arith.constant 0 : i32
    %c0_i32_1 = arith.constant 0 : i32
    return %c0_i32, %c0_i32_0 : i32, i32
  }
  func.func @transform_4(%arg0: i32, %arg1: i32) -> (i32, i32) {
    %c0_i32 = arith.constant 0 : i32
    %c0_i32_0 = arith.constant 0 : i32
    %c0_i32_1 = arith.constant 0 : i32
    return %c0_i32, %c0_i32_0 : i32, i32
  }
  func.func @transform_5(%arg0: i32, %arg1: i32) -> (i32, i32) {
    %c0_i32 = arith.constant 0 : i32
    %c0_i32_0 = arith.constant 0 : i32
    return %c0_i32, %arg1 : i32, i32
  }
  func.func @transform_6(%arg0: i32, %arg1: i32) -> (i32, i32) {
    %c0_i32 = arith.constant 0 : i32
    %c0_i32_0 = arith.constant 0 : i32
    return %c0_i32, %arg1 : i32, i32
  }
  func.func @transform_7(%arg0: i32, %arg1: i32) -> (i32, i32) {
    %c0_i32 = arith.constant 0 : i32
    return %arg0, %arg1 : i32, i32
  }
  func.func @transform_8(%arg0: i32, %arg1: i32) -> (i32, i32) {
    %c0_i32 = arith.constant 0 : i32
    %c0_i32_0 = arith.constant 0 : i32
    return %arg0, %c0_i32 : i32, i32
  }
}

</mosaic_0001>

<bundles_post_ra>
// kernel: _run_kernel.1
= control target key start
LH: loop header
LB: loop body
LE: loop exit
PB: predicated region body
PF: predicated region fallthrough
CT: control target
= control target key end

     0   :  { %s5030_s0 = inlined_call_operand.hbm [shape: bf16[48,32], index: 0, kind: input, shape index: {}]   ;;  %s5031_s1 = inlined_call_operand.hbm [shape: f32[48,1], index: 1, kind: input, shape index: {}]   ;;  %s5032_s2 = inlined_call_operand.hbm [shape: s32[48,1], index: 2, kind: input, shape index: {}]   ;;  %s5033_s3 = inlined_call_operand.hbm [shape: bf16[32,2048], index: 3, kind: input, shape index: {}]   ;;  %s5034_s4 = inlined_call_operand.hbm [shape: f32[1,2048], index: 4, kind: input, shape index: {}]   ;;  %s5035_s5 = inlined_call_operand.hbm [shape: bf16[2048,256], index: 5, kind: input, shape index: {}]   ;;  %s5036_s6 = inlined_call_operand.hbm [shape: f32[1,256], index: 6, kind: input, shape index: {}]   ;;  %s5037_s7 = inlined_call_operand.hbm [shape: bf16[48,256], index: 7, kind: output, shape index: {0}]   ;;  %s5038_s8 = inlined_call_operand.hbm [shape: f32[48,1], index: 8, kind: output, shape index: {1}]  }
   0x1   :  { %5095 = sst [smem:[#allocation48_spill]] %s5031_s1 }
   0x2   :  { %5096 = sst [smem:[#allocation49_spill]] %s5033_s3 }
   0x3   :  { %5097 = sst [smem:[#allocation50_spill]] %s5035_s5 }
   0x4   :  { %5098 = sst [smem:[#allocation51_spill]] %s5036_s6 }
   0x5   :  { %5099 = sst [smem:[#allocation52_spill]] %s5037_s7 }
   0x6   :  { %5100 = sst [smem:[#allocation53_spill]] %s5038_s8 }
   0x7   :  { %14 = vsyncpa [#allocation7], 0 }
   0x8   :  { %16 = vsyncpa [#allocation7 + $0x1], 0 }
   0x9   :  { %17 = vsyncpa [#allocation10], 0 }
   0xa   :  { %19 = vsyncpa [#allocation10 + $0x1], 0 }
   0xb   :  { %20 = vsyncpa [#allocation13], 0 }
   0xc   :  { %21 = vsyncpa [#allocation16], 0 }
   0xd   :  { %23 = vsyncpa [#allocation16 + $0x1], 0 }
   0xe   :  { %24 = vsyncpa [#allocation8], 0 }
   0xf   :  { %26 = vsyncpa [#allocation8 + $0x1], 0 }
  0x10   :  { %27 = vsyncpa [#allocation20], 0 }
  0x11   :  { %29 = vsyncpa [#allocation20 + $0x1], 0  ;;  %s4205_s27 = smov 0   ;;  %s4207_s28 = smov 0  }
  0x12   :  { %s4209_s29 = smov 0   ;;  %s4211_s30 = smov 0  }
  0x13   :  { %s4213_s9 = smov 0   ;;  %s4215_s10 = smov 0  }
  0x14   :  { %s4217_s11 = smov 0   ;;  %s4219_s12 = smov 0  }
  0x15   :  { %s4221_s13 = smov 0   ;;  %s4223_s14 = smov 0  }
  0x16   :  { %s4225_s15 = smov 0   ;;  %s4227_s16 = smov 0  }
  0x17   :  { %s4229_s17 = smov 0   ;;  %s4231_s18 = smov 0  }
  0x18 LB: > { %5101 = sst [smem:[#allocation27_spill]] %s4081_s27  ;;  %s4274_s19 = sadd.s32 4294967295, %s4133_s18   ;;  %s4133_s18 = sphi %s4231_s18, %s35_s18   ;;  %s4129_s17 = sphi %s4229_s17, %s5210_s17   ;;  %s4125_s16 = sphi %s4227_s16, %s5199_s16   ;;  %s4121_s15 = sphi %s4225_s15, %s5209_s15   ;;  %s4117_s14 = sphi %s4223_s14, %s5208_s14   ;;  %s4113_s13 = sphi %s4221_s13, %s5207_s13   ;;  %s4109_s12 = sphi %s4219_s12, %s5206_s12   ;;  %s4105_s11 = sphi %s4217_s11, %s5196_s11   ;;  %s4101_s10 = sphi %s4215_s10, %s5205_s10   ;;  %s4097_s9 = sphi %s4213_s9, %s5204_s9   ;;  %s4093_s30 = sphi %s4211_s30, %s5195_s30   ;;  %s4089_s29 = sphi %s4209_s29, %s5203_s29   ;;  %s4085_s28 = sphi %s4207_s28, %s5202_s28   ;;  %s4081_s27 = sphi %s4205_s27, %s5194_s27  }
  0x19   : > { %5102 = sst [smem:[#allocation28_spill]] %s4085_s28  ;;  %s3006_s20 = sadd.s32 4294967294, %s4133_s18  }
  0x1a   : > { %5103 = sst [smem:[#allocation29_spill]] %s4097_s9  ;;  %p67_p0 = scmp.ne.s32.totalorder %s4109_s12, %s4105_s11 }
  0x1b   : > { %5104 = sst [smem:[#allocation30_spill]] %s4105_s11  ;;  %p5049_p1 = scmp.eq.s32.totalorder %s4274_s19, 0 }
  0x1c   : > { %5105 = sst [smem:[#allocation31_spill]] %s4109_s12  ;;  %p187_p2 = scmp.ne.s32.totalorder %s4097_s9, %s4093_s30 }
  0x1d   : > { %5106 = sst [smem:[#allocation32_spill]] %s4117_s14  ;;  %p4287_p3 = por %p5049_p1, %p67_p0 }
  0x1e   : > { %5107 = sst [smem:[#allocation33_spill]] %s4121_s15  ;;  %p238_p4 = scmp.ne.s32.totalorder %s4089_s29, %s4085_s28 }
  0x1f   : > { %5108 = sst [smem:[#allocation34_spill]] %s4125_s16  ;;  %p4295_p5 = por %p187_p2, %p5049_p1 }
  0x20   : > { %5109 = sst [smem:[#allocation35_spill]] %s4274_s19  ;;  %p5050_p6 = scmp.eq.s32.totalorder %s4274_s19, 5 }
  0x21   : > { %s5110_s22 = scalar_select %p4287_p3, 1, 0 }
  0x22   : > { %s5112_s23 = scalar_select %p4295_p5, 1, 0 }
  0x23   : > { %5111 = sst [smem:[#allocation36_spill]] %s5110_s22  ;;  %p244_p7 = scmp.ne.s32.totalorder %s4085_s28, %s4081_s27 }
  0x24   : > { %5113 = sst [smem:[#allocation37_spill]] %s5112_s23  ;;  %p245_p8 = scmp.eq.s32.totalorder %s3006_s20, 5 }
  0x25   : > { %p4304_p9 = por %p5050_p6, %p238_p4  ;;  %p3007_p10 = scmp.ge.s32.totalorder %s4133_s18, 1 }
  0x26   : > { %p4309_p11 = por %p245_p8, %p244_p7  ;;  %p4316_p12 = por %p245_p8, %p67_p0 }
  0x27   : > { %s5114_s24 = scalar_select %p4304_p9, 1, 0 }
  0x28   : > { %s5116_s25 = scalar_select %p4309_p11, 1, 0 }
  0x29   : > { %5115 = sst [smem:[#allocation38_spill]] %s5114_s24  ;;  %p278_p13 = scmp.lt.s32.totalorder %s4133_s18, 7 }
  0x2a   : > { %5117 = sst [smem:[#allocation39_spill]] %s5116_s25  ;;  %s4135_s20 = smov [#allocation12]  }
  0x2b   : > { %s5118_s26 = scalar_select %p4316_p12, 1, 0 }
  0x2c   : > { %p4321_p2 = pnand %p3007_p10, %p278_p13  ;;  %s290_s21 = sshll.u32 %s4135_s20, 4  ;;  %s291_s21 = int_to_ptr.vmem [resolvable:$true] %s290_s21 }
  0x2d   : > { %5119 = sst [smem:[#allocation40_spill]] %s5118_s26  ;;  %s5123_s3 = sld [smem:[#allocation49_spill]] }
  0x2e   : > { %s5120_s30 = scalar_select %p4321_p2, 1, 0 }
  0x2f   : > { %p3428_p4 = pneg %p4321_p2 }
  0x30   : > { %5121 = sst [smem:[#allocation41_spill]] %s5120_s30 }
  0x31   : > { %p4329_p7 = pnand %p3428_p4, %p5049_p1 }
  0x33   : > { %s5122_s27 = scalar_select %p4329_p7, 1, 0 }
  0x34   : > { %s3737_s7 = scalar_lea.hbm %s5123_s3, 4096  ;;  %p5065_p8 = pneg %p4329_p7 }
  0x35   : > { %p3738_p0 = scmp.ne.s32.totalorder %s5123_s3, %s3737_s7  ;;  %p3744_p4 = scmp.lt.u32.totalorder %s3737_s7, %s5123_s3 }
  0x37   : > { %p3740_p10 = pnand %p5065_p8, %p3738_p0 }
  0x39   : > { %p3741_p13 = pneg %p3740_p10 }
  0x3b   : > { %p3746_p1 = pnand %p3744_p4, %p3741_p13 }
  0x3d   : > { %3749 = shalt.err (!%p3746_p1)
}
  0x3e   : > { %s3750_s26 = scalar_lea.vmem %s291_s21, 4096  ;;  %p3758_p9 = scmp.lt.s32.totalorder %s291_s21, %s291_s21 }
  0x3f   : > { %p3751_p6 = scmp.ne.s32.totalorder %s291_s21, %s3750_s26  ;;  %p3759_p5 = scmp.lt.s32.totalorder %s3750_s26, %s3750_s26 }
  0x41   : > { %p3753_p12 = pnand %p3751_p6, %p5065_p8  ;;  %p3760_p3 = por %p3759_p5, %p3758_p9 }
  0x43   : > { %p3754_p11 = pneg %p3753_p12 }
  0x45   : > { %p3761_p2 = pnand %p3760_p3, %p3754_p11 }
  0x47   : > { %3764 = shalt.err (!%p3761_p2)
}
  0x48   : > { %s4136_s8 = smov 1024   ;;  %s5055_s7 = smov 64  }
  0x49   : > { %3431 = dma.hbm_to_vmem [thread:$0]  (!%p4329_p7), %s5123_s3, 4096, %s291_s21, [#allocation13], %s4136_s8, %s4136_s8, %s5055_s7  }
  0x4a   : > { %p61_p1 = scmp.ne.s32.totalorder %s4113_s13, %s4109_s12  ;;  %p5067_p3 = scmp.eq.s32.totalorder %s4133_s18, 0 }
  0x4b   : > { %p5066_p5 = scmp.lt.s32.totalorder %s4133_s18, 6  ;;  %s4363_s24 = sand.u32 1, %s4113_s13  }
  0x4c   : > { %p63_p6 = por %p5067_p3, %p61_p1  ;;  %p5124_p9 = scmp.eq.s32.totalorder %s4274_s19, 5 }
  0x4d   : > { %s5063_s20 = sshll.u32 %s4363_s24, 4  ;;  %s5064_s21 = sshll.u32 %s4129_s17, 8 }
  0x4e   : > { %p4369_p11 = por %p5124_p9, %p61_p1  ;;  %p4377_p12 = pnand %p5066_p5, %p63_p6 }
  0x4f   : > { %s5128_s1 = sld [smem:[#allocation48_spill]]  ;;  %s340_s11 = scalar_lea.vmem [#allocation9], %s5063_s20 }
  0x50   : > { %s5125_s25 = scalar_select %p4369_p11, 1, 0 }
  0x51   : > { %s5127_s14 = scalar_select %p4377_p12, 1, 0 }
  0x52   : > { %5126 = sst [smem:[#allocation42_spill]] %s5125_s25  ;;  %s347_s26 = sshll.u32 %s340_s11, 4  ;;  %s4391_s26 = int_to_ptr.vmem [resolvable:$true] %s347_s26 }
  0x53   : > { %s5129_s3 = sand.u32 1, %s4133_s18   ;;  %p4401_p0 = pneg %p4377_p12 }
  0x54   : > { %s4395_s25 = scalar_lea.sflag [#allocation10], %s5129_s3 }
  0x55   : > { %s4387_s7 = scalar_lea.hbm %s5128_s1, %s5064_s21  ;;  %5130 = sst [smem:[#allocation43_spill]] %s4395_s25 }
  0x56   : > { %s3765_s28 = scalar_lea.hbm %s4387_s7, 256  ;;  %s3770_s11 = scalar_lea.hbm %s5128_s1, 768 }
  0x57   : > { %p3766_p2 = scmp.ne.s32.totalorder %s4387_s7, %s3765_s28  ;;  %p3771_p4 = scmp.lt.u32.totalorder %s4387_s7, %s5128_s1 }
  0x58   : > { %s5131_s23 = scalar_select %p4401_p0, 1, 0 }
  0x59   : > { %p3768_p10 = pnand %p4401_p0, %p3766_p2  ;;  %p3772_p1 = scmp.lt.u32.totalorder %s3770_s11, %s3765_s28 }
  0x5a   : > { %p3774_p9 = scmp.lt.u32.totalorder %s3765_s28, %s4387_s7 }
  0x5b   : > { %p3769_p13 = pneg %p3768_p10  ;;  %p3773_p6 = por %p3772_p1, %p3771_p4 }
  0x5d   : > { %p3775_p8 = por %p3774_p9, %p3773_p6 }
  0x5f   : > { %p3776_p5 = pnand %p3775_p8, %p3769_p13 }
  0x61   : > { %3779 = shalt.err (!%p3776_p5)
}
  0x62   : > { %s3780_s3 = scalar_lea.vmem %s4391_s26, 256  ;;  %s4138_s8 = smov [#allocation9]  }
  0x63   : > { %p3781_p2 = scmp.ne.s32.totalorder %s4391_s26, %s3780_s3  ;;  %s3785_s15 = sshll.u32 %s4138_s8, 4  ;;  %s3786_s15 = int_to_ptr.vmem [resolvable:$false] %s3785_s15 }
  0x64   : > { %s3787_s20 = scalar_lea.vmem %s3786_s15, 512  ;;  %p3788_p11 = scmp.lt.s32.totalorder %s4391_s26, %s3786_s15 }
  0x65   : > { %p3783_p10 = pnand %p3781_p2, %p4401_p0  ;;  %p3789_p7 = scmp.lt.s32.totalorder %s3787_s20, %s3780_s3 }
  0x67   : > { %p3784_p3 = pneg %p3783_p10  ;;  %p3790_p4 = por %p3789_p7, %p3788_p11 }
  0x69   : > { %p3791_p1 = pnand %p3790_p4, %p3784_p3 }
  0x6b   : > { %3794 = shalt.err (!%p3791_p1)
}
  0x6c   : > { %s5077_s28 = smov 128   ;;  %s5076_s21 = smov 8  }
  0x6d   : > { %3441 = dma.hbm_to_vmem [thread:$0]  (!%p4377_p12), %s4387_s7, 256, %s4391_s26, %s4395_s25, %s5077_s28, %s5077_s28, %s5076_s21  }
  0x6e   : > { %s5132_s11 = sshll.u32 %s4129_s17, 8  ;;  %s5133_s20 = sshll.u32 %s4363_s24, 4 }
  0x6f   : > { %s4433_s15 = scalar_lea.hbm %s5032_s2, %s5132_s11  ;;  %s361_s1 = scalar_lea.vmem [#allocation11], %s5133_s20 }
  0x70   : > { %s368_s19 = sshll.u32 %s361_s1, 4  ;;  %s174_s22 = sadd.s32 1, %s4101_s10  ;;  %s4437_s19 = int_to_ptr.vmem [resolvable:$true] %s368_s19 }
  0x71   : > { %5134 = sst [smem:[#allocation44_spill]] %s4437_s19  ;;  %s44_s12 = sadd.s32 1, %s4125_s16 }
  0x72   : > { %p181_p7 = scmp.ne.s32.totalorder %s4101_s10, %s4097_s9  ;;  %p45_p8 = scmp.ge.s32.totalorder %s44_s12, 2 }
  0x73   : > { %p5135_p3 = scmp.eq.s32.totalorder %s4133_s18, 0  ;;  %s5081_s26 = sand.u32 1, %s4101_s10  }
  0x74   : > { %s5212_s12 = smov (%p45_p8, %s44_s12), 0  ;;  %s5138_s11 = sadd.s32 1, %s4129_s17 }
  0x75   : > { %p4445_p5 = por %p181_p7, %p5135_p3  ;;  %5137 = sst [smem:[#allocation45_spill]] %s5212_s12 }
  0x76   : > { %s5214_s11 = smov (!%p45_p8, %s5138_s11), %s4129_s17  ;;  %s171_s1 = ssub.s32 %s4125_s16, %s5212_s12 }
  0x77   : > { %s3020_s3 = sshll.u32 %s5081_s26, 10  ;;  %p49_p11 = scmp.ge.s32.totalorder %s5214_s11, 3 }
  0x78   : > { %p172_p13 = scmp.eq.s32.totalorder %s171_s1, 0  ;;  %s3021_s8 = sshll.u32 %s4125_s16, 6 }
  0x79   : > { %s5216_s11 = smov (%p49_p11, %s5214_s11), 0  ;;  %s5140_s5 = sld [smem:[#allocation50_spill]] }
  0x7a   : > { %5139 = sst [smem:[#allocation46_spill]] %s5216_s11  ;;  %s51_s21 = ssub.s32 %s4129_s17, %s5216_s11 }
  0x7b   : > { %s4463_s20 = scalar_select %p172_p13, %s4101_s10, %s174_s22  }
  0x7c   : > { %p52_p6 = scmp.eq.s32.totalorder %s51_s21, 0  ;;  %s225_s26 = sor.u32 %s171_s1, %s51_s21 }
  0x7d   : > { %p226_p9 = scmp.eq.s32.totalorder %s225_s26, 0  ;;  %s382_s12 = scalar_lea.vmem [#allocation15], %s3020_s3 }
  0x7e   : > { %s388_s6 = sshll.u32 %s382_s12, 4  ;;  %s5141_s16 = sadd.s32 1, %s4113_s13  ;;  %s4482_s6 = int_to_ptr.vmem [resolvable:$true] %s388_s6 }
  0x7f   : > { %s4470_s30 = scalar_lea.hbm %s5140_s5, %s3021_s8  ;;  %s5143_s19 = sadd.s32 1, %s4089_s29 }
  0x80   : > { %s4475_s25 = scalar_select %p52_p6, %s4113_s13, %s5141_s16  }
  0x81   : > { %s4480_s22 = scalar_select %p226_p9, %s4089_s29, %s5143_s19  }
  0x82   : > { %5142 = sst [smem:[#allocation47_spill]] %s4475_s25  ;;  %p5144_p2 = scmp.lt.s32.totalorder %s4133_s18, 6 }
  0x83   : > { %s4141_s28 = smov [#allocation14]   ;;  %s5146_s12 = sand.u32 1, %s4133_s18  }
  0x84   : > { %p4488_p10 = pnand %p5144_p2, %p4445_p5  ;;  %s4492_s21 = sshll.u32 %s4141_s28, 4  ;;  %s305_s21 = int_to_ptr.vmem [resolvable:$true] %s4492_s21 }
  0x85   : > { %s4496_s16 = scalar_lea.sflag [#allocation16], %s5146_s12  ;;  %s3795_s26 = scalar_lea.hbm %s4470_s30, 16384 }
  0x86   : > { %s5145_s9 = scalar_select %p4488_p10, 1, 0 }
  0x87   : > { %p3796_p4 = scmp.ne.s32.totalorder %s4470_s30, %s3795_s26  ;;  %p5090_p1 = pneg %p4488_p10 }
  0x88   : > { %s3800_s1 = scalar_lea.hbm %s5140_s5, 32768  ;;  %p3801_p3 = scmp.lt.u32.totalorder %s4470_s30, %s5140_s5 }
  0x89   : > { %p3798_p7 = pnand %p5090_p1, %p3796_p4  ;;  %p3802_p5 = scmp.lt.u32.totalorder %s3800_s1, %s3795_s26 }
  0x8a   : > { %p3804_p13 = scmp.lt.u32.totalorder %s3795_s26, %s4470_s30 }
  0x8b   : > { %p3799_p8 = pneg %p3798_p7  ;;  %p3803_p11 = por %p3802_p5, %p3801_p3 }
  0x8d   : > { %p3805_p6 = por %p3804_p13, %p3803_p11 }
  0x8f   : > { %p3806_p9 = pnand %p3805_p6, %p3799_p8 }
  0x91   : > { %3809 = shalt.err (!%p3806_p9)
}
  0x92   : > { %s3810_s28 = scalar_lea.vmem %s4482_s6, 16384  ;;  %s4142_s12 = smov [#allocation15]  }
  0x93   : > { %p3811_p2 = scmp.ne.s32.totalorder %s4482_s6, %s3810_s28  ;;  %s3815_s19 = sshll.u32 %s4142_s12, 4  ;;  %s3816_s19 = int_to_ptr.vmem [resolvable:$false] %s3815_s19 }
  0x94   : > { %s3817_s7 = scalar_lea.vmem %s3816_s19, 32768  ;;  %p3818_p12 = scmp.lt.s32.totalorder %s4482_s6, %s3816_s19 }
  0x95   : > { %p3813_p4 = pnand %p3811_p2, %p5090_p1  ;;  %p3819_p3 = scmp.lt.s32.totalorder %s3817_s7, %s3810_s28 }
  0x97   : > { %p3814_p7 = pneg %p3813_p4  ;;  %p3820_p5 = por %p3819_p3, %p3818_p12 }
  0x99   : > { %p3821_p11 = pnand %p3820_p5, %p3814_p7 }
  0x9b   : > { %3824 = shalt.err (!%p3821_p11)
}
  0x9c   : > { %s4143_s26 = smov 4   ;;  %s5147_s1 = smov 64  }
  0x9d   : > { %s5148_s3 = smov 128   ;;  %s3011_s8 = sshll.u32 %s4363_s24, 3 }
  0x9e   : > { %3447 = dma.hbm_to_vmem [thread:$0]  (!%p4488_p10), %s4470_s30, 16384, %s4482_s6, %s4496_s16, %s5148_s3, %s5147_s1, %s4143_s26  }
  0x9f   : > { %s3825_s19 = scalar_lea.hbm %s5034_s4, 256  ;;  %p5149_p8 = scmp.ne.s32.totalorder %s5122_s27, 0 }
  0xa0   : > { %p3826_p12 = scmp.ne.s32.totalorder %s5034_s4, %s3825_s19  ;;  %p3832_p2 = scmp.lt.u32.totalorder %s3825_s19, %s5034_s4 }
  0xa1   : > { %p5150_p13 = pneg %p5149_p8 }
  0xa3   : > { %p3828_p6 = pnand %p3826_p12, %p5150_p13 }
  0xa5   : > { %p3829_p9 = pneg %p3828_p6 }
  0xa7   : > { %p3834_p4 = pnand %p3832_p2, %p3829_p9 }
  0xa9   : > { %3837 = shalt.err (!%p3834_p4)
}
  0xaa   : > { %s3838_s6 = scalar_lea.vmem %s305_s21, 256  ;;  %p5151_p3 = pmov %p5150_p13 }
  0xab   : > { %p3839_p7 = scmp.ne.s32.totalorder %s305_s21, %s3838_s6  ;;  %p3846_p1 = scmp.lt.s32.totalorder %s305_s21, %s305_s21 }
  0xac   : > { %p3847_p10 = scmp.lt.s32.totalorder %s3838_s6, %s3838_s6 }
  0xad   : > { %p3841_p5 = pnand %p3839_p7, %p5151_p3 }
  0xae   : > { %p3848_p0 = por %p3847_p10, %p3846_p1 }
  0xaf   : > { %p3842_p11 = pneg %p3841_p5 }
  0xb1   : > { %p3849_p12 = pnand %p3848_p0, %p3842_p11 }
  0xb3   : > { %3852 = shalt.err (!%p3849_p12)
}
  0xb4   : > { %3434 = dma.hbm_to_vmem [thread:$0]  (!%p5149_p8), %s5034_s4, 256, %s305_s21, [#allocation13]  }
  0xb5   : > { %s3218_s25 = sshll.u32 %s4129_s17, 7  ;;  %s319_s19 = scalar_lea.vmem [#allocation6], %s3011_s8 }
  0xb6   : > { %s4553_s28 = scalar_lea.hbm %s5030_s0, %s3218_s25  ;;  %s326_s7 = sshll.u32 %s319_s19, 4  ;;  %s4555_s7 = int_to_ptr.vmem [resolvable:$true] %s326_s7 }
  0xb7   : > { %s316_s27 = scalar_lea.sflag [#allocation7], %s4363_s24  ;;  %s3853_s6 = scalar_lea.hbm %s4553_s28, 128 }
  0xb8   : > { %p3854_p0 = scmp.ne.s32.totalorder %s4553_s28, %s3853_s6  ;;  %p5152_p10 = scmp.ne.s32.totalorder %s5131_s23, 0 }
  0xb9   : > { %s3858_s30 = scalar_lea.hbm %s5030_s0, 384  ;;  %p3859_p13 = scmp.lt.u32.totalorder %s4553_s28, %s5030_s0 }
  0xba   : > { %p3856_p1 = pnand %p3854_p0, %p5152_p10  ;;  %p3860_p6 = scmp.lt.u32.totalorder %s3858_s30, %s3853_s6 }
  0xbb   : > { %p3862_p2 = scmp.lt.u32.totalorder %s3853_s6, %s4553_s28 }
  0xbc   : > { %p3857_p8 = pneg %p3856_p1  ;;  %p3861_p9 = por %p3860_p6, %p3859_p13 }
  0xbe   : > { %p3863_p4 = por %p3862_p2, %p3861_p9 }
  0xc0   : > { %p3864_p7 = pnand %p3863_p4, %p3857_p8 }
  0xc2   : > { %3867 = shalt.err (!%p3864_p7)
}
  0xc3   : > { %s3868_s8 = scalar_lea.vmem %s4555_s7, 128  ;;  %s4144_s12 = smov [#allocation6]  }
  0xc4   : > { %p3869_p3 = scmp.ne.s32.totalorder %s4555_s7, %s3868_s8  ;;  %s3873_s19 = sshll.u32 %s4144_s12, 4  ;;  %s3874_s19 = int_to_ptr.vmem [resolvable:$false] %s3873_s19 }
  0xc5   : > { %s3875_s21 = scalar_lea.vmem %s3874_s19, 256  ;;  %p3876_p12 = scmp.lt.s32.totalorder %s4555_s7, %s3874_s19 }
  0xc6   : > { %p3871_p5 = pnand %p3869_p3, %p5152_p10  ;;  %p3877_p0 = scmp.lt.s32.totalorder %s3875_s21, %s3868_s8 }
  0xc8   : > { %p3872_p11 = pneg %p3871_p5  ;;  %p3878_p1 = por %p3877_p0, %p3876_p12 }
  0xca   : > { %p3879_p13 = pnand %p3878_p1, %p3872_p11 }
  0xcc   : > { %3882 = shalt.err (!%p3879_p13)
}
  0xcd   : > { %p5153_p8 = scmp.ne.s32.totalorder %s5127_s14, 0  ;;  %s3883_s6 = scalar_lea.hbm %s4433_s15, 256 }
  0xce   : > { %p3884_p6 = scmp.ne.s32.totalorder %s4433_s15, %s3883_s6  ;;  %s3888_s25 = scalar_lea.hbm %s5032_s2, 768 }
  0xcf   : > { %3438 = dma.hbm_to_vmem [thread:$0]  (!%p5153_p8), %s4553_s28, 128, %s4555_s7, %s316_s27, %s5147_s1, %s5147_s1, %s4143_s26  }
  0xd0   : > { %p3886_p9 = pnand %p3884_p6, %p5152_p10  ;;  %p3889_p4 = scmp.lt.u32.totalorder %s4433_s15, %s5032_s2 }
  0xd1   : > { %p3890_p7 = scmp.lt.u32.totalorder %s3888_s25, %s3883_s6  ;;  %p3892_p5 = scmp.lt.u32.totalorder %s3883_s6, %s4433_s15 }
  0xd2   : > { %p3887_p2 = pneg %p3886_p9 }
  0xd3   : > { %p3891_p3 = por %p3890_p7, %p3889_p4 }
  0xd5   : > { %p3893_p11 = por %p3892_p5, %p3891_p3 }
  0xd7   : > { %p3894_p12 = pnand %p3893_p11, %p3887_p2 }
  0xd9   : > { %3897 = shalt.err (!%p3894_p12)
}
  0xda   : > { %s5154_s24 = sld [smem:[#allocation44_spill]]  ;;  %s4145_s1 = smov [#allocation11]  }
  0xdb   : > { %s3903_s28 = sshll.u32 %s4145_s1, 4  ;;  %s3904_s28 = int_to_ptr.vmem [resolvable:$false] %s3903_s28 }
  0xdc   : > { %s3905_s7 = scalar_lea.vmem %s3904_s28, 512 }
  0xe0   : > { %s3898_s26 = scalar_lea.vmem %s5154_s24, 256  ;;  %p3906_p6 = scmp.lt.s32.totalorder %s5154_s24, %s3904_s28 }
  0xe1   : > { %p3899_p0 = scmp.ne.s32.totalorder %s5154_s24, %s3898_s26  ;;  %p3907_p9 = scmp.lt.s32.totalorder %s3905_s7, %s3898_s26 }
  0xe3   : > { %p3901_p1 = pnand %p3899_p0, %p5152_p10  ;;  %p3908_p4 = por %p3907_p9, %p3906_p6 }
  0xe5   : > { %p3902_p13 = pneg %p3901_p1 }
  0xe7   : > { %p3909_p7 = pnand %p3908_p4, %p3902_p13 }
  0xe9   : > { %3912 = shalt.err (!%p3909_p7)
}
  0xea   : > { %s5155_s27 = smov 8   ;;  %s5156_s12 = sld [smem:[#allocation43_spill]] }
  0xeb   : > { %s5157_s23 = sld [smem:[#allocation34_spill]]  ;;  %s5158_s21 = sand.u32 1, %s4101_s10  }
  0xec   : > { %s401_s6 = scalar_lea.vmem [#allocation17], %s5158_s21  ;;  %s5159_s11 = sld [smem:[#allocation51_spill]] }
  0xed   : > { %s408_s5 = sshll.u32 %s401_s6, 4  ;;  %p5161_p2 = scmp.ne.s32.totalorder %s5145_s9, 0  ;;  %s409_s5 = int_to_ptr.vmem [resolvable:$true] %s408_s5 }
  0xef   : > { %p5162_p3 = pneg %p5161_p2 }
  0xf0   : > { %3444 = dma.hbm_to_vmem [thread:$0]  (!%p5153_p8), %s4433_s15, 256, %s5154_s24, %s5156_s12, %s5148_s3, %s5148_s3, %s5155_s27  }
  0xf1   : > { %s3022_s19 = sshll.u32 %s5157_s23, 4 }
  0xf2   : > { %s5160_s8 = smov %s5159_s11  ;;  %s406_s26 = scalar_lea.hbm %s5159_s11, %s3022_s19 }
  0xf3   : > { %s3913_s14 = scalar_lea.hbm %s406_s26, 16  ;;  %s3918_s7 = scalar_lea.hbm %s5160_s8, 32 }
  0xf4   : > { %p3914_p10 = scmp.ne.s32.totalorder %s406_s26, %s3913_s14  ;;  %p3919_p8 = scmp.lt.u32.totalorder %s406_s26, %s5160_s8 }
  0xf5   : > { %p3920_p12 = scmp.lt.u32.totalorder %s3918_s7, %s3913_s14  ;;  %p3922_p1 = scmp.lt.u32.totalorder %s3913_s14, %s406_s26 }
  0xf6   : > { %p3916_p5 = pnand %p3914_p10, %p5162_p3 }
  0xf7   : > { %p3921_p0 = por %p3920_p12, %p3919_p8 }
  0xf8   : > { %p3917_p11 = pneg %p3916_p5 }
  0xf9   : > { %p3923_p13 = por %p3922_p1, %p3921_p0 }
  0xfb   : > { %p3924_p6 = pnand %p3923_p13, %p3917_p11 }
  0xfd   : > { %3927 = shalt.err (!%p3924_p6)
}
  0xfe   : > { %s3928_s24 = scalar_lea.vmem %s409_s5, 16  ;;  %p5163_p4 = pmov %p5162_p3 }
  0xff   : > { %p3929_p9 = scmp.ne.s32.totalorder %s409_s5, %s3928_s24  ;;  %s4146_s27 = smov [#allocation17]  }
 0x100   : > { %s3933_s12 = sshll.u32 %s4146_s27, 4  ;;  %s3934_s12 = int_to_ptr.vmem [resolvable:$false] %s3933_s12 }
 0x101   : > { %p3931_p7 = pnand %p3929_p9, %p5163_p4  ;;  %s3935_s23 = scalar_lea.vmem %s3934_s12, 32 }
 0x102   : > { %p3936_p3 = scmp.lt.s32.totalorder %s409_s5, %s3934_s12  ;;  %p3937_p5 = scmp.lt.s32.totalorder %s3935_s23, %s3928_s24 }
 0x103   : > { %p3932_p10 = pneg %p3931_p7 }
 0x104   : > { %p3938_p8 = por %p3937_p5, %p3936_p3 }
 0x106   : > { %p3939_p12 = pnand %p3938_p8, %p3932_p10 }
 0x108   : > { %3942 = shalt.err (!%p3939_p12)
}
 0x109   : > { %3450 = dma.hbm_to_vmem [thread:$0]  (!%p5161_p2), %s406_s26, 16, %s409_s5, %s4496_s16  }
 0x10a   : > { %s5164_s19 = sld [smem:[#allocation41_spill]] }
 0x110   : > { %p5165_p11 = scmp.ne.s32.totalorder %s5164_s19, 0 }
 0x111   : > { %s5166_s21 = sld [smem:[#allocation31_spill]] (!%p5165_p11)  ;;  %s5167_s6 = sld [smem:[#allocation36_spill]] (!%p5165_p11) }
 0x112   : > { %417 = sbr.rel (%p5165_p11) target bundleno = 1565 (0x61d), region = 48 }
 0x117   : > { %s4633_s30 = sand.u32 (!%p5165_p11), 1, %s5166_s21   ;;  %p5168_p0 = scmp.ne.s32.totalorder (!%p5165_p11), %s5167_s6, 0 }
 0x118   : > { %s3024_s25 = sshll.u32 (!%p5165_p11), %s4633_s30, 3  ;;  %s420_s11 = scalar_lea.sflag (!%p5165_p11), [#allocation7], %s4633_s30 }
 0x119   : > { %s4637_s14 = scalar_lea.vmem [#allocation6], %s3024_s25 }
 0x11a   : > { %4056 = dma.done.wait (%p5168_p0), %s420_s11, 128  }
 0x11b   : > { %4058 = vsyncadd (%p5168_p0), %s420_s11, 4294967168  ;;  %s5169_s9 = sld [smem:[#allocation35_spill]]  ;;  %s4645_s5 = sshll.u32 %s4633_s30, 4 }
 0x11c   : > { %s4648_s1 = scalar_lea.vmem [#allocation9], %s4645_s5 }
 0x121   : > { %s428_s16 = sand.u32 1, %s5169_s9  }
 0x122   : > { %s429_s26 = scalar_lea.sflag [#allocation10], %s428_s16 }
 0x123   : > { %4060 = dma.done.wait (%p5168_p0), %s429_s26, 512  }
 0x124   : > { %4062 = vsyncadd (%p5168_p0), %s429_s26, 4294966784  ;;  %s441_s28 = scalar_lea.vmem [#allocation11], %s4645_s5  ;;  %p5170_p2 = scmp.eq.s32.totalorder %s5169_s9, 0 }
 0x126   : > { %4064 = dma.done.wait (%p5170_p2), [#allocation13], 4352   ;;  %p5171_p1 = pmov %p5170_p2 }
 0x127   : > { %s5172_s7 = sld [smem:[#allocation29_spill]]  ;;  %s5173_s15 = sld [smem:[#allocation37_spill]] }
 0x128   : > { %4066 = vsyncadd (%p5171_p1), [#allocation13], 4294962944  ;;  %s455_s27 = scalar_lea.sflag [#allocation16], %s428_s16 }
 0x12d   : > { %s456_s3 = sand.u32 1, %s5172_s7   ;;  %p5174_p13 = scmp.ne.s32.totalorder %s5173_s15, 0 }
 0x12e   : > { %s3029_s24 = sshll.u32 %s456_s3, 10 }
 0x12f   : > { %s4660_s12 = scalar_lea.vmem [#allocation15], %s3029_s24 }
 0x130   : > { %4068 = dma.done.wait (%p5174_p13), %s455_s27, 16400  }
 0x131   : > { %4070 = vsyncadd (%p5174_p13), %s455_s27, 4294950896  ;;  %s5175_s23 = sld [smem:[#allocation28_spill]]  ;;  %s4671_s6 = scalar_lea.vmem [#allocation17], %s456_s3 }
 0x132   : > { %s4675_s11 = scalar_lea.vmem [#allocation19], %s4645_s5  ;;  %s5176_s9 = sld [smem:[#allocation32_spill]] }
 0x137   : > { %s513_s19 = sand.u32 1, %s5175_s23  }
 0x138   : > { %s4669_s21 = sshll.u32 %s513_s19, 3  ;;  %p3032_p6 = scmp.ne.s32.totalorder %s5176_s9, 0 }
 0x139   : > { %s515_s25 = scalar_lea.vmem [#allocation18], %s4669_s21  ;;  %v535_v0 = vld [vmem:[%s4648_s1] sm:$0xff] (!%p3032_p6)  ;;  %v536_v1 = vld [vmem:[%s4648_s1 + $0x8] sm:$0xff] (!%p3032_p6)  ;;  %v4147_v3 = vmov (!%p3032_p6), 0   ;;  %v4148_v28 = vmov (!%p3032_p6), 839922192   ;;  %v546_v30 = vlaneseq (!%p3032_p6) }
 0x13a   : > { %532 = sbr.rel (%p3032_p6) target bundleno = 696 (0x2b8), region = 80  ;;  %v561_v2 = vld [vmem:[#allocation12] sm:$0xff] (!%p3032_p6)  ;;  %3594 = vset.pattern.permute.xlu0 (!%p3032_p6), %v4147_v3  ;;  %v537_v4 = vpack.c.bf16 (!%p3032_p6), %v536_v1, %v535_v0  ;;  %v562_v6 = vld [vmem:[#allocation12 + $0x8] sm:$0xff] (!%p3032_p6)  ;;  %878 = vmatprep.mubr.bf16.mxu0 (!%p3032_p6), %v4147_v3  ;;  %v563_v20 = vld [vmem:[#allocation12 + $0x10] sm:$0xff] (!%p3032_p6)  ;;  %v544_v29 = vunpack.c.l.s4 (!%p3032_p6), %v4148_v28  ;;  %v4149_v31 = vmov (!%p3032_p6), 1985246804  }
 0x13b   : > { %v569_v5 = vld [vmem:[#allocation12 + $0x40] sm:$0xff] (!%p3032_p6)  ;;  %v570_v7 = vld [vmem:[#allocation12 + $0x48] sm:$0xff] (!%p3032_p6)  ;;  %921 = vmatprep.mubr.bf16.mxu1 (!%p3032_p6), %v4147_v3  ;;  %v571_v21 = vld [vmem:[#allocation12 + $0x50] sm:$0xff] (!%p3032_p6)  ;;  %v551_v32 = vunpack.c.l.s4 (!%p3032_p6), %v4149_v31  ;;  %v4683_v34 = vshrl.u32 (!%p3032_p6), %v546_v30, 7  ;;  %vm842_vm0 = vcmask (!%p3032_p6), 261120   ;;  %vm1254_vm1 = vcmask (!%p3032_p6), 7168  }
 0x13c   : > { %v3035_v8 = vcombine.high (!%p3032_p6), %v561_v2, %v569_v5  ;;  %v3037_v9 = vcombine.high (!%p3032_p6), %v562_v6, %v570_v7  ;;  %v3034_v10 = vcombine.low (!%p3032_p6), %v561_v2, %v569_v5  ;;  %v3036_v11 = vcombine.low (!%p3032_p6), %v562_v6, %v570_v7  ;;  %v577_v12 = vld [vmem:[#allocation12 + $0x80] sm:$0xff] (!%p3032_p6)  ;;  %540 = vperm.xlu0 (!%p3032_p6), %3594, %v537_v4   ;;  %v578_v14 = vld [vmem:[#allocation12 + $0x88] sm:$0xff] (!%p3032_p6)  ;;  %v564_v22 = vld [vmem:[#allocation12 + $0x18] sm:$0xff] (!%p3032_p6) }
 0x13d   : > { %v585_v13 = vld [vmem:[#allocation12 + $0xc0] sm:$0xff] (!%p3032_p6)  ;;  %v586_v15 = vld [vmem:[#allocation12 + $0xc8] sm:$0xff] (!%p3032_p6)  ;;  %v3038_v23 = vcombine.low (!%p3032_p6), %v563_v20, %v571_v21  ;;  %v3039_v24 = vcombine.high (!%p3032_p6), %v563_v20, %v571_v21  ;;  %v572_v25 = vld [vmem:[#allocation12 + $0x58] sm:$0xff] (!%p3032_p6)  ;;  %v545_v33 = vunpack.c.0.s8 (!%p3032_p6), %v544_v29  ;;  %v552_v35 = vunpack.c.0.s8 (!%p3032_p6), %v551_v32 }
 0x13e   : > { %846 = vmatprep.subr.bf16.mxu0 (!%p3032_p6), %v3035_v8  ;;  %889 = vmatprep.subr.bf16.mxu1 (!%p3032_p6), %v3037_v9  ;;  %v3051_v16 = vcombine.high (!%p3032_p6), %v577_v12, %v585_v13  ;;  %v3053_v17 = vcombine.high (!%p3032_p6), %v578_v14, %v586_v15  ;;  %v3050_v18 = vcombine.low (!%p3032_p6), %v577_v12, %v585_v13  ;;  %v533_v39 = vld [vmem:[%s4637_s14] sm:$0xf] (!%p3032_p6)  ;;  %v534_v40 = vld [vmem:[%s4637_s14 + $0x4] sm:$0xf] (!%p3032_p6)  ;;  %v565_v52 = vld [vmem:[#allocation12 + $0x20] sm:$0xff] (!%p3032_p6)  ;;  %v611_v28 = vsub.s32 (!%p3032_p6), 3, %v4683_v34 }
 0x13f   : > { %847 = vmatpush1.bf16.msra.mxu0 (!%p3032_p6), %v3034_v10  ;;  %890 = vmatpush1.bf16.msra.mxu1 (!%p3032_p6), %v3036_v11  ;;  %v3052_v19 = vcombine.low (!%p3032_p6), %v578_v14, %v586_v15  ;;  %v3040_v26 = vcombine.low (!%p3032_p6), %v564_v22, %v572_v25  ;;  %v3041_v27 = vcombine.high (!%p3032_p6), %v564_v22, %v572_v25  ;;  %v579_v43 = vld [vmem:[#allocation12 + $0x90] sm:$0xff] (!%p3032_p6)  ;;  %v580_v45 = vld [vmem:[#allocation12 + $0x98] sm:$0xff] (!%p3032_p6)  ;;  %v573_v53 = vld [vmem:[#allocation12 + $0x60] sm:$0xff] (!%p3032_p6)  ;;  %v599_v25 = vsub.s32 (!%p3032_p6), 0, %v4683_v34 }
 0x140   : > { %848 = vmatprep.subr.bf16.mxu0 (!%p3032_p6), %v3051_v16  ;;  %891 = vmatprep.subr.bf16.mxu1 (!%p3032_p6), %v3053_v17  ;;  %v548_v36 = vsub.s32 (!%p3032_p6), %v545_v33, %v4683_v34  ;;  %v555_v37 = vsub.s32 (!%p3032_p6), %v552_v35, %v4683_v34  ;;  %v587_v44 = vld [vmem:[#allocation12 + $0xd0] sm:$0xff] (!%p3032_p6)  ;;  %v588_v46 = vld [vmem:[#allocation12 + $0xd8] sm:$0xff] (!%p3032_p6)  ;;  %v566_v54 = vld [vmem:[#allocation12 + $0x28] sm:$0xff] (!%p3032_p6)  ;;  %v3043_v58 = vcombine.high (!%p3032_p6), %v565_v52, %v573_v53  ;;  %v615_v33 = vsub.s32 (!%p3032_p6), 4, %v4683_v34 }
 0x141   : > { %v3055_v50 = vcombine.high %v579_v43, %v587_v44  ;;  %v3057_v51 = vcombine.high %v580_v45, %v588_v46  ;;  %v574_v55 = vld [vmem:[#allocation12 + $0x68] sm:$0xff]  ;;  %v3054_v56 = vcombine.low %v579_v43, %v587_v44  ;;  %v3056_v57 = vcombine.low %v580_v45, %v588_v46  ;;  %v581_v60 = vld [vmem:[#allocation12 + $0xa0] sm:$0xff]  ;;  %v567_v5 = vld [vmem:[#allocation12 + $0x30] sm:$0xff] }
 0x142   : > { %v3045_v59 = vcombine.high %v566_v54, %v574_v55  ;;  %v589_v61 = vld [vmem:[#allocation12 + $0xe0] sm:$0xff]  ;;  %v582_v62 = vld [vmem:[#allocation12 + $0xa8] sm:$0xff]  ;;  %v3042_v0 = vcombine.low %v565_v52, %v573_v53  ;;  %v3044_v1 = vcombine.low %v566_v54, %v574_v55  ;;  %v575_v6 = vld [vmem:[#allocation12 + $0x70] sm:$0xff]  ;;  %v623_v35 = vsub.s32 6, %v4683_v34 }
 0x143   : > { %849 = vmatpush1.bf16.msra.mxu0 %v3050_v18  ;;  %892 = vmatpush1.bf16.msra.mxu1 %v3052_v19  ;;  %v590_v63 = vld [vmem:[#allocation12 + $0xe8] sm:$0xff]  ;;  %v3059_v2 = vcombine.high %v581_v60, %v589_v61  ;;  %v568_v7 = vld [vmem:[#allocation12 + $0x38] sm:$0xff]  ;;  %v3058_v9 = vcombine.low %v581_v60, %v589_v61  ;;  %v3047_v11 = vcombine.high %v567_v5, %v575_v6  ;;  %v583_v13 = vld [vmem:[#allocation12 + $0xb0] sm:$0xff] }
 0x144   : > { %932 = vmatprep.subr.bf16.mxu0 %v3039_v24  ;;  %975 = vmatprep.subr.bf16.mxu1 %v3041_v27  ;;  %v3061_v4 = vcombine.high %v582_v62, %v590_v63  ;;  %v576_v8 = vld [vmem:[#allocation12 + $0x78] sm:$0xff]  ;;  %v3060_v10 = vcombine.low %v582_v62, %v590_v63  ;;  %v591_v14 = vld [vmem:[#allocation12 + $0xf0] sm:$0xff]  ;;  %v3046_v17 = vcombine.low %v567_v5, %v575_v6  ;;  %v4151_v24 = vmov 0.0  }
 0x145   : > { %v3049_v12 = vcombine.high %v568_v7, %v576_v8  ;;  %v584_v15 = vld [vmem:[#allocation12 + $0xb8] sm:$0xff]  ;;  %v3048_v18 = vcombine.low %v568_v7, %v576_v8  ;;  %v3063_v19 = vcombine.high %v583_v13, %v591_v14  ;;  %v3062_v21 = vcombine.low %v583_v13, %v591_v14  ;;  %1257 = vst.msk [vmem:[#allocation4] sm:$0xff] %vm1254_vm1, %v4151_v24 }
 0x146   : > { %v592_v16 = vld [vmem:[#allocation12 + $0xf8] sm:$0xff]  ;;  %1258 = vst.msk [vmem:[#allocation4 + $0x8] sm:$0xff] %vm1254_vm1, %v4151_v24  ;;  %1259 = vst.msk [vmem:[#allocation5] sm:$0xff] %vm1254_vm1, %v4151_v24  ;;  %v603_v27 = vsub.s32 1, %v4683_v34 }
 0x147   : > { %v3065_v20 = vcombine.high %v584_v15, %v592_v16  ;;  %v3064_v22 = vcombine.low %v584_v15, %v592_v16  ;;  %1260 = vst.msk [vmem:[#allocation5 + $0x8] sm:$0xff] %vm1254_vm1, %v4151_v24 }
 0x1bb   : > { %v541_v38 = vpop.permute.xlu0 %540 }
 0x1bc   : > { %v549_v41 = vrot.slane %v541_v38, %v548_v36  ;;  %v556_v42 = vrot.slane %v541_v38, %v555_v37  ;;  %v619_v38 = vsub.s32 5, %v4683_v34 }
 0x1be   : > { %v559_v47 = vmul.bf16 %v549_v41, %v533_v39  ;;  %v560_v48 = vmul.bf16 %v556_v42, %v534_v40  ;;  %v627_v39 = vsub.s32 7, %v4683_v34 }
 0x1c0   : > { %v4689_v49 = vcombine.low %v559_v47, %v560_v48 }
 0x1c2   : > { %3066 = vmatmul.mubr.msk.bf16.vlgmr.msra.gmra.mrb[0].mxu0 %vm842_vm0, %v4689_v49  ;;  %3067 = vmatmul.mubr.msk.bf16.vlgmr.msra.gmra.mrb[0].mxu1 %vm842_vm0, %v4689_v49 }
 0x1c3   : > { %933 = vmatpush1.bf16.msra.mxu0 %v3038_v23  ;;  %976 = vmatpush1.bf16.msra.mxu1 %v3040_v26  ;;  %v4150_v23 = vmov -inf   ;;  %v593_v26 = vld [vmem:[#allocation14] sm:$0xff] }
 0x1c4   : > { %934 = vmatprep.subr.bf16.mxu0 %v3055_v50  ;;  %977 = vmatprep.subr.bf16.mxu1 %v3057_v51  ;;  %1255 = vst.msk [vmem:[#allocation3] sm:$0xff] %vm1254_vm1, %v4150_v23  ;;  %1256 = vst.msk [vmem:[#allocation3 + $0x8] sm:$0xff] %vm1254_vm1, %v4150_v23  ;;  %v600_v29 = vrot.slane %v593_v26, %v599_v25  ;;  %v604_v31 = vrot.slane %v593_v26, %v603_v27 }
 0x1c5   : > { %964 = vmatprep.mubr.bf16.mxu0 %v4147_v3  ;;  %1007 = vmatprep.mubr.bf16.mxu1 %v4147_v3  ;;  %v612_v32 = vrot.slane %v593_v26, %v611_v28  ;;  %v616_v52 = vrot.slane %v593_v26, %v615_v33  ;;  %v624_v53 = vrot.slane %v593_v26, %v623_v35 }
 0x1c7   : > { %935 = vmatpush1.bf16.msra.mxu0 %v3054_v56  ;;  %978 = vmatpush1.bf16.msra.mxu1 %v3056_v57  ;;  %v620_v56 = vrot.slane %v593_v26, %v619_v38  ;;  %v628_v57 = vrot.slane %v593_v26, %v627_v39 }
 0x1c8   : > { %1018 = vmatprep.subr.bf16.mxu0 %v3043_v58  ;;  %1061 = vmatprep.subr.bf16.mxu1 %v3045_v59 }
 0x1ca   : > { %3068 = vmatmul.mubr.msk.bf16.vlgmr.msra.gmra.mrb[4].mxu0 %vm842_vm0, %v4689_v49  ;;  %3069 = vmatmul.mubr.msk.bf16.vlgmr.msra.gmra.mrb[4].mxu1 %vm842_vm0, %v4689_v49 }
 0x1cb   : > { %1019 = vmatpush1.bf16.msra.mxu0 %v3042_v0  ;;  %1062 = vmatpush1.bf16.msra.mxu1 %v3044_v1 }
 0x1cc   : > { %1020 = vmatprep.subr.bf16.mxu0 %v3059_v2  ;;  %1063 = vmatprep.subr.bf16.mxu1 %v3061_v4 }
 0x1cd   : > { %1050 = vmatprep.mubr.bf16.mxu0 %v4147_v3  ;;  %1093 = vmatprep.mubr.bf16.mxu1 %v4147_v3 }
 0x1cf   : > { %1021 = vmatpush1.bf16.msra.mxu0 %v3058_v9  ;;  %1064 = vmatpush1.bf16.msra.mxu1 %v3060_v10  ;;  %v594_v9 = vld [vmem:[#allocation14 + $0x8] sm:$0xff] }
 0x1d0   : > { %1104 = vmatprep.subr.bf16.mxu0 %v3047_v11  ;;  %1147 = vmatprep.subr.bf16.mxu1 %v3049_v12 }
 0x1d2   : > { %3070 = vmatmul.mubr.msk.bf16.vlgmr.msra.gmra.mrb[8].mxu0 %vm842_vm0, %v4689_v49  ;;  %3071 = vmatmul.mubr.msk.bf16.vlgmr.msra.gmra.mrb[8].mxu1 %vm842_vm0, %v4689_v49 }
 0x1d3   : > { %1105 = vmatpush1.bf16.msra.mxu0 %v3046_v17  ;;  %1148 = vmatpush1.bf16.msra.mxu1 %v3048_v18 }
 0x1d4   : > { %1106 = vmatprep.subr.bf16.mxu0 %v3063_v19  ;;  %1149 = vmatprep.subr.bf16.mxu1 %v3065_v20 }
 0x1d5   : > { %1136 = vmatprep.mubr.bf16.mxu0 %v4147_v3  ;;  %1179 = vmatprep.mubr.bf16.mxu1 %v4147_v3  ;;  %v607_v3 = vsub.s32 2, %v4683_v34 }
 0x1d7   : > { %1107 = vmatpush1.bf16.msra.mxu0 %v3062_v21  ;;  %1150 = vmatpush1.bf16.msra.mxu1 %v3064_v22  ;;  %v608_v30 = vrot.slane %v593_v26, %v607_v3  ;;  %v632_v22 = vrot.slane %v594_v9, %v599_v25  ;;  %v640_v23 = vrot.slane %v594_v9, %v607_v3 }
 0x1da   : > { %3072 = vmatmul.mubr.msk.bf16.vlgmr.msra.gmra.mrb[12].mxu0 %vm842_vm0, %v4689_v49  ;;  %3073 = vmatmul.mubr.msk.bf16.vlgmr.msra.gmra.mrb[12].mxu1 %vm842_vm0, %v4689_v49 }
 0x295   : > { %v880_v36 = vpop.f32.mrb[0].mxu0  ;;  %v923_v37 = vpop.f32.mrb[0].mxu1 }
 0x296   : > { %v881_v40 = vadd.f32 %v880_v36, %v600_v29  ;;  %v924_v41 = vadd.f32 %v923_v37, %v608_v30  ;;  %v882_v42 = vpop.f32.mrb[1].mxu0  ;;  %v925_v43 = vpop.f32.mrb[1].mxu1 }
 0x297   : > { %v883_v44 = vadd.f32 %v882_v42, %v604_v31  ;;  %v926_v45 = vadd.f32 %v925_v43, %v612_v32  ;;  %v884_v46 = vpop.f32.mrb[2].mxu0  ;;  %v927_v47 = vpop.f32.mrb[2].mxu1 }
 0x298   : > { %v885_v48 = vadd.f32 %v884_v46, %v600_v29  ;;  %v928_v49 = vadd.f32 %v927_v47, %v608_v30  ;;  %v886_v50 = vpop.f32.mrb[3].mxu0  ;;  %v929_v51 = vpop.f32.mrb[3].mxu1  ;;  %v1190_v58 = vmax.f32 %v881_v40, 0.0  ;;  %v1192_v59 = vmax.f32 %v924_v41, 0.0 }
 0x299   : > { %v887_v54 = vadd.f32 %v886_v50, %v604_v31  ;;  %v930_v55 = vadd.f32 %v929_v51, %v612_v32  ;;  %v1191_v62 = vmax.f32 %v883_v44, 0.0  ;;  %v1193_v63 = vmax.f32 %v926_v45, 0.0 }
 0x29a   : > { %v1206_v60 = vmax.f32 %v885_v48, 0.0  ;;  %v1208_v61 = vmax.f32 %v928_v49, 0.0  ;;  %v636_v29 = vrot.slane %v594_v9, %v603_v27  ;;  %v644_v30 = vrot.slane %v594_v9, %v611_v28 }
 0x29b   : > { %v1207_v0 = vmax.f32 %v887_v54, 0.0  ;;  %v1209_v1 = vmax.f32 %v930_v55, 0.0 }
 0x29c   : > { %v1222_v2 = vpack.c.bf16 %v1206_v60, %v1190_v58  ;;  %v1224_v4 = vpack.c.bf16 %v1208_v61, %v1192_v59  ;;  %v648_v58 = vrot.slane %v594_v9, %v615_v33  ;;  %v656_v59 = vrot.slane %v594_v9, %v623_v35 }
 0x29d   : > { %v1223_v5 = vpack.c.bf16 %v1207_v0, %v1191_v62  ;;  %v1225_v6 = vpack.c.bf16 %v1209_v1, %v1193_v63  ;;  %v966_v7 = vpop.f32.mrb[4].mxu0  ;;  %v1009_v8 = vpop.f32.mrb[4].mxu1  ;;  %v652_v62 = vrot.slane %v594_v9, %v619_v38  ;;  %v660_v63 = vrot.slane %v594_v9, %v627_v39 }
 0x29e   : > { %1238 = vst [vmem:[#allocation2] sm:$0xff] %v1222_v2  ;;  %1240 = vst [vmem:[#allocation2 + $0x10] sm:$0xff] %v1224_v4  ;;  %v967_v10 = vadd.f32 %v966_v7, %v616_v52  ;;  %v1010_v11 = vadd.f32 %v1009_v8, %v624_v53  ;;  %v968_v12 = vpop.f32.mrb[5].mxu0  ;;  %v1011_v13 = vpop.f32.mrb[5].mxu1 }
 0x29f   : > { %1239 = vst [vmem:[#allocation2 + $0x8] sm:$0xff] %v1223_v5  ;;  %1241 = vst [vmem:[#allocation2 + $0x18] sm:$0xff] %v1225_v6  ;;  %v969_v14 = vadd.f32 %v968_v12, %v620_v56  ;;  %v1012_v15 = vadd.f32 %v1011_v13, %v628_v57  ;;  %v970_v16 = vpop.f32.mrb[6].mxu0  ;;  %v1013_v17 = vpop.f32.mrb[6].mxu1 }
 0x2a0   : > { %v971_v18 = vadd.f32 %v970_v16, %v616_v52  ;;  %v1014_v19 = vadd.f32 %v1013_v17, %v624_v53  ;;  %v972_v20 = vpop.f32.mrb[7].mxu0  ;;  %v1015_v21 = vpop.f32.mrb[7].mxu1  ;;  %v1194_v31 = vmax.f32 %v967_v10, 0.0  ;;  %v1196_v32 = vmax.f32 %v1010_v11, 0.0 }
 0x2a1   : > { %v973_v24 = vadd.f32 %v972_v20, %v620_v56  ;;  %v1016_v26 = vadd.f32 %v1015_v21, %v628_v57  ;;  %v1195_v40 = vmax.f32 %v969_v14, 0.0  ;;  %v1197_v41 = vmax.f32 %v1012_v15, 0.0 }
 0x2a2   : > { %v1210_v36 = vmax.f32 %v971_v18, 0.0  ;;  %v1212_v37 = vmax.f32 %v1014_v19, 0.0 }
 0x2a3   : > { %v1211_v42 = vmax.f32 %v973_v24, 0.0  ;;  %v1213_v43 = vmax.f32 %v1016_v26, 0.0 }
 0x2a4   : > { %v1226_v25 = vpack.c.bf16 %v1210_v36, %v1194_v31  ;;  %v1228_v44 = vpack.c.bf16 %v1212_v37, %v1196_v32 }
 0x2a5   : > { %v1227_v45 = vpack.c.bf16 %v1211_v42, %v1195_v40  ;;  %v1229_v3 = vpack.c.bf16 %v1213_v43, %v1197_v41  ;;  %v1052_v46 = vpop.f32.mrb[8].mxu0  ;;  %v1095_v47 = vpop.f32.mrb[8].mxu1 }
 0x2a6   : > { %1242 = vst [vmem:[#allocation2 + $0x20] sm:$0xff] %v1226_v25  ;;  %1244 = vst [vmem:[#allocation2 + $0x30] sm:$0xff] %v1228_v44  ;;  %v1053_v27 = vadd.f32 %v1052_v46, %v632_v22  ;;  %v1096_v48 = vadd.f32 %v1095_v47, %v640_v23  ;;  %v1054_v49 = vpop.f32.mrb[9].mxu0  ;;  %v1097_v28 = vpop.f32.mrb[9].mxu1 }
 0x2a7   : > { %1243 = vst [vmem:[#allocation2 + $0x28] sm:$0xff] %v1227_v45  ;;  %1245 = vst [vmem:[#allocation2 + $0x38] sm:$0xff] %v1229_v3  ;;  %v1055_v50 = vadd.f32 %v1054_v49, %v636_v29  ;;  %v1098_v51 = vadd.f32 %v1097_v28, %v644_v30  ;;  %v1056_v52 = vpop.f32.mrb[10].mxu0  ;;  %v1099_v53 = vpop.f32.mrb[10].mxu1 }
 0x2a8   : > { %v1057_v54 = vadd.f32 %v1056_v52, %v632_v22  ;;  %v1100_v55 = vadd.f32 %v1099_v53, %v640_v23  ;;  %v1058_v56 = vpop.f32.mrb[11].mxu0  ;;  %v1101_v57 = vpop.f32.mrb[11].mxu1  ;;  %v1198_v0 = vmax.f32 %v1053_v27, 0.0  ;;  %v1200_v1 = vmax.f32 %v1096_v48, 0.0 }
 0x2a9   : > { %v1059_v60 = vadd.f32 %v1058_v56, %v636_v29  ;;  %v1102_v61 = vadd.f32 %v1101_v57, %v644_v30  ;;  %v1199_v5 = vmax.f32 %v1055_v50, 0.0  ;;  %v1201_v6 = vmax.f32 %v1098_v51, 0.0 }
 0x2aa   : > { %v1214_v2 = vmax.f32 %v1057_v54, 0.0  ;;  %v1216_v4 = vmax.f32 %v1100_v55, 0.0 }
 0x2ab   : > { %v1215_v7 = vmax.f32 %v1059_v60, 0.0  ;;  %v1217_v8 = vmax.f32 %v1102_v61, 0.0 }
 0x2ac   : > { %v1230_v33 = vpack.c.bf16 %v1214_v2, %v1198_v0  ;;  %v1232_v10 = vpack.c.bf16 %v1216_v4, %v1200_v1 }
 0x2ad   : > { %v1231_v11 = vpack.c.bf16 %v1215_v7, %v1199_v5  ;;  %v1233_v35 = vpack.c.bf16 %v1217_v8, %v1201_v6  ;;  %v1138_v12 = vpop.f32.mrb[12].mxu0  ;;  %v1181_v13 = vpop.f32.mrb[12].mxu1 }
 0x2ae   : > { %1246 = vst [vmem:[#allocation2 + $0x40] sm:$0xff] %v1230_v33  ;;  %1248 = vst [vmem:[#allocation2 + $0x50] sm:$0xff] %v1232_v10  ;;  %v1139_v38 = vadd.f32 %v1138_v12, %v648_v58  ;;  %v1182_v14 = vadd.f32 %v1181_v13, %v656_v59  ;;  %v1140_v34 = vpop.f32.mrb[13].mxu0  ;;  %v1183_v39 = vpop.f32.mrb[13].mxu1 }
 0x2af   : > { %1247 = vst [vmem:[#allocation2 + $0x48] sm:$0xff] %v1231_v11  ;;  %1249 = vst [vmem:[#allocation2 + $0x58] sm:$0xff] %v1233_v35  ;;  %v1141_v9 = vadd.f32 %v1140_v34, %v652_v62  ;;  %v1184_v15 = vadd.f32 %v1183_v39, %v660_v63  ;;  %v1142_v16 = vpop.f32.mrb[14].mxu0  ;;  %v1185_v17 = vpop.f32.mrb[14].mxu1 }
 0x2b0   : > { %v1143_v18 = vadd.f32 %v1142_v16, %v648_v58  ;;  %v1186_v19 = vadd.f32 %v1185_v17, %v656_v59  ;;  %v1144_v20 = vpop.f32.mrb[15].mxu0  ;;  %v1187_v21 = vpop.f32.mrb[15].mxu1  ;;  %v1202_v24 = vmax.f32 %v1139_v38, 0.0  ;;  %v1204_v26 = vmax.f32 %v1182_v14, 0.0 }
 0x2b1   : > { %v1145_v22 = vadd.f32 %v1144_v20, %v652_v62  ;;  %v1188_v23 = vadd.f32 %v1187_v21, %v660_v63  ;;  %v1203_v31 = vmax.f32 %v1141_v9, 0.0  ;;  %v1205_v32 = vmax.f32 %v1184_v15, 0.0 }
 0x2b2   : > { %v1218_v29 = vmax.f32 %v1143_v18, 0.0  ;;  %v1220_v30 = vmax.f32 %v1186_v19, 0.0 }
 0x2b3   : > { %v1219_v36 = vmax.f32 %v1145_v22, 0.0  ;;  %v1221_v37 = vmax.f32 %v1188_v23, 0.0 }
 0x2b4   : > { %v1234_v40 = vpack.c.bf16 %v1218_v29, %v1202_v24  ;;  %v1236_v41 = vpack.c.bf16 %v1220_v30, %v1204_v26 }
 0x2b5   : > { %v1235_v42 = vpack.c.bf16 %v1219_v36, %v1203_v31  ;;  %v1237_v43 = vpack.c.bf16 %v1221_v37, %v1205_v32 }
 0x2b6   : > { %1250 = vst [vmem:[#allocation2 + $0x60] sm:$0xff] %v1234_v40  ;;  %1252 = vst [vmem:[#allocation2 + $0x70] sm:$0xff] %v1236_v41 }
 0x2b7   : > { %1251 = vst [vmem:[#allocation2 + $0x68] sm:$0xff] %v1235_v42  ;;  %1253 = vst [vmem:[#allocation2 + $0x78] sm:$0xff] %v1237_v43 }
 0x2b8 PF: > { %v3597_v25 = vld [vmem:[%s4660_s12 + $0x40] sm:$0xff]   ;;  %v3601_v46 = vld [vmem:[%s4660_s12 + $0x48] sm:$0xff]   ;;  %v3605_v49 = vld [vmem:[%s4660_s12 + $0x50] sm:$0xff]   ;;  %s5177_s14 = sld [smem:[#allocation32_spill]]  ;;  %vm2686_vm2 = vcmask 7168  }
 0x2b9   : > { %v3598_v44 = vld [vmem:[%s4660_s12 + $0xc0] sm:$0xff]   ;;  %3230 = vmatprep.subr.bf16.mxu0 %v3597_v25  ;;  %v3602_v47 = vld [vmem:[%s4660_s12 + $0xc8] sm:$0xff]   ;;  %v3606_v28 = vld [vmem:[%s4660_s12 + $0xd0] sm:$0xff]  }
 0x2ba   : > { %v3599_v45 = vld [vmem:[%s4660_s12] sm:$0xff]   ;;  %3252 = vmatprep.subr.bf16.mxu1 %v3598_v44  ;;  %v3603_v27 = vld [vmem:[%s4660_s12 + $0x8] sm:$0xff]   ;;  %v3607_v50 = vld [vmem:[%s4660_s12 + $0x10] sm:$0xff]  }
 0x2bb   : > { %v3600_v3 = vld [vmem:[%s4660_s12 + $0x80] sm:$0xff]   ;;  %3231 = vmatpush3.bf16.msra.mxu0 %v3599_v45  ;;  %v3604_v48 = vld [vmem:[%s4660_s12 + $0x88] sm:$0xff]   ;;  %v3608_v51 = vld [vmem:[%s4660_s12 + $0x90] sm:$0xff]  }
 0x2bc   : > { %3253 = vmatpush3.bf16.msra.mxu1 %v3600_v3  ;;  %3232 = vmatprep.subr.bf16.mxu0 %v3601_v46  ;;  %v3609_v52 = vld [vmem:[%s4660_s12 + $0x58] sm:$0xff]   ;;  %v3613_v56 = vld [vmem:[%s4660_s12 + $0x60] sm:$0xff]   ;;  %v3617_v60 = vld [vmem:[%s4660_s12 + $0x68] sm:$0xff]  }
 0x2bd   : > { %3254 = vmatprep.subr.bf16.mxu1 %v3602_v47  ;;  %v3610_v53 = vld [vmem:[%s4660_s12 + $0xd8] sm:$0xff]   ;;  %v3614_v57 = vld [vmem:[%s4660_s12 + $0xe0] sm:$0xff]   ;;  %v3618_v61 = vld [vmem:[%s4660_s12 + $0xe8] sm:$0xff]  }
 0x2be   : > { %v3611_v54 = vld [vmem:[%s4660_s12 + $0x18] sm:$0xff]   ;;  %v3615_v58 = vld [vmem:[%s4660_s12 + $0x20] sm:$0xff]   ;;  %v3619_v62 = vld [vmem:[%s4660_s12 + $0x28] sm:$0xff]   ;;  %s3205_s16 = sshll.u32 %s5177_s14, 7  ;;  %p3206_p9 = scmp.ne.s32.totalorder %s5177_s14, 1 }
 0x2bf   : > { %3233 = vmatpush3.bf16.msra.mxu0 %v3603_v27  ;;  %v3612_v55 = vld [vmem:[%s4660_s12 + $0x98] sm:$0xff]   ;;  %v3616_v59 = vld [vmem:[%s4660_s12 + $0xa0] sm:$0xff]   ;;  %v3620_v63 = vld [vmem:[%s4660_s12 + $0xa8] sm:$0xff]  }
 0x2c0   : > { %3255 = vmatpush3.bf16.msra.mxu1 %v3604_v48  ;;  %3234 = vmatprep.subr.bf16.mxu0 %v3605_v49  ;;  %v3621_v0 = vld [vmem:[%s4660_s12 + $0x70] sm:$0xff]   ;;  %v3625_v5 = vld [vmem:[%s4660_s12 + $0x78] sm:$0xff]   ;;  %v1264_v10 = vld [vmem:[#allocation2 + $0x18] sm:$0xff] }
 0x2c1   : > { %3256 = vmatprep.subr.bf16.mxu1 %v3606_v28  ;;  %v3622_v1 = vld [vmem:[%s4660_s12 + $0xf0] sm:$0xff]   ;;  %v3626_v6 = vld [vmem:[%s4660_s12 + $0xf8] sm:$0xff]   ;;  %v1263_v35 = vld [vmem:[#allocation2 + $0x10] sm:$0xff]  ;;  %2381 = vmatprep.mubr.bf16.mxu1 %v1264_v10 }
 0x2c2   : > { %v3623_v2 = vld [vmem:[%s4660_s12 + $0x30] sm:$0xff]   ;;  %v3627_v7 = vld [vmem:[%s4660_s12 + $0x38] sm:$0xff]   ;;  %v3629_v12 = vld [vmem:[%s4660_s12 + $0x140] sm:$0xff]  }
 0x2c3   : > { %3235 = vmatpush3.bf16.msra.mxu0 %v3607_v50  ;;  %v3624_v4 = vld [vmem:[%s4660_s12 + $0xb0] sm:$0xff]   ;;  %v3628_v8 = vld [vmem:[%s4660_s12 + $0xb8] sm:$0xff]   ;;  %v3630_v13 = vld [vmem:[%s4660_s12 + $0x1c0] sm:$0xff]  }
 0x2c4   : > { %3257 = vmatpush3.bf16.msra.mxu1 %v3608_v51  ;;  %3236 = vmatprep.subr.bf16.mxu0 %v3609_v52  ;;  %v1262_v33 = vld [vmem:[#allocation2 + $0x8] sm:$0xff]  ;;  %v1261_v11 = vld [vmem:[#allocation2] sm:$0xff]  ;;  %v3631_v38 = vld [vmem:[%s4660_s12 + $0x100] sm:$0xff]  }
 0x2c5   : > { %3258 = vmatprep.subr.bf16.mxu1 %v3610_v53  ;;  %2340 = vmatprep.mubr.bf16.mxu0 %v1262_v33  ;;  %v3632_v14 = vld [vmem:[%s4660_s12 + $0x180] sm:$0xff]   ;;  %v3633_v34 = vld [vmem:[%s4660_s12 + $0x148] sm:$0xff]   ;;  %v3637_v16 = vld [vmem:[%s4660_s12 + $0x150] sm:$0xff]  }
 0x2c6   : > { %v3634_v39 = vld [vmem:[%s4660_s12 + $0x1c8] sm:$0xff]   ;;  %v3638_v17 = vld [vmem:[%s4660_s12 + $0x1d0] sm:$0xff]   ;;  %v3641_v20 = vld [vmem:[%s4660_s12 + $0x158] sm:$0xff]  }
 0x2c7   : > { %3237 = vmatpush3.bf16.msra.mxu0 %v3611_v54  ;;  %v3635_v9 = vld [vmem:[%s4660_s12 + $0x108] sm:$0xff]   ;;  %v3639_v18 = vld [vmem:[%s4660_s12 + $0x110] sm:$0xff]   ;;  %v3642_v21 = vld [vmem:[%s4660_s12 + $0x1d8] sm:$0xff]  }
 0x2c8   : > { %3259 = vmatpush3.bf16.msra.mxu1 %v3612_v55  ;;  %3238 = vmatprep.subr.bf16.mxu0 %v3613_v56  ;;  %v3636_v15 = vld [vmem:[%s4660_s12 + $0x188] sm:$0xff]   ;;  %v3640_v19 = vld [vmem:[%s4660_s12 + $0x190] sm:$0xff]   ;;  %v3643_v22 = vld [vmem:[%s4660_s12 + $0x118] sm:$0xff]  }
 0x2c9   : > { %3260 = vmatprep.subr.bf16.mxu1 %v3614_v57  ;;  %v3644_v23 = vld [vmem:[%s4660_s12 + $0x198] sm:$0xff]   ;;  %v3645_v24 = vld [vmem:[%s4660_s12 + $0x160] sm:$0xff]   ;;  %v3649_v31 = vld [vmem:[%s4660_s12 + $0x168] sm:$0xff]  }
 0x2ca   : > { %v3646_v26 = vld [vmem:[%s4660_s12 + $0x1e0] sm:$0xff]   ;;  %v3650_v32 = vld [vmem:[%s4660_s12 + $0x1e8] sm:$0xff]   ;;  %v3653_v40 = vld [vmem:[%s4660_s12 + $0x170] sm:$0xff]  }
 0x2cb   : > { %3239 = vmatpush3.bf16.msra.mxu0 %v3615_v58  ;;  %v3647_v29 = vld [vmem:[%s4660_s12 + $0x120] sm:$0xff]   ;;  %v3651_v36 = vld [vmem:[%s4660_s12 + $0x128] sm:$0xff]   ;;  %v3654_v41 = vld [vmem:[%s4660_s12 + $0x1f0] sm:$0xff]  }
 0x2cc   : > { %3261 = vmatpush3.bf16.msra.mxu1 %v3616_v59  ;;  %3240 = vmatprep.subr.bf16.mxu0 %v3617_v60  ;;  %v3648_v30 = vld [vmem:[%s4660_s12 + $0x1a0] sm:$0xff]   ;;  %v3652_v37 = vld [vmem:[%s4660_s12 + $0x1a8] sm:$0xff]   ;;  %v3655_v42 = vld [vmem:[%s4660_s12 + $0x130] sm:$0xff]  }
 0x2cd   : > { %3262 = vmatprep.subr.bf16.mxu1 %v3618_v61  ;;  %v3656_v43 = vld [vmem:[%s4660_s12 + $0x1b0] sm:$0xff]   ;;  %v3657_v25 = vld [vmem:[%s4660_s12 + $0x178] sm:$0xff]   ;;  %v1268_v47 = vld [vmem:[#allocation2 + $0x38] sm:$0xff] }
 0x2ce   : > { %v3658_v44 = vld [vmem:[%s4660_s12 + $0x1f8] sm:$0xff]   ;;  %v1265_v27 = vld [vmem:[#allocation2 + $0x20] sm:$0xff]  ;;  %v1267_v48 = vld [vmem:[#allocation2 + $0x30] sm:$0xff] }
 0x2cf   : > { %3241 = vmatpush3.bf16.msra.mxu0 %v3619_v62  ;;  %v3659_v45 = vld [vmem:[%s4660_s12 + $0x138] sm:$0xff]   ;;  %v3661_v49 = vld [vmem:[%s4660_s12 + $0x240] sm:$0xff]   ;;  %v3665_v52 = vld [vmem:[%s4660_s12 + $0x248] sm:$0xff]  }
 0x2d0   : > { %3263 = vmatpush3.bf16.msra.mxu1 %v3620_v63  ;;  %3242 = vmatprep.subr.bf16.mxu0 %v3621_v0  ;;  %v3660_v3 = vld [vmem:[%s4660_s12 + $0x1b8] sm:$0xff]   ;;  %v3662_v28 = vld [vmem:[%s4660_s12 + $0x2c0] sm:$0xff]   ;;  %v3666_v53 = vld [vmem:[%s4660_s12 + $0x2c8] sm:$0xff]  }
 0x2d1   : > { %3264 = vmatprep.subr.bf16.mxu1 %v3622_v1  ;;  %v1266_v46 = vld [vmem:[#allocation2 + $0x28] sm:$0xff]  ;;  %v3663_v50 = vld [vmem:[%s4660_s12 + $0x200] sm:$0xff]   ;;  %v3667_v54 = vld [vmem:[%s4660_s12 + $0x208] sm:$0xff]  }
 0x2d2   : > { %v3664_v51 = vld [vmem:[%s4660_s12 + $0x280] sm:$0xff]   ;;  %v3668_v55 = vld [vmem:[%s4660_s12 + $0x288] sm:$0xff]   ;;  %v3669_v56 = vld [vmem:[%s4660_s12 + $0x250] sm:$0xff]  }
 0x2d3   : > { %3243 = vmatpush3.bf16.msra.mxu0 %v3623_v2  ;;  %v3670_v57 = vld [vmem:[%s4660_s12 + $0x2d0] sm:$0xff]   ;;  %v3673_v60 = vld [vmem:[%s4660_s12 + $0x258] sm:$0xff]   ;;  %v3677_v0 = vld [vmem:[%s4660_s12 + $0x260] sm:$0xff]  }
 0x2d4   : > { %3265 = vmatpush3.bf16.msra.mxu1 %v3624_v4  ;;  %3244 = vmatprep.subr.bf16.mxu0 %v3625_v5  ;;  %v3671_v58 = vld [vmem:[%s4660_s12 + $0x210] sm:$0xff]   ;;  %v3674_v61 = vld [vmem:[%s4660_s12 + $0x2d8] sm:$0xff]   ;;  %v3678_v1 = vld [vmem:[%s4660_s12 + $0x2e0] sm:$0xff]  }
 0x2d5   : > { %3266 = vmatprep.subr.bf16.mxu1 %v3626_v6  ;;  %v3672_v59 = vld [vmem:[%s4660_s12 + $0x290] sm:$0xff]   ;;  %v3675_v62 = vld [vmem:[%s4660_s12 + $0x218] sm:$0xff]   ;;  %v3679_v2 = vld [vmem:[%s4660_s12 + $0x220] sm:$0xff]  }
 0x2d6   : > { %v3676_v63 = vld [vmem:[%s4660_s12 + $0x298] sm:$0xff]   ;;  %v3680_v4 = vld [vmem:[%s4660_s12 + $0x2a0] sm:$0xff]   ;;  %v3681_v5 = vld [vmem:[%s4660_s12 + $0x268] sm:$0xff]  }
 0x2d7   : > { %3245 = vmatpush3.bf16.msra.mxu0 %v3627_v7  ;;  %v3682_v6 = vld [vmem:[%s4660_s12 + $0x2e8] sm:$0xff]   ;;  %v3685_v33 = vld [vmem:[%s4660_s12 + $0x270] sm:$0xff]  }
 0x2d8   : > { %3267 = vmatpush3.bf16.msra.mxu1 %v3628_v8  ;;  %3274 = vmatprep.subr.bf16.mxu0 %v3629_v12  ;;  %v3683_v7 = vld [vmem:[%s4660_s12 + $0x228] sm:$0xff]   ;;  %v3686_v10 = vld [vmem:[%s4660_s12 + $0x2f0] sm:$0xff]   ;;  %v3689_v12 = vld [vmem:[%s4660_s12 + $0x278] sm:$0xff]  }
 0x2d9   : > { %3296 = vmatprep.subr.bf16.mxu1 %v3630_v13  ;;  %v3684_v8 = vld [vmem:[%s4660_s12 + $0x2a8] sm:$0xff]   ;;  %v3690_v13 = vld [vmem:[%s4660_s12 + $0x2f8] sm:$0xff]  }
 0x2da   : > { %2341 = vmatmul.mubr.bf16.vlgmr.msra.gmra.mrb[0].mxu0 %v1261_v11  ;;  %v3687_v11 = vld [vmem:[%s4660_s12 + $0x230] sm:$0xff]  }
 0x2db   : > { %2382 = vmatmul.mubr.bf16.vlgmr.msra.gmra.mrb[0].mxu1 %v1263_v35  ;;  %3275 = vmatpush3.bf16.msra.mxu0 %v3631_v38  ;;  %v3688_v35 = vld [vmem:[%s4660_s12 + $0x2b0] sm:$0xff]   ;;  %v3691_v38 = vld [vmem:[%s4660_s12 + $0x238] sm:$0xff]  }
 0x2dc   : > { %3297 = vmatpush3.bf16.msra.mxu1 %v3632_v14  ;;  %3276 = vmatprep.subr.bf16.mxu0 %v3633_v34  ;;  %v3692_v14 = vld [vmem:[%s4660_s12 + $0x2b8] sm:$0xff]  }
 0x2dd   : > { %3298 = vmatprep.subr.bf16.mxu1 %v3634_v39  ;;  %2422 = vmatprep.mubr.bf16.mxu0 %v1266_v46  ;;  %v1270_v34 = vld [vmem:[#allocation2 + $0x48] sm:$0xff]  ;;  %v1272_v39 = vld [vmem:[#allocation2 + $0x58] sm:$0xff]  ;;  %v3717_v46 = vld [vmem:[%s4660_s12 + $0x370] sm:$0xff]  }
 0x2de   : > { %2463 = vmatprep.mubr.bf16.mxu1 %v1268_v47  ;;  %v3718_v47 = vld [vmem:[%s4660_s12 + $0x3f0] sm:$0xff]  }
 0x2df   : > { %3277 = vmatpush3.bf16.msra.mxu0 %v3635_v9  ;;  %v1269_v9 = vld [vmem:[#allocation2 + $0x40] sm:$0xff] }
 0x2e0   : > { %3299 = vmatpush3.bf16.msra.mxu1 %v3636_v15  ;;  %3278 = vmatprep.subr.bf16.mxu0 %v3637_v16  ;;  %v1271_v15 = vld [vmem:[#allocation2 + $0x50] sm:$0xff] }
 0x2e1   : > { %3300 = vmatprep.subr.bf16.mxu1 %v3638_v17  ;;  %v3693_v16 = vld [vmem:[%s4660_s12 + $0x340] sm:$0xff]  }
 0x2e2   : > { %v3694_v17 = vld [vmem:[%s4660_s12 + $0x3c0] sm:$0xff]  }
 0x2e3   : > { %3279 = vmatpush3.bf16.msra.mxu0 %v3639_v18  ;;  %v3695_v18 = vld [vmem:[%s4660_s12 + $0x300] sm:$0xff]  }
 0x2e4   : > { %3301 = vmatpush3.bf16.msra.mxu1 %v3640_v19  ;;  %3280 = vmatprep.subr.bf16.mxu0 %v3641_v20  ;;  %v3696_v19 = vld [vmem:[%s4660_s12 + $0x380] sm:$0xff]   ;;  %v3697_v20 = vld [vmem:[%s4660_s12 + $0x348] sm:$0xff]  }
 0x2e5   : > { %3302 = vmatprep.subr.bf16.mxu1 %v3642_v21  ;;  %v3698_v21 = vld [vmem:[%s4660_s12 + $0x3c8] sm:$0xff]  }
 0x2e7   : > { %3281 = vmatpush3.bf16.msra.mxu0 %v3643_v22  ;;  %v3699_v22 = vld [vmem:[%s4660_s12 + $0x308] sm:$0xff]  }
 0x2e8   : > { %3303 = vmatpush3.bf16.msra.mxu1 %v3644_v23  ;;  %3282 = vmatprep.subr.bf16.mxu0 %v3645_v24  ;;  %v3700_v23 = vld [vmem:[%s4660_s12 + $0x388] sm:$0xff]   ;;  %v3701_v24 = vld [vmem:[%s4660_s12 + $0x350] sm:$0xff]  }
 0x2e9   : > { %3304 = vmatprep.subr.bf16.mxu1 %v3646_v26  ;;  %v3702_v26 = vld [vmem:[%s4660_s12 + $0x3d0] sm:$0xff]  }
 0x2eb   : > { %3283 = vmatpush3.bf16.msra.mxu0 %v3647_v29  ;;  %v3703_v29 = vld [vmem:[%s4660_s12 + $0x310] sm:$0xff]  }
 0x2ec   : > { %3305 = vmatpush3.bf16.msra.mxu1 %v3648_v30  ;;  %3284 = vmatprep.subr.bf16.mxu0 %v3649_v31  ;;  %v3704_v30 = vld [vmem:[%s4660_s12 + $0x390] sm:$0xff]   ;;  %v3705_v31 = vld [vmem:[%s4660_s12 + $0x358] sm:$0xff]  }
 0x2ed   : > { %3306 = vmatprep.subr.bf16.mxu1 %v3650_v32  ;;  %v3706_v32 = vld [vmem:[%s4660_s12 + $0x3d8] sm:$0xff]  }
 0x2ef   : > { %3285 = vmatpush3.bf16.msra.mxu0 %v3651_v36  ;;  %v3707_v36 = vld [vmem:[%s4660_s12 + $0x318] sm:$0xff]  }
 0x2f0   : > { %3307 = vmatpush3.bf16.msra.mxu1 %v3652_v37  ;;  %3286 = vmatprep.subr.bf16.mxu0 %v3653_v40  ;;  %v3708_v37 = vld [vmem:[%s4660_s12 + $0x398] sm:$0xff]   ;;  %v3709_v40 = vld [vmem:[%s4660_s12 + $0x360] sm:$0xff]  }
 0x2f1   : > { %3308 = vmatprep.subr.bf16.mxu1 %v3654_v41  ;;  %v3710_v41 = vld [vmem:[%s4660_s12 + $0x3e0] sm:$0xff]  }
 0x2f3   : > { %3287 = vmatpush3.bf16.msra.mxu0 %v3655_v42  ;;  %v3711_v42 = vld [vmem:[%s4660_s12 + $0x320] sm:$0xff]  }
 0x2f4   : > { %3309 = vmatpush3.bf16.msra.mxu1 %v3656_v43  ;;  %3288 = vmatprep.subr.bf16.mxu0 %v3657_v25  ;;  %v3712_v43 = vld [vmem:[%s4660_s12 + $0x3a0] sm:$0xff]   ;;  %v3713_v25 = vld [vmem:[%s4660_s12 + $0x368] sm:$0xff]  }
 0x2f5   : > { %3310 = vmatprep.subr.bf16.mxu1 %v3658_v44  ;;  %v3714_v44 = vld [vmem:[%s4660_s12 + $0x3e8] sm:$0xff]  }
 0x2f7   : > { %3289 = vmatpush3.bf16.msra.mxu0 %v3659_v45  ;;  %v3715_v45 = vld [vmem:[%s4660_s12 + $0x328] sm:$0xff]  }
 0x2f8   : > { %3311 = vmatpush3.bf16.msra.mxu1 %v3660_v3  ;;  %3318 = vmatprep.subr.bf16.mxu0 %v3661_v49  ;;  %v3716_v3 = vld [vmem:[%s4660_s12 + $0x3a8] sm:$0xff]   ;;  %v3721_v49 = vld [vmem:[%s4660_s12 + $0x378] sm:$0xff]  }
 0x2f9   : > { %3340 = vmatprep.subr.bf16.mxu1 %v3662_v28  ;;  %v3722_v28 = vld [vmem:[%s4660_s12 + $0x3f8] sm:$0xff]  }
 0x2fa   : > { %2423 = vmatmul.mubr.bf16.vlgmr.msra.gmra.mrb[4].mxu0 %v1265_v27  ;;  %v3719_v27 = vld [vmem:[%s4660_s12 + $0x330] sm:$0xff]  }
 0x2fb   : > { %2464 = vmatmul.mubr.bf16.vlgmr.msra.gmra.mrb[4].mxu1 %v1267_v48  ;;  %3319 = vmatpush3.bf16.msra.mxu0 %v3663_v50  ;;  %v3720_v48 = vld [vmem:[%s4660_s12 + $0x3b0] sm:$0xff]   ;;  %v3723_v50 = vld [vmem:[%s4660_s12 + $0x338] sm:$0xff]  }
 0x2fc   : > { %3341 = vmatpush3.bf16.msra.mxu1 %v3664_v51  ;;  %3320 = vmatprep.subr.bf16.mxu0 %v3665_v52  ;;  %v3724_v51 = vld [vmem:[%s4660_s12 + $0x3b8] sm:$0xff]  }
 0x2fd   : > { %3342 = vmatprep.subr.bf16.mxu1 %v3666_v53  ;;  %2504 = vmatprep.mubr.bf16.mxu0 %v1270_v34  ;;  %v1274_v52 = vld [vmem:[#allocation2 + $0x68] sm:$0xff]  ;;  %v1276_v53 = vld [vmem:[#allocation2 + $0x78] sm:$0xff] }
 0x2fe   : > { %2545 = vmatprep.mubr.bf16.mxu1 %v1272_v39 }
 0x2ff   : > { %3321 = vmatpush3.bf16.msra.mxu0 %v3667_v54  ;;  %v1273_v54 = vld [vmem:[#allocation2 + $0x60] sm:$0xff] }
 0x300   : > { %3343 = vmatpush3.bf16.msra.mxu1 %v3668_v55  ;;  %3322 = vmatprep.subr.bf16.mxu0 %v3669_v56  ;;  %v1275_v55 = vld [vmem:[#allocation2 + $0x70] sm:$0xff]  ;;  %v4152_v56 = vmov 0  }
 0x301   : > { %3344 = vmatprep.subr.bf16.mxu1 %v3670_v57  ;;  %3596 = vset.pattern.permute.xlu0 %v4152_v56 }
 0x302   : > { %3595 = vset.pattern.permute.xlu1 %v4152_v56 }
 0x303   : > { %3323 = vmatpush3.bf16.msra.mxu0 %v3671_v58 }
 0x304   : > { %3345 = vmatpush3.bf16.msra.mxu1 %v3672_v59  ;;  %3324 = vmatprep.subr.bf16.mxu0 %v3673_v60  ;;  %v3074_v59 = vld [vmem:[%s4671_s6] ss:$0 sm:$0xff] }
 0x305   : > { %3346 = vmatprep.subr.bf16.mxu1 %v3674_v61 }
 0x307   : > { %3325 = vmatpush3.bf16.msra.mxu0 %v3675_v62 }
 0x308   : > { %3347 = vmatpush3.bf16.msra.mxu1 %v3676_v63  ;;  %3326 = vmatprep.subr.bf16.mxu0 %v3677_v0 }
 0x309   : > { %3348 = vmatprep.subr.bf16.mxu1 %v3678_v1 }
 0x30b   : > { %3327 = vmatpush3.bf16.msra.mxu0 %v3679_v2 }
 0x30c   : > { %3349 = vmatpush3.bf16.msra.mxu1 %v3680_v4  ;;  %3328 = vmatprep.subr.bf16.mxu0 %v3681_v5 }
 0x30d   : > { %3350 = vmatprep.subr.bf16.mxu1 %v3682_v6 }
 0x30f   : > { %3329 = vmatpush3.bf16.msra.mxu0 %v3683_v7 }
 0x310   : > { %3351 = vmatpush3.bf16.msra.mxu1 %v3684_v8  ;;  %3330 = vmatprep.subr.bf16.mxu0 %v3685_v33 }
 0x311   : > { %3352 = vmatprep.subr.bf16.mxu1 %v3686_v10 }
 0x313   : > { %3331 = vmatpush3.bf16.msra.mxu0 %v3687_v11 }
 0x314   : > { %3353 = vmatpush3.bf16.msra.mxu1 %v3688_v35  ;;  %3332 = vmatprep.subr.bf16.mxu0 %v3689_v12 }
 0x315   : > { %3354 = vmatprep.subr.bf16.mxu1 %v3690_v13 }
 0x317   : > { %3333 = vmatpush3.bf16.msra.mxu0 %v3691_v38 }
 0x318   : > { %3355 = vmatpush3.bf16.msra.mxu1 %v3692_v14  ;;  %3362 = vmatprep.subr.bf16.mxu0 %v3693_v16 }
 0x319   : > { %3384 = vmatprep.subr.bf16.mxu1 %v3694_v17 }
 0x31a   : > { %2505 = vmatmul.mubr.bf16.vlgmr.msra.gmra.mrb[8].mxu0 %v1269_v9 }
 0x31b   : > { %2546 = vmatmul.mubr.bf16.vlgmr.msra.gmra.mrb[8].mxu1 %v1271_v15  ;;  %3363 = vmatpush3.bf16.msra.mxu0 %v3695_v18 }
 0x31c   : > { %3385 = vmatpush3.bf16.msra.mxu1 %v3696_v19  ;;  %3364 = vmatprep.subr.bf16.mxu0 %v3697_v20 }
 0x31d   : > { %3386 = vmatprep.subr.bf16.mxu1 %v3698_v21  ;;  %2586 = vmatprep.mubr.bf16.mxu0 %v1274_v52 }
 0x31e   : > { %2627 = vmatprep.mubr.bf16.mxu1 %v1276_v53 }
 0x31f   : > { %3365 = vmatpush3.bf16.msra.mxu0 %v3699_v22 }
 0x320   : > { %3387 = vmatpush3.bf16.msra.mxu1 %v3700_v23  ;;  %3366 = vmatprep.subr.bf16.mxu0 %v3701_v24 }
 0x321   : > { %3388 = vmatprep.subr.bf16.mxu1 %v3702_v26 }
 0x323   : > { %3367 = vmatpush3.bf16.msra.mxu0 %v3703_v29 }
 0x324   : > { %3389 = vmatpush3.bf16.msra.mxu1 %v3704_v30  ;;  %3368 = vmatprep.subr.bf16.mxu0 %v3705_v31 }
 0x325   : > { %3390 = vmatprep.subr.bf16.mxu1 %v3706_v32 }
 0x327   : > { %3369 = vmatpush3.bf16.msra.mxu0 %v3707_v36 }
 0x328   : > { %3391 = vmatpush3.bf16.msra.mxu1 %v3708_v37  ;;  %3370 = vmatprep.subr.bf16.mxu0 %v3709_v40 }
 0x329   : > { %3392 = vmatprep.subr.bf16.mxu1 %v3710_v41 }
 0x32b   : > { %3371 = vmatpush3.bf16.msra.mxu0 %v3711_v42 }
 0x32c   : > { %3393 = vmatpush3.bf16.msra.mxu1 %v3712_v43  ;;  %3372 = vmatprep.subr.bf16.mxu0 %v3713_v25 }
 0x32d   : > { %3394 = vmatprep.subr.bf16.mxu1 %v3714_v44 }
 0x32f   : > { %3373 = vmatpush3.bf16.msra.mxu0 %v3715_v45 }
 0x330   : > { %3395 = vmatpush3.bf16.msra.mxu1 %v3716_v3  ;;  %3374 = vmatprep.subr.bf16.mxu0 %v3717_v46 }
 0x331   : > { %3396 = vmatprep.subr.bf16.mxu1 %v3718_v47 }
 0x333   : > { %3375 = vmatpush3.bf16.msra.mxu0 %v3719_v27 }
 0x334   : > { %3397 = vmatpush3.bf16.msra.mxu1 %v3720_v48  ;;  %3376 = vmatprep.subr.bf16.mxu0 %v3721_v49 }
 0x335   : > { %3398 = vmatprep.subr.bf16.mxu1 %v3722_v28 }
 0x337   : > { %3377 = vmatpush3.bf16.msra.mxu0 %v3723_v50 }
 0x338   : > { %3399 = vmatpush3.bf16.msra.mxu1 %v3724_v51 }
 0x33a   : > { %2587 = vmatmul.mubr.bf16.vlgmr.msra.gmra.mrb[12].mxu0 %v1273_v54 }
 0x33b   : > { %2628 = vmatmul.mubr.bf16.vlgmr.msra.gmra.mrb[12].mxu1 %v1275_v55 }
 0x3ad   : > { %v3246_v57 = vpop.f32.mrb[0].mxu0 }
 0x3ae   : > { %v3268_v58 = vpop.f32.mrb[0].mxu1  ;;  %v3247_v60 = vpop.f32.mrb[1].mxu0 }
 0x3af   : > { %v3248_v61 = vadd.f32 %v3247_v60, %v3246_v57  ;;  %v3269_v62 = vpop.f32.mrb[1].mxu1  ;;  %v3249_v63 = vpop.f32.mrb[2].mxu0  ;;  %v2646_v60 = vld [vmem:[#allocation3] sm:$0xff] }
 0x3b0   : > { %v3270_v0 = vadd.f32 %v3269_v62, %v3268_v58  ;;  %v3271_v1 = vpop.f32.mrb[2].mxu1  ;;  %v3250_v2 = vpop.f32.mrb[3].mxu0 }
 0x3b1   : > { %v2343_v4 = vadd.f32 %v3248_v61, %v3074_v59  ;;  %v3251_v5 = vadd.f32 %v3250_v2, %v3249_v63  ;;  %v3272_v6 = vpop.f32.mrb[3].mxu1  ;;  %v2691_v63 = vlaneseq }
 0x3b2   : > { %v3273_v7 = vadd.f32 %v3272_v6, %v3271_v1  ;;  %v2694_v6 = vstv %s3205_s16 }
 0x3b3   : > { %v2384_v8 = vadd.f32 %v3270_v0, %v2343_v4  ;;  %v2346_v33 = vadd.f32 %v3251_v5, %v3074_v59  ;;  %v2698_v59 = vld [vmem:[%s441_s28] sm:$0xff]  ;;  %v2647_v0 = vld [vmem:[#allocation3 + $0x8] sm:$0xff]  ;;  %v2692_v5 = vand.u32 127, %v2691_v63 }
 0x3b5   : > { %v2387_v10 = vadd.f32 %v3273_v7, %v2346_v33  ;;  %v2695_v33 = vadd.s32 %v2694_v6, %v2692_v5 }
 0x3cd   : > { %v3290_v11 = vpop.f32.mrb[4].mxu0 }
 0x3ce   : > { %v3312_v35 = vpop.f32.mrb[4].mxu1  ;;  %v3291_v12 = vpop.f32.mrb[5].mxu0 }
 0x3cf   : > { %v3292_v13 = vadd.f32 %v3291_v12, %v3290_v11  ;;  %v3313_v38 = vpop.f32.mrb[5].mxu1  ;;  %v3293_v14 = vpop.f32.mrb[6].mxu0 }
 0x3d0   : > { %v3314_v34 = vadd.f32 %v3313_v38, %v3312_v35  ;;  %v3315_v39 = vpop.f32.mrb[6].mxu1  ;;  %v3294_v9 = vpop.f32.mrb[7].mxu0 }
 0x3d1   : > { %v2425_v15 = vadd.f32 %v3292_v13, %v2384_v8  ;;  %v3295_v16 = vadd.f32 %v3294_v9, %v3293_v14  ;;  %v3316_v17 = vpop.f32.mrb[7].mxu1  ;;  %v2699_v8 = vld [vmem:[%s441_s28 + $0x8] sm:$0xff] }
 0x3d2   : > { %v3317_v18 = vadd.f32 %v3316_v17, %v3315_v39  ;;  %v2696_v17 = vld [vmem:[#allocation5] sm:$0xff] }
 0x3d3   : > { %v2466_v19 = vadd.f32 %v3314_v34, %v2425_v15  ;;  %v2428_v20 = vadd.f32 %v3295_v16, %v2387_v10 }
 0x3d5   : > { %v2469_v21 = vadd.f32 %v3317_v18, %v2428_v20 }
 0x3ed   : > { %v3334_v22 = vpop.f32.mrb[8].mxu0 }
 0x3ee   : > { %v3356_v23 = vpop.f32.mrb[8].mxu1  ;;  %v3335_v24 = vpop.f32.mrb[9].mxu0 }
 0x3ef   : > { %v3336_v26 = vadd.f32 %v3335_v24, %v3334_v22  ;;  %v3357_v29 = vpop.f32.mrb[9].mxu1  ;;  %v3337_v30 = vpop.f32.mrb[10].mxu0 }
 0x3f0   : > { %v3358_v31 = vadd.f32 %v3357_v29, %v3356_v23  ;;  %v3359_v32 = vpop.f32.mrb[10].mxu1  ;;  %v3338_v36 = vpop.f32.mrb[11].mxu0  ;;  %v2660_v23 = vld [vmem:[#allocation4] sm:$0xff] }
 0x3f1   : > { %v2507_v37 = vadd.f32 %v3336_v26, %v2466_v19  ;;  %v3339_v40 = vadd.f32 %v3338_v36, %v3337_v30  ;;  %v3360_v41 = vpop.f32.mrb[11].mxu1  ;;  %v2661_v30 = vld [vmem:[#allocation4 + $0x8] sm:$0xff] }
 0x3f2   : > { %v3361_v42 = vadd.f32 %v3360_v41, %v3359_v32 }
 0x3f3   : > { %v2548_v43 = vadd.f32 %v3358_v31, %v2507_v37  ;;  %v2510_v25 = vadd.f32 %v3339_v40, %v2469_v21  ;;  %v2697_v40 = vld [vmem:[#allocation5 + $0x8] sm:$0xff] }
 0x3f5   : > { %v2551_v44 = vadd.f32 %v3361_v42, %v2510_v25 }
 0x40d   : > { %v3378_v45 = vpop.f32.mrb[12].mxu0 }
 0x40e   : > { %v3400_v3 = vpop.f32.mrb[12].mxu1  ;;  %v3379_v46 = vpop.f32.mrb[13].mxu0 }
 0x40f   : > { %v3380_v47 = vadd.f32 %v3379_v46, %v3378_v45  ;;  %v3401_v27 = vpop.f32.mrb[13].mxu1  ;;  %v3381_v48 = vpop.f32.mrb[14].mxu0  ;;  %v2733_v45 = vld [vmem:[%s4648_s1 + $0x8] sm:$0xff] (!%p3206_p9) }
 0x410   : > { %v3402_v49 = vadd.f32 %v3401_v27, %v3400_v3  ;;  %v3403_v28 = vpop.f32.mrb[14].mxu1  ;;  %v3382_v50 = vpop.f32.mrb[15].mxu0  ;;  %vm2735_vm6 = vcmp.gt.f32.partialorder (!%p3206_p9), %v2733_v45, 0.5 }
 0x411   : > { %v2589_v51 = vadd.f32 %v3380_v47, %v2548_v43  ;;  %v3383_v52 = vadd.f32 %v3382_v50, %v3381_v48  ;;  %v3404_v53 = vpop.f32.mrb[15].mxu1 }
 0x412   : > { %v3405_v54 = vadd.f32 %v3404_v53, %v3403_v28 }
 0x413   : > { %v2630_v55 = vadd.f32 %v3402_v49, %v2589_v51  ;;  %v2592_v56 = vadd.f32 %v3383_v52, %v2551_v44  ;;  %v2732_v44 = vld [vmem:[%s4648_s1] sm:$0xff] (!%p3206_p9)  ;;  %v4153_v52 = vmov (!%p3206_p9), 0.0  }
 0x414   : > { %vm2734_vm5 = vcmp.gt.f32.partialorder (!%p3206_p9), %v2732_v44, 0.5 }
 0x415   : > { %v2633_v57 = vadd.f32 %v3405_v54, %v2592_v56  ;;  %2648 = vmax.xlane.f32.xlu0 %v2630_v55  ;;  %v3207_v53 = vsel (!%p3206_p9), %vm2734_vm5, 1.0, %v4153_v52  ;;  %v3208_v56 = vsel (!%p3206_p9), %vm2735_vm6, 1.0, %v4153_v52 }
 0x417   : > { %v3228_v58 = vpack.c.bf16 %v2633_v57, %v2630_v55 }
 0x419   : > { %3229 = vst [vmem:[%s515_s25] sm:$0xff] %v3228_v58   ;;  %2650 = vmax.xlane.f32.xlu0 %v2633_v57 }
 0x42f   : > { %2701 = vperm.xlu0 %3596, %v2698_v59  }
 0x4a2   : > { %v2649_v61 = vpop.xlane.xlu0 %2648 }
 0x4a3   : > { %v2652_v62 = vmax.f32 %v2646_v60, %v2649_v61 }
 0x4a5   : > { %v2654_v1 = vsub.f32 %v2646_v60, %v2652_v62  ;;  %2689 = vst.msk [vmem:[#allocation3] sm:$0xff] %vm2686_vm2, %v2652_v62  ;;  %2666 = vperm.xlu1 %3595, %v2652_v62  }
 0x4a6   : > { %v2651_v2 = vpop.xlane.xlu0 %2650 }
 0x4a7   : > { %v2653_v4 = vmax.f32 %v2647_v0, %v2651_v2  ;;  %v2656_v20 = vmul.f32 1.442695, %v2654_v1 }
 0x4a9   : > { %v2655_v7 = vsub.f32 %v2647_v0, %v2653_v4  ;;  %2690 = vst.msk [vmem:[#allocation3 + $0x8] sm:$0xff] %vm2686_vm2, %v2653_v4  ;;  %2671 = vperm.xlu1 %3595, %v2653_v4  }
 0x4ab   : > { %v2658_v21 = vmul.f32 1.442695, %v2655_v7 }
 0x4ac   : > { %v2722_v46 = vld [vmem:[#allocation3] sm:$0xff] (!%p3206_p9) }
 0x4ad   : > { %2704 = vperm.xlu1 %3595, %v2699_v8  }
 0x4ae   : > { %v2702_v10 = vpop.permute.xlu0 %2701 }
 0x4af   : > { %vm2706_vm3 = vcmp.eq.s32.totalorder %v2695_v33, %v2702_v10 }
 0x4b0   : > { %v2708_v11 = vsel %vm2706_vm3, %v2630_v55, 0.0  ;;  %v2723_v48 = vld [vmem:[#allocation3 + $0x8] sm:$0xff] (!%p3206_p9) }
 0x4b1   : > { %2710 = vadd.xlane.f32.xlu0 %v2708_v11 }
 0x524   : > { %v2667_v35 = vpop.permute.xlu1 %2666 }
 0x525   : > { %v2674_v12 = vsub.f32 %v2630_v55, %v2667_v35 }
 0x527   : > { %v2676_v13 = vmul.f32 1.442695, %v2674_v12 }
 0x528   : > { %v2672_v38 = vpop.permute.xlu1 %2671 }
 0x529   : > { %3725 = vpow2.f32 %v2676_v13  ;;  %v2675_v14 = vsub.f32 %v2633_v57, %v2672_v38 }
 0x52b   : > { %v2678_v34 = vmul.f32 1.442695, %v2675_v14 }
 0x52c   : > { %v2705_v9 = vpop.permute.xlu1 %2704 }
 0x52d   : > { %3727 = vpow2.f32 %v2678_v34  ;;  %vm2707_vm4 = vcmp.eq.s32.totalorder %v2695_v33, %v2705_v9 }
 0x52e   : > { %v2709_v16 = vsel %vm2707_vm4, %v2633_v57, 0.0  ;;  %3729 = vpow2.f32 %v2656_v20 }
 0x52f   : > { %3731 = vpow2.f32 %v2658_v21 }
 0x533   : > { %v3726_v39 = vpop.eup %3725 }
 0x534   : > { %2680 = vadd.xlane.f32.xlu1 %v3726_v39 }
 0x537   : > { %v3728_v15 = vpop.eup %3727 }
 0x538   : > { %2682 = vadd.xlane.f32.xlu1 %v3728_v15  ;;  %v3730_v22 = vpop.eup %3729 }
 0x539   : > { %v2662_v24 = vmul.f32 %v3730_v22, %v2660_v23  ;;  %v3732_v26 = vpop.eup %3731 }
 0x53a   : > { %v2663_v32 = vmul.f32 %v3732_v26, %v2661_v30 }
 0x53c   : > { %2712 = vadd.xlane.f32.xlu1 %v2709_v16 }
 0x53e   : > { %v2711_v18 = vpop.xlane.xlu0 %2710 }
 0x53f   : > { %v2714_v19 = vadd.f32 %v2711_v18, %v2696_v17 }
 0x541   : > { %2716 = vst.msk [vmem:[#allocation5] sm:$0xff] %vm2686_vm2, %v2714_v19 }
 0x548   : > { %v2740_v49 = vld [vmem:[#allocation5] sm:$0xff] (!%p3206_p9) }
 0x5c1   : > { %v2681_v29 = vpop.xlane.xlu1 %2680 }
 0x5c2   : > { %v2684_v31 = vadd.f32 %v2681_v29, %v2662_v24 }
 0x5c4   : > { %2687 = vst.msk [vmem:[#allocation4] sm:$0xff] %vm2686_vm2, %v2684_v31 }
 0x5c5   : > { %v2683_v36 = vpop.xlane.xlu1 %2682 }
 0x5c6   : > { %v2685_v37 = vadd.f32 %v2683_v36, %v2663_v32  ;;  %2721 = sbr.rel (%p3206_p9) target bundleno = 1508 (0x5e4), region = 84 }
 0x5c8   : > { %2688 = vst.msk [vmem:[#allocation4 + $0x8] sm:$0xff] %vm2686_vm2, %v2685_v37 }
 0x5c9   : > { %v2713_v41 = vpop.xlane.xlu1 %2712 }
 0x5ca   : > { %v2715_v42 = vadd.f32 %v2713_v41, %v2697_v40 }
 0x5cb   : > { %v2724_v43 = vld [vmem:[#allocation4] sm:$0xff] (!%p3206_p9) }
 0x5cc   : > { %2717 = vst.msk [vmem:[#allocation5 + $0x8] sm:$0xff] %vm2686_vm2, %v2715_v42  ;;  %3733 = vlog2.f32 (!%p3206_p9), %v2724_v43 }
 0x5cf   : > { %v2725_v25 = vld [vmem:[#allocation4 + $0x8] sm:$0xff] }
 0x5d0   : > { %3735 = vlog2.f32 %v2725_v25 }
 0x5d3   : > { %v2741_v51 = vld [vmem:[#allocation5 + $0x8] sm:$0xff] }
 0x5d6   : > { %v3734_v3 = vpop.eup %3733 }
 0x5d7   : > { %v2727_v27 = vmul.f32 0.6931472, %v3734_v3 }
 0x5d9   : > { %v2730_v50 = vadd.f32 %v2727_v27, %v2722_v46 }
 0x5da   : > { %v3736_v47 = vpop.eup %3735 }
 0x5db   : > { %v2729_v28 = vmul.f32 0.6931472, %v3736_v47  ;;  %v2742_v55 = vsub.f32 %v2730_v50, %v2740_v49 }
 0x5dd   : > { %v2731_v54 = vadd.f32 %v2729_v28, %v2723_v48  ;;  %v2744_v58 = vmul.f32 %v3207_v53, %v2742_v55 }
 0x5df   : > { %v2743_v57 = vsub.f32 %v2731_v54, %v2741_v51  ;;  %2746 = vst.msk [vmem:[%s4675_s11] sm:$0xff] %vm2686_vm2, %v2744_v58 }
 0x5e1   : > { %v2745_v59 = vmul.f32 %v3208_v56, %v2743_v57 }
 0x5e3   : > { %2747 = vst.msk [vmem:[%s4675_s11 + $0x8] sm:$0xff] %vm2686_vm2, %v2745_v59 }
 0x5e4 PF: > { %s5178_s5 = sld [smem:[#allocation33_spill]]  ;;  %s5179_s26 = sld [smem:[#allocation32_spill]] }
 0x5e5   : > { %s5181_s28 = sld [smem:[#allocation38_spill]]  ;;  %s2769_s3 = sshll.u32 %s515_s25, 4  ;;  %s4906_s3 = int_to_ptr.vmem [resolvable:$true] %s2769_s3 }
 0x5e6   : > { %s5182_s23 = sld [smem:[#allocation52_spill]]  ;;  %s4915_s9 = scalar_lea.sflag [#allocation8], %s513_s19 }
 0x5e7   : > { %s3943_s14 = scalar_lea.vmem %s4906_s3, 128  ;;  %s4154_s21 = smov [#allocation18]  }
 0x5e8   : > { %p3944_p4 = scmp.ne.s32.totalorder %s4906_s3, %s3943_s14  ;;  %s3947_s25 = sshll.u32 %s4154_s21, 4  ;;  %s3948_s25 = int_to_ptr.vmem [resolvable:$false] %s3947_s25 }
 0x5e9   : > { %s3949_s16 = scalar_lea.vmem %s3948_s25, 256  ;;  %p3950_p5 = scmp.lt.s32.totalorder %s4906_s3, %s3948_s25 }
 0x5ea   : > { %s3223_s7 = sshll.u32 %s5178_s5, 2  ;;  %p3951_p8 = scmp.lt.s32.totalorder %s3949_s16, %s3943_s14 }
 0x5eb   : > { %s2766_s15 = sadd.s32 %s5179_s26, %s3223_s7  ;;  %p5183_p7 = scmp.ne.s32.totalorder %s5181_s28, 0 }
 0x5ec   : > { %s3213_s24 = sshll.u32 %s2766_s15, 6  ;;  %p3952_p12 = por %p3951_p8, %p3950_p5 }
 0x5ed   : > { %s4911_s6 = scalar_lea.hbm %s5182_s23, %s3213_s24  ;;  %p3945_p10 = pnand %p3944_p4, %p5183_p7 }
 0x5ef   : > { %p3946_p3 = pneg %p3945_p10 }
 0x5f1   : > { %p3953_p11 = pnand %p3952_p12, %p3946_p3 }
 0x5f3   : > { %3956 = shalt.err (!%p3953_p11)
}
 0x5f4   : > { %s3957_s19 = scalar_lea.hbm %s4911_s6, 128  ;;  %s3961_s7 = scalar_lea.hbm %s5182_s23, 768 }
 0x5f5   : > { %p3958_p0 = scmp.ne.s32.totalorder %s4911_s6, %s3957_s19  ;;  %p3962_p13 = scmp.lt.u32.totalorder %s4911_s6, %s5182_s23 }
 0x5f6   : > { %p3963_p6 = scmp.lt.u32.totalorder %s3961_s7, %s3957_s19  ;;  %p3965_p4 = scmp.lt.u32.totalorder %s3957_s19, %s4911_s6 }
 0x5f7   : > { %p3959_p2 = pnand %p3958_p0, %p5183_p7 }
 0x5f8   : > { %p3964_p9 = por %p3963_p6, %p3962_p13 }
 0x5f9   : > { %p3960_p1 = pneg %p3959_p2 }
 0x5fa   : > { %p3966_p10 = por %p3965_p4, %p3964_p9 }
 0x5fc   : > { %p3967_p3 = pnand %p3966_p10, %p3960_p1 }
 0x5fe   : > { %3970 = shalt.err (!%p3967_p3)
}
 0x5ff   : > { %s4155_s27 = smov 64   ;;  %s5184_s12 = sld [smem:[#allocation42_spill]] }
 0x600   : > { %s4156_s14 = smov 128   ;;  %s4157_s21 = smov 4  }
 0x601   : > { %3424 = dma.vmem_to_hbm [thread:$0]  (%p5183_p7), %s4906_s3, 128, %s4911_s6, %s4915_s9, %s4155_s27, %s4156_s14, %s4157_s21  }
 0x602   : > { %s3224_s25 = sshll.u32 %s5178_s5, 8  ;;  %s5185_s26 = sld [smem:[#allocation53_spill]] }
 0x603   : > { %s2785_s7 = sshll.u32 %s4675_s11, 4  ;;  %s2754_s15 = scalar_lea.sflag [#allocation20], %s4633_s30  ;;  %s4947_s7 = int_to_ptr.vmem [resolvable:$true] %s2785_s7 }
 0x604   : > { %s3971_s24 = scalar_lea.vmem %s4947_s7, 256  ;;  %s4158_s28 = smov [#allocation19]  }
 0x605   : > { %p3972_p5 = scmp.ne.s32.totalorder %s4947_s7, %s3971_s24  ;;  %p5186_p8 = scmp.ne.s32.totalorder %s5184_s12, 0 }
 0x606   : > { %s3975_s3 = sshll.u32 %s4158_s28, 4  ;;  %s3976_s3 = int_to_ptr.vmem [resolvable:$false] %s3975_s3 }
 0x607   : > { %p3973_p12 = pnand %p3972_p5, %p5186_p8  ;;  %s3977_s5 = scalar_lea.vmem %s3976_s3, 512 }
 0x608   : > { %s4944_s1 = scalar_lea.hbm %s5185_s26, %s3224_s25  ;;  %p3978_p7 = scmp.lt.s32.totalorder %s4947_s7, %s3976_s3 }
 0x609   : > { %p3974_p11 = pneg %p3973_p12  ;;  %p3979_p0 = scmp.lt.s32.totalorder %s3977_s5, %s3971_s24 }
 0x60b   : > { %p3980_p2 = por %p3979_p0, %p3978_p7 }
 0x60d   : > { %p3981_p1 = pnand %p3980_p2, %p3974_p11 }
 0x60f   : > { %3984 = shalt.err (!%p3981_p1)
}
 0x610   : > { %s3985_s11 = scalar_lea.hbm %s4944_s1, 256  ;;  %s3989_s27 = scalar_lea.hbm %s5185_s26, 768 }
 0x611   : > { %p3986_p13 = scmp.ne.s32.totalorder %s4944_s1, %s3985_s11  ;;  %p3990_p4 = scmp.lt.u32.totalorder %s4944_s1, %s5185_s26 }
 0x612   : > { %p3991_p10 = scmp.lt.u32.totalorder %s3989_s27, %s3985_s11  ;;  %p3993_p5 = scmp.lt.u32.totalorder %s3985_s11, %s4944_s1 }
 0x613   : > { %p3987_p6 = pnand %p3986_p13, %p5186_p8 }
 0x614   : > { %p3992_p3 = por %p3991_p10, %p3990_p4 }
 0x615   : > { %p3988_p9 = pneg %p3987_p6 }
 0x616   : > { %p3994_p12 = por %p3993_p5, %p3992_p3 }
 0x618   : > { %p3995_p11 = pnand %p3994_p12, %p3988_p9 }
 0x61a   : > { %3998 = shalt.err (!%p3995_p11)
}
 0x61b   : > { %s4159_s16 = smov 8  }
 0x61c   : > { %3425 = dma.vmem_to_hbm [thread:$0]  (%p5186_p8), %s4947_s7, 256, %s4944_s1, %s2754_s15, %s4156_s14, %s4156_s14, %s4159_s16  }
 0x61d PF: > { %s5187_s19 = sld [smem:[#allocation27_spill]]  ;;  %p3463_p7 = scmp.ge.s32.totalorder %s4133_s18, 2 }
 0x61e   : > { %s5188_s24 = sld [smem:[#allocation39_spill]] }
 0x623   : > { %s2800_s28 = sand.u32 1, %s5187_s19  }
 0x624   : > { %p5189_p0 = scmp.ne.s32.totalorder %s5188_s24, 0  ;;  %s2801_s3 = scalar_lea.sflag [#allocation8], %s2800_s28 }
 0x626   : > { %p3452_p2 = pnand %p3463_p7, %p5189_p0 }
 0x628   : > { %4072 = dma.done.wait (!%p3452_p2), %s2801_s3, 128  }
 0x629   : > { %4074 = vsyncadd (!%p3452_p2), %s2801_s3, 4294967168  ;;  %s5190_s5 = sld [smem:[#allocation30_spill]] }
 0x62a   : > { %s5191_s12 = sld [smem:[#allocation40_spill]] }
 0x62f   : > { %s2809_s11 = sand.u32 1, %s5190_s5  }
 0x630   : > { %p5192_p1 = scmp.ne.s32.totalorder %s5191_s12, 0  ;;  %s2810_s30 = scalar_lea.sflag [#allocation20], %s2809_s11 }
 0x632   : > { %p3455_p13 = pnand %p3463_p7, %p5192_p1 }
 0x634   : > { %4076 = dma.done.wait (!%p3455_p13), %s2810_s30, 256  }
 0x635   : > { %4078 = vsyncadd (!%p3455_p13), %s2810_s30, 4294967040  ;;  %s35_s18 = sadd.s32 1, %s4133_s18   ;;  %s5194_s27 = sld [smem:[#allocation28_spill]] }
 0x636   : > { %p4983_p8 = scmp.ge.s32.totalorder %s35_s18, 8   ;;  %s5195_s30 = sld [smem:[#allocation29_spill]] }
 0x637   : > { %s5196_s11 = sld [smem:[#allocation31_spill]]  ;;  %s5197_s1 = sld [smem:[#allocation47_spill]] }
 0x638   : > { %s5198_s7 = sld [smem:[#allocation34_spill]]  ;;  %s5199_s16 = sld [smem:[#allocation45_spill]] }
 0x639   : > { %s5200_s6 = sld [smem:[#allocation46_spill]]  ;;  %s5202_s28 = smov %s4089_s29 }
 0x63a   : > { %s5203_s29 = smov %s4480_s22  ;;  %s5204_s9 = smov %s4101_s10 }
 0x63b   : > { %s5205_s10 = smov %s4463_s20  ;;  %s5206_s12 = smov %s4113_s13 }
 0x63c   : > { %s5209_s15 = smov %s4129_s17  ;;  %34 = sbr.rel (!%p4983_p8) target bundleno = 24 (0x18), region = 174 }
 0x63d   : > { %s5207_s13 = smov %s5197_s1 }
 0x63e   : > { %s5208_s14 = smov %s5198_s7 }
 0x63f   : > { %s5210_s17 = smov %s5200_s6 }
 0x643   :  { %2815 = vsyncpa [#allocation7], 1 }
 0x644   :  { %2817 = vsyncpa [#allocation7 + $0x1], 1 }
 0x645   :  { %2818 = vsyncpa [#allocation10], 1 }
 0x646   :  { %2820 = vsyncpa [#allocation10 + $0x1], 1 }
 0x647   :  { %2821 = vsyncpa [#allocation13], 1 }
 0x648   :  { %2822 = vsyncpa [#allocation16], 1 }
 0x649   :  { %2824 = vsyncpa [#allocation16 + $0x1], 1 }
 0x64a   :  { %2825 = vsyncpa [#allocation8], 1 }
 0x64b   :  { %2827 = vsyncpa [#allocation8 + $0x1], 1 }
 0x64c   :  { %2828 = vsyncpa [#allocation20], 1 }
 0x64d   :  { %2830 = vsyncpa [#allocation20 + $0x1], 1 }

// kernel: _run_kernel.1
= control target key start
LH: loop header
LB: loop body
LE: loop exit
PB: predicated region body
PF: predicated region fallthrough
CT: control target
= control target key end

     0   :  { %s5030_s0 = inlined_call_operand.hbm [shape: bf16[48,32], index: 0, kind: input, shape index: {}]   ;;  %s5031_s1 = inlined_call_operand.hbm [shape: f32[48,1], index: 1, kind: input, shape index: {}]   ;;  %s5032_s2 = inlined_call_operand.hbm [shape: s32[48,1], index: 2, kind: input, shape index: {}]   ;;  %s5033_s3 = inlined_call_operand.hbm [shape: bf16[32,2048], index: 3, kind: input, shape index: {}]   ;;  %s5034_s4 = inlined_call_operand.hbm [shape: f32[1,2048], index: 4, kind: input, shape index: {}]   ;;  %s5035_s5 = inlined_call_operand.hbm [shape: bf16[2048,256], index: 5, kind: input, shape index: {}]   ;;  %s5036_s6 = inlined_call_operand.hbm [shape: f32[1,256], index: 6, kind: input, shape index: {}]   ;;  %s5037_s7 = inlined_call_operand.hbm [shape: bf16[48,256], index: 7, kind: output, shape index: {0}]   ;;  %s5038_s8 = inlined_call_operand.hbm [shape: f32[48,1], index: 8, kind: output, shape index: {1}]  }
   0x1   :  { %5095 = sst [smem:[#allocation48_spill]] %s5031_s1 }
   0x2   :  { %5096 = sst [smem:[#allocation49_spill]] %s5033_s3 }
   0x3   :  { %5097 = sst [smem:[#allocation50_spill]] %s5035_s5 }
   0x4   :  { %5098 = sst [smem:[#allocation51_spill]] %s5036_s6 }
   0x5   :  { %5099 = sst [smem:[#allocation52_spill]] %s5037_s7 }
   0x6   :  { %5100 = sst [smem:[#allocation53_spill]] %s5038_s8 }
   0x7   :  { %14 = vsyncpa [#allocation7], 0 }
   0x8   :  { %16 = vsyncpa [#allocation7 + $0x1], 0 }
   0x9   :  { %17 = vsyncpa [#allocation10], 0 }
   0xa   :  { %19 = vsyncpa [#allocation10 + $0x1], 0 }
   0xb   :  { %20 = vsyncpa [#allocation13], 0 }
   0xc   :  { %21 = vsyncpa [#allocation16], 0 }
   0xd   :  { %23 = vsyncpa [#allocation16 + $0x1], 0 }
   0xe   :  { %24 = vsyncpa [#allocation8], 0 }
   0xf   :  { %26 = vsyncpa [#allocation8 + $0x1], 0 }
  0x10   :  { %27 = vsyncpa [#allocation20], 0 }
  0x11   :  { %29 = vsyncpa [#allocation20 + $0x1], 0  ;;  %s4205_s27 = smov 0   ;;  %s4207_s28 = smov 0  }
  0x12   :  { %s4209_s29 = smov 0   ;;  %s4211_s30 = smov 0  }
  0x13   :  { %s4213_s9 = smov 0   ;;  %s4215_s10 = smov 0  }
  0x14   :  { %s4217_s11 = smov 0   ;;  %s4219_s12 = smov 0  }
  0x15   :  { %s4221_s13 = smov 0   ;;  %s4223_s14 = smov 0  }
  0x16   :  { %s4225_s15 = smov 0   ;;  %s4227_s16 = smov 0  }
  0x17   :  { %s4229_s17 = smov 0   ;;  %s4231_s18 = smov 0  }
  0x18 LB: > { %5101 = sst [smem:[#allocation27_spill]] %s4081_s27  ;;  %s4274_s19 = sadd.s32 4294967295, %s4133_s18   ;;  %s4133_s18 = sphi %s4231_s18, %s35_s18   ;;  %s4129_s17 = sphi %s4229_s17, %s5210_s17   ;;  %s4125_s16 = sphi %s4227_s16, %s5199_s16   ;;  %s4121_s15 = sphi %s4225_s15, %s5209_s15   ;;  %s4117_s14 = sphi %s4223_s14, %s5208_s14   ;;  %s4113_s13 = sphi %s4221_s13, %s5207_s13   ;;  %s4109_s12 = sphi %s4219_s12, %s5206_s12   ;;  %s4105_s11 = sphi %s4217_s11, %s5196_s11   ;;  %s4101_s10 = sphi %s4215_s10, %s5205_s10   ;;  %s4097_s9 = sphi %s4213_s9, %s5204_s9   ;;  %s4093_s30 = sphi %s4211_s30, %s5195_s30   ;;  %s4089_s29 = sphi %s4209_s29, %s5203_s29   ;;  %s4085_s28 = sphi %s4207_s28, %s5202_s28   ;;  %s4081_s27 = sphi %s4205_s27, %s5194_s27  }
  0x19   : > { %5102 = sst [smem:[#allocation28_spill]] %s4085_s28  ;;  %s3006_s20 = sadd.s32 4294967294, %s4133_s18  }
  0x1a   : > { %5103 = sst [smem:[#allocation29_spill]] %s4097_s9  ;;  %p67_p0 = scmp.ne.s32.totalorder %s4109_s12, %s4105_s11 }
  0x1b   : > { %5104 = sst [smem:[#allocation30_spill]] %s4105_s11  ;;  %p5049_p1 = scmp.eq.s32.totalorder %s4274_s19, 0 }
  0x1c   : > { %5105 = sst [smem:[#allocation31_spill]] %s4109_s12  ;;  %p187_p2 = scmp.ne.s32.totalorder %s4097_s9, %s4093_s30 }
  0x1d   : > { %5106 = sst [smem:[#allocation32_spill]] %s4117_s14  ;;  %p4287_p3 = por %p5049_p1, %p67_p0 }
  0x1e   : > { %5107 = sst [smem:[#allocation33_spill]] %s4121_s15  ;;  %p238_p4 = scmp.ne.s32.totalorder %s4089_s29, %s4085_s28 }
  0x1f   : > { %5108 = sst [smem:[#allocation34_spill]] %s4125_s16  ;;  %p4295_p5 = por %p187_p2, %p5049_p1 }
  0x20   : > { %5109 = sst [smem:[#allocation35_spill]] %s4274_s19  ;;  %p5050_p6 = scmp.eq.s32.totalorder %s4274_s19, 5 }
  0x21   : > { %s5110_s22 = scalar_select %p4287_p3, 1, 0 }
  0x22   : > { %s5112_s23 = scalar_select %p4295_p5, 1, 0 }
  0x23   : > { %5111 = sst [smem:[#allocation36_spill]] %s5110_s22  ;;  %p244_p7 = scmp.ne.s32.totalorder %s4085_s28, %s4081_s27 }
  0x24   : > { %5113 = sst [smem:[#allocation37_spill]] %s5112_s23  ;;  %p245_p8 = scmp.eq.s32.totalorder %s3006_s20, 5 }
  0x25   : > { %p4304_p9 = por %p5050_p6, %p238_p4  ;;  %p3007_p10 = scmp.ge.s32.totalorder %s4133_s18, 1 }
  0x26   : > { %p4309_p11 = por %p245_p8, %p244_p7  ;;  %p4316_p12 = por %p245_p8, %p67_p0 }
  0x27   : > { %s5114_s24 = scalar_select %p4304_p9, 1, 0 }
  0x28   : > { %s5116_s25 = scalar_select %p4309_p11, 1, 0 }
  0x29   : > { %5115 = sst [smem:[#allocation38_spill]] %s5114_s24  ;;  %p278_p13 = scmp.lt.s32.totalorder %s4133_s18, 7 }
  0x2a   : > { %5117 = sst [smem:[#allocation39_spill]] %s5116_s25  ;;  %s4135_s20 = smov [#allocation12]  }
  0x2b   : > { %s5118_s26 = scalar_select %p4316_p12, 1, 0 }
  0x2c   : > { %p4321_p2 = pnand %p3007_p10, %p278_p13  ;;  %s290_s21 = sshll.u32 %s4135_s20, 4  ;;  %s291_s21 = int_to_ptr.vmem [resolvable:$true] %s290_s21 }
  0x2d   : > { %5119 = sst [smem:[#allocation40_spill]] %s5118_s26  ;;  %s5123_s3 = sld [smem:[#allocation49_spill]] }
  0x2e   : > { %s5120_s30 = scalar_select %p4321_p2, 1, 0 }
  0x2f   : > { %p3428_p4 = pneg %p4321_p2 }
  0x30   : > { %5121 = sst [smem:[#allocation41_spill]] %s5120_s30 }
  0x31   : > { %p4329_p7 = pnand %p3428_p4, %p5049_p1 }
  0x33   : > { %s5122_s27 = scalar_select %p4329_p7, 1, 0 }
  0x34   : > { %s3737_s7 = scalar_lea.hbm %s5123_s3, 4096  ;;  %p5065_p8 = pneg %p4329_p7 }
  0x35   : > { %p3738_p0 = scmp.ne.s32.totalorder %s5123_s3, %s3737_s7  ;;  %p3744_p4 = scmp.lt.u32.totalorder %s3737_s7, %s5123_s3 }
  0x37   : > { %p3740_p10 = pnand %p5065_p8, %p3738_p0 }
  0x39   : > { %p3741_p13 = pneg %p3740_p10 }
  0x3b   : > { %p3746_p1 = pnand %p3744_p4, %p3741_p13 }
  0x3d   : > { %3749 = shalt.err (!%p3746_p1)
}
  0x3e   : > { %s3750_s26 = scalar_lea.vmem %s291_s21, 4096  ;;  %p3758_p9 = scmp.lt.s32.totalorder %s291_s21, %s291_s21 }
  0x3f   : > { %p3751_p6 = scmp.ne.s32.totalorder %s291_s21, %s3750_s26  ;;  %p3759_p5 = scmp.lt.s32.totalorder %s3750_s26, %s3750_s26 }
  0x41   : > { %p3753_p12 = pnand %p3751_p6, %p5065_p8  ;;  %p3760_p3 = por %p3759_p5, %p3758_p9 }
  0x43   : > { %p3754_p11 = pneg %p3753_p12 }
  0x45   : > { %p3761_p2 = pnand %p3760_p3, %p3754_p11 }
  0x47   : > { %3764 = shalt.err (!%p3761_p2)
}
  0x48   : > { %s4136_s8 = smov 1024   ;;  %s5055_s7 = smov 64  }
  0x49   : > { %3431 = dma.hbm_to_vmem [thread:$0]  (!%p4329_p7), %s5123_s3, 4096, %s291_s21, [#allocation13], %s4136_s8, %s4136_s8, %s5055_s7  }
  0x4a   : > { %p61_p1 = scmp.ne.s32.totalorder %s4113_s13, %s4109_s12  ;;  %p5067_p3 = scmp.eq.s32.totalorder %s4133_s18, 0 }
  0x4b   : > { %p5066_p5 = scmp.lt.s32.totalorder %s4133_s18, 6  ;;  %s4363_s24 = sand.u32 1, %s4113_s13  }
  0x4c   : > { %p63_p6 = por %p5067_p3, %p61_p1  ;;  %p5124_p9 = scmp.eq.s32.totalorder %s4274_s19, 5 }
  0x4d   : > { %s5063_s20 = sshll.u32 %s4363_s24, 4  ;;  %s5064_s21 = sshll.u32 %s4129_s17, 8 }
  0x4e   : > { %p4369_p11 = por %p5124_p9, %p61_p1  ;;  %p4377_p12 = pnand %p5066_p5, %p63_p6 }
  0x4f   : > { %s5128_s1 = sld [smem:[#allocation48_spill]]  ;;  %s340_s11 = scalar_lea.vmem [#allocation9], %s5063_s20 }
  0x50   : > { %s5125_s25 = scalar_select %p4369_p11, 1, 0 }
  0x51   : > { %s5127_s14 = scalar_select %p4377_p12, 1, 0 }
  0x52   : > { %5126 = sst [smem:[#allocation42_spill]] %s5125_s25  ;;  %s347_s26 = sshll.u32 %s340_s11, 4  ;;  %s4391_s26 = int_to_ptr.vmem [resolvable:$true] %s347_s26 }
  0x53   : > { %s5129_s3 = sand.u32 1, %s4133_s18   ;;  %p4401_p0 = pneg %p4377_p12 }
  0x54   : > { %s4395_s25 = scalar_lea.sflag [#allocation10], %s5129_s3 }
  0x55   : > { %s4387_s7 = scalar_lea.hbm %s5128_s1, %s5064_s21  ;;  %5130 = sst [smem:[#allocation43_spill]] %s4395_s25 }
  0x56   : > { %s3765_s28 = scalar_lea.hbm %s4387_s7, 256  ;;  %s3770_s11 = scalar_lea.hbm %s5128_s1, 768 }
  0x57   : > { %p3766_p2 = scmp.ne.s32.totalorder %s4387_s7, %s3765_s28  ;;  %p3771_p4 = scmp.lt.u32.totalorder %s4387_s7, %s5128_s1 }
  0x58   : > { %s5131_s23 = scalar_select %p4401_p0, 1, 0 }
  0x59   : > { %p3768_p10 = pnand %p4401_p0, %p3766_p2  ;;  %p3772_p1 = scmp.lt.u32.totalorder %s3770_s11, %s3765_s28 }
  0x5a   : > { %p3774_p9 = scmp.lt.u32.totalorder %s3765_s28, %s4387_s7 }
  0x5b   : > { %p3769_p13 = pneg %p3768_p10  ;;  %p3773_p6 = por %p3772_p1, %p3771_p4 }
  0x5d   : > { %p3775_p8 = por %p3774_p9, %p3773_p6 }
  0x5f   : > { %p3776_p5 = pnand %p3775_p8, %p3769_p13 }
  0x61   : > { %3779 = shalt.err (!%p3776_p5)
}
  0x62   : > { %s3780_s3 = scalar_lea.vmem %s4391_s26, 256  ;;  %s4138_s8 = smov [#allocation9]  }
  0x63   : > { %p3781_p2 = scmp.ne.s32.totalorder %s4391_s26, %s3780_s3  ;;  %s3785_s15 = sshll.u32 %s4138_s8, 4  ;;  %s3786_s15 = int_to_ptr.vmem [resolvable:$false] %s3785_s15 }
  0x64   : > { %s3787_s20 = scalar_lea.vmem %s3786_s15, 512  ;;  %p3788_p11 = scmp.lt.s32.totalorder %s4391_s26, %s3786_s15 }
  0x65   : > { %p3783_p10 = pnand %p3781_p2, %p4401_p0  ;;  %p3789_p7 = scmp.lt.s32.totalorder %s3787_s20, %s3780_s3 }
  0x67   : > { %p3784_p3 = pneg %p3783_p10  ;;  %p3790_p4 = por %p3789_p7, %p3788_p11 }
  0x69   : > { %p3791_p1 = pnand %p3790_p4, %p3784_p3 }
  0x6b   : > { %3794 = shalt.err (!%p3791_p1)
}
  0x6c   : > { %s5077_s28 = smov 128   ;;  %s5076_s21 = smov 8  }
  0x6d   : > { %3441 = dma.hbm_to_vmem [thread:$0]  (!%p4377_p12), %s4387_s7, 256, %s4391_s26, %s4395_s25, %s5077_s28, %s5077_s28, %s5076_s21  }
  0x6e   : > { %s5132_s11 = sshll.u32 %s4129_s17, 8  ;;  %s5133_s20 = sshll.u32 %s4363_s24, 4 }
  0x6f   : > { %s4433_s15 = scalar_lea.hbm %s5032_s2, %s5132_s11  ;;  %s361_s1 = scalar_lea.vmem [#allocation11], %s5133_s20 }
  0x70   : > { %s368_s19 = sshll.u32 %s361_s1, 4  ;;  %s174_s22 = sadd.s32 1, %s4101_s10  ;;  %s4437_s19 = int_to_ptr.vmem [resolvable:$true] %s368_s19 }
  0x71   : > { %5134 = sst [smem:[#allocation44_spill]] %s4437_s19  ;;  %s44_s12 = sadd.s32 1, %s4125_s16 }
  0x72   : > { %p181_p7 = scmp.ne.s32.totalorder %s4101_s10, %s4097_s9  ;;  %p45_p8 = scmp.ge.s32.totalorder %s44_s12, 2 }
  0x73   : > { %p5135_p3 = scmp.eq.s32.totalorder %s4133_s18, 0  ;;  %s5081_s26 = sand.u32 1, %s4101_s10  }
  0x74   : > { %s5212_s12 = smov (%p45_p8, %s44_s12), 0  ;;  %s5138_s11 = sadd.s32 1, %s4129_s17 }
  0x75   : > { %p4445_p5 = por %p181_p7, %p5135_p3  ;;  %5137 = sst [smem:[#allocation45_spill]] %s5212_s12 }
  0x76   : > { %s5214_s11 = smov (!%p45_p8, %s5138_s11), %s4129_s17  ;;  %s171_s1 = ssub.s32 %s4125_s16, %s5212_s12 }
  0x77   : > { %s3020_s3 = sshll.u32 %s5081_s26, 10  ;;  %p49_p11 = scmp.ge.s32.totalorder %s5214_s11, 3 }
  0x78   : > { %p172_p13 = scmp.eq.s32.totalorder %s171_s1, 0  ;;  %s3021_s8 = sshll.u32 %s4125_s16, 6 }
  0x79   : > { %s5216_s11 = smov (%p49_p11, %s5214_s11), 0  ;;  %s5140_s5 = sld [smem:[#allocation50_spill]] }
  0x7a   : > { %5139 = sst [smem:[#allocation46_spill]] %s5216_s11  ;;  %s51_s21 = ssub.s32 %s4129_s17, %s5216_s11 }
  0x7b   : > { %s4463_s20 = scalar_select %p172_p13, %s4101_s10, %s174_s22  }
  0x7c   : > { %p52_p6 = scmp.eq.s32.totalorder %s51_s21, 0  ;;  %s225_s26 = sor.u32 %s171_s1, %s51_s21 }
  0x7d   : > { %p226_p9 = scmp.eq.s32.totalorder %s225_s26, 0  ;;  %s382_s12 = scalar_lea.vmem [#allocation15], %s3020_s3 }
  0x7e   : > { %s388_s6 = sshll.u32 %s382_s12, 4  ;;  %s5141_s16 = sadd.s32 1, %s4113_s13  ;;  %s4482_s6 = int_to_ptr.vmem [resolvable:$true] %s388_s6 }
  0x7f   : > { %s4470_s30 = scalar_lea.hbm %s5140_s5, %s3021_s8  ;;  %s5143_s19 = sadd.s32 1, %s4089_s29 }
  0x80   : > { %s4475_s25 = scalar_select %p52_p6, %s4113_s13, %s5141_s16  }
  0x81   : > { %s4480_s22 = scalar_select %p226_p9, %s4089_s29, %s5143_s19  }
  0x82   : > { %5142 = sst [smem:[#allocation47_spill]] %s4475_s25  ;;  %p5144_p2 = scmp.lt.s32.totalorder %s4133_s18, 6 }
  0x83   : > { %s4141_s28 = smov [#allocation14]   ;;  %s5146_s12 = sand.u32 1, %s4133_s18  }
  0x84   : > { %p4488_p10 = pnand %p5144_p2, %p4445_p5  ;;  %s4492_s21 = sshll.u32 %s4141_s28, 4  ;;  %s305_s21 = int_to_ptr.vmem [resolvable:$true] %s4492_s21 }
  0x85   : > { %s4496_s16 = scalar_lea.sflag [#allocation16], %s5146_s12  ;;  %s3795_s26 = scalar_lea.hbm %s4470_s30, 16384 }
  0x86   : > { %s5145_s9 = scalar_select %p4488_p10, 1, 0 }
  0x87   : > { %p3796_p4 = scmp.ne.s32.totalorder %s4470_s30, %s3795_s26  ;;  %p5090_p1 = pneg %p4488_p10 }
  0x88   : > { %s3800_s1 = scalar_lea.hbm %s5140_s5, 32768  ;;  %p3801_p3 = scmp.lt.u32.totalorder %s4470_s30, %s5140_s5 }
  0x89   : > { %p3798_p7 = pnand %p5090_p1, %p3796_p4  ;;  %p3802_p5 = scmp.lt.u32.totalorder %s3800_s1, %s3795_s26 }
  0x8a   : > { %p3804_p13 = scmp.lt.u32.totalorder %s3795_s26, %s4470_s30 }
  0x8b   : > { %p3799_p8 = pneg %p3798_p7  ;;  %p3803_p11 = por %p3802_p5, %p3801_p3 }
  0x8d   : > { %p3805_p6 = por %p3804_p13, %p3803_p11 }
  0x8f   : > { %p3806_p9 = pnand %p3805_p6, %p3799_p8 }
  0x91   : > { %3809 = shalt.err (!%p3806_p9)
}
  0x92   : > { %s3810_s28 = scalar_lea.vmem %s4482_s6, 16384  ;;  %s4142_s12 = smov [#allocation15]  }
  0x93   : > { %p3811_p2 = scmp.ne.s32.totalorder %s4482_s6, %s3810_s28  ;;  %s3815_s19 = sshll.u32 %s4142_s12, 4  ;;  %s3816_s19 = int_to_ptr.vmem [resolvable:$false] %s3815_s19 }
  0x94   : > { %s3817_s7 = scalar_lea.vmem %s3816_s19, 32768  ;;  %p3818_p12 = scmp.lt.s32.totalorder %s4482_s6, %s3816_s19 }
  0x95   : > { %p3813_p4 = pnand %p3811_p2, %p5090_p1  ;;  %p3819_p3 = scmp.lt.s32.totalorder %s3817_s7, %s3810_s28 }
  0x97   : > { %p3814_p7 = pneg %p3813_p4  ;;  %p3820_p5 = por %p3819_p3, %p3818_p12 }
  0x99   : > { %p3821_p11 = pnand %p3820_p5, %p3814_p7 }
  0x9b   : > { %3824 = shalt.err (!%p3821_p11)
}
  0x9c   : > { %s4143_s26 = smov 4   ;;  %s5147_s1 = smov 64  }
  0x9d   : > { %s5148_s3 = smov 128   ;;  %s3011_s8 = sshll.u32 %s4363_s24, 3 }
  0x9e   : > { %3447 = dma.hbm_to_vmem [thread:$0]  (!%p4488_p10), %s4470_s30, 16384, %s4482_s6, %s4496_s16, %s5148_s3, %s5147_s1, %s4143_s26  }
  0x9f   : > { %s3825_s19 = scalar_lea.hbm %s5034_s4, 256  ;;  %p5149_p8 = scmp.ne.s32.totalorder %s5122_s27, 0 }
  0xa0   : > { %p3826_p12 = scmp.ne.s32.totalorder %s5034_s4, %s3825_s19  ;;  %p3832_p2 = scmp.lt.u32.totalorder %s3825_s19, %s5034_s4 }
  0xa1   : > { %p5150_p13 = pneg %p5149_p8 }
  0xa3   : > { %p3828_p6 = pnand %p3826_p12, %p5150_p13 }
  0xa5   : > { %p3829_p9 = pneg %p3828_p6 }
  0xa7   : > { %p3834_p4 = pnand %p3832_p2, %p3829_p9 }
  0xa9   : > { %3837 = shalt.err (!%p3834_p4)
}
  0xaa   : > { %s3838_s6 = scalar_lea.vmem %s305_s21, 256  ;;  %p5151_p3 = pmov %p5150_p13 }
  0xab   : > { %p3839_p7 = scmp.ne.s32.totalorder %s305_s21, %s3838_s6  ;;  %p3846_p1 = scmp.lt.s32.totalorder %s305_s21, %s305_s21 }
  0xac   : > { %p3847_p10 = scmp.lt.s32.totalorder %s3838_s6, %s3838_s6 }
  0xad   : > { %p3841_p5 = pnand %p3839_p7, %p5151_p3 }
  0xae   : > { %p3848_p0 = por %p3847_p10, %p3846_p1 }
  0xaf   : > { %p3842_p11 = pneg %p3841_p5 }
  0xb1   : > { %p3849_p12 = pnand %p3848_p0, %p3842_p11 }
  0xb3   : > { %3852 = shalt.err (!%p3849_p12)
}
  0xb4   : > { %3434 = dma.hbm_to_vmem [thread:$0]  (!%p5149_p8), %s5034_s4, 256, %s305_s21, [#allocation13]  }
  0xb5   : > { %s3218_s25 = sshll.u32 %s4129_s17, 7  ;;  %s319_s19 = scalar_lea.vmem [#allocation6], %s3011_s8 }
  0xb6   : > { %s4553_s28 = scalar_lea.hbm %s5030_s0, %s3218_s25  ;;  %s326_s7 = sshll.u32 %s319_s19, 4  ;;  %s4555_s7 = int_to_ptr.vmem [resolvable:$true] %s326_s7 }
  0xb7   : > { %s316_s27 = scalar_lea.sflag [#allocation7], %s4363_s24  ;;  %s3853_s6 = scalar_lea.hbm %s4553_s28, 128 }
  0xb8   : > { %p3854_p0 = scmp.ne.s32.totalorder %s4553_s28, %s3853_s6  ;;  %p5152_p10 = scmp.ne.s32.totalorder %s5131_s23, 0 }
  0xb9   : > { %s3858_s30 = scalar_lea.hbm %s5030_s0, 384  ;;  %p3859_p13 = scmp.lt.u32.totalorder %s4553_s28, %s5030_s0 }
  0xba   : > { %p3856_p1 = pnand %p3854_p0, %p5152_p10  ;;  %p3860_p6 = scmp.lt.u32.totalorder %s3858_s30, %s3853_s6 }
  0xbb   : > { %p3862_p2 = scmp.lt.u32.totalorder %s3853_s6, %s4553_s28 }
  0xbc   : > { %p3857_p8 = pneg %p3856_p1  ;;  %p3861_p9 = por %p3860_p6, %p3859_p13 }
  0xbe   : > { %p3863_p4 = por %p3862_p2, %p3861_p9 }
  0xc0   : > { %p3864_p7 = pnand %p3863_p4, %p3857_p8 }
  0xc2   : > { %3867 = shalt.err (!%p3864_p7)
}
  0xc3   : > { %s3868_s8 = scalar_lea.vmem %s4555_s7, 128  ;;  %s4144_s12 = smov [#allocation6]  }
  0xc4   : > { %p3869_p3 = scmp.ne.s32.totalorder %s4555_s7, %s3868_s8  ;;  %s3873_s19 = sshll.u32 %s4144_s12, 4  ;;  %s3874_s19 = int_to_ptr.vmem [resolvable:$false] %s3873_s19 }
  0xc5   : > { %s3875_s21 = scalar_lea.vmem %s3874_s19, 256  ;;  %p3876_p12 = scmp.lt.s32.totalorder %s4555_s7, %s3874_s19 }
  0xc6   : > { %p3871_p5 = pnand %p3869_p3, %p5152_p10  ;;  %p3877_p0 = scmp.lt.s32.totalorder %s3875_s21, %s3868_s8 }
  0xc8   : > { %p3872_p11 = pneg %p3871_p5  ;;  %p3878_p1 = por %p3877_p0, %p3876_p12 }
  0xca   : > { %p3879_p13 = pnand %p3878_p1, %p3872_p11 }
  0xcc   : > { %3882 = shalt.err (!%p3879_p13)
}
  0xcd   : > { %p5153_p8 = scmp.ne.s32.totalorder %s5127_s14, 0  ;;  %s3883_s6 = scalar_lea.hbm %s4433_s15, 256 }
  0xce   : > { %p3884_p6 = scmp.ne.s32.totalorder %s4433_s15, %s3883_s6  ;;  %s3888_s25 = scalar_lea.hbm %s5032_s2, 768 }
  0xcf   : > { %3438 = dma.hbm_to_vmem [thread:$0]  (!%p5153_p8), %s4553_s28, 128, %s4555_s7, %s316_s27, %s5147_s1, %s5147_s1, %s4143_s26  }
  0xd0   : > { %p3886_p9 = pnand %p3884_p6, %p5152_p10  ;;  %p3889_p4 = scmp.lt.u32.totalorder %s4433_s15, %s5032_s2 }
  0xd1   : > { %p3890_p7 = scmp.lt.u32.totalorder %s3888_s25, %s3883_s6  ;;  %p3892_p5 = scmp.lt.u32.totalorder %s3883_s6, %s4433_s15 }
  0xd2   : > { %p3887_p2 = pneg %p3886_p9 }
  0xd3   : > { %p3891_p3 = por %p3890_p7, %p3889_p4 }
  0xd5   : > { %p3893_p11 = por %p3892_p5, %p3891_p3 }
  0xd7   : > { %p3894_p12 = pnand %p3893_p11, %p3887_p2 }
  0xd9   : > { %3897 = shalt.err (!%p3894_p12)
}
  0xda   : > { %s5154_s24 = sld [smem:[#allocation44_spill]]  ;;  %s4145_s1 = smov [#allocation11]  }
  0xdb   : > { %s3903_s28 = sshll.u32 %s4145_s1, 4  ;;  %s3904_s28 = int_to_ptr.vmem [resolvable:$false] %s3903_s28 }
  0xdc   : > { %s3905_s7 = scalar_lea.vmem %s3904_s28, 512 }
  0xe0   : > { %s3898_s26 = scalar_lea.vmem %s5154_s24, 256  ;;  %p3906_p6 = scmp.lt.s32.totalorder %s5154_s24, %s3904_s28 }
  0xe1   : > { %p3899_p0 = scmp.ne.s32.totalorder %s5154_s24, %s3898_s26  ;;  %p3907_p9 = scmp.lt.s32.totalorder %s3905_s7, %s3898_s26 }
  0xe3   : > { %p3901_p1 = pnand %p3899_p0, %p5152_p10  ;;  %p3908_p4 = por %p3907_p9, %p3906_p6 }
  0xe5   : > { %p3902_p13 = pneg %p3901_p1 }
  0xe7   : > { %p3909_p7 = pnand %p3908_p4, %p3902_p13 }
  0xe9   : > { %3912 = shalt.err (!%p3909_p7)
}
  0xea   : > { %s5155_s27 = smov 8   ;;  %s5156_s12 = sld [smem:[#allocation43_spill]] }
  0xeb   : > { %s5157_s23 = sld [smem:[#allocation34_spill]]  ;;  %s5158_s21 = sand.u32 1, %s4101_s10  }
  0xec   : > { %s401_s6 = scalar_lea.vmem [#allocation17], %s5158_s21  ;;  %s5159_s11 = sld [smem:[#allocation51_spill]] }
  0xed   : > { %s408_s5 = sshll.u32 %s401_s6, 4  ;;  %p5161_p2 = scmp.ne.s32.totalorder %s5145_s9, 0  ;;  %s409_s5 = int_to_ptr.vmem [resolvable:$true] %s408_s5 }
  0xef   : > { %p5162_p3 = pneg %p5161_p2 }
  0xf0   : > { %3444 = dma.hbm_to_vmem [thread:$0]  (!%p5153_p8), %s4433_s15, 256, %s5154_s24, %s5156_s12, %s5148_s3, %s5148_s3, %s5155_s27  }
  0xf1   : > { %s3022_s19 = sshll.u32 %s5157_s23, 4 }
  0xf2   : > { %s5160_s8 = smov %s5159_s11  ;;  %s406_s26 = scalar_lea.hbm %s5159_s11, %s3022_s19 }
  0xf3   : > { %s3913_s14 = scalar_lea.hbm %s406_s26, 16  ;;  %s3918_s7 = scalar_lea.hbm %s5160_s8, 32 }
  0xf4   : > { %p3914_p10 = scmp.ne.s32.totalorder %s406_s26, %s3913_s14  ;;  %p3919_p8 = scmp.lt.u32.totalorder %s406_s26, %s5160_s8 }
  0xf5   : > { %p3920_p12 = scmp.lt.u32.totalorder %s3918_s7, %s3913_s14  ;;  %p3922_p1 = scmp.lt.u32.totalorder %s3913_s14, %s406_s26 }
  0xf6   : > { %p3916_p5 = pnand %p3914_p10, %p5162_p3 }
  0xf7   : > { %p3921_p0 = por %p3920_p12, %p3919_p8 }
  0xf8   : > { %p3917_p11 = pneg %p3916_p5 }
  0xf9   : > { %p3923_p13 = por %p3922_p1, %p3921_p0 }
  0xfb   : > { %p3924_p6 = pnand %p3923_p13, %p3917_p11 }
  0xfd   : > { %3927 = shalt.err (!%p3924_p6)
}
  0xfe   : > { %s3928_s24 = scalar_lea.vmem %s409_s5, 16  ;;  %p5163_p4 = pmov %p5162_p3 }
  0xff   : > { %p3929_p9 = scmp.ne.s32.totalorder %s409_s5, %s3928_s24  ;;  %s4146_s27 = smov [#allocation17]  }
 0x100   : > { %s3933_s12 = sshll.u32 %s4146_s27, 4  ;;  %s3934_s12 = int_to_ptr.vmem [resolvable:$false] %s3933_s12 }
 0x101   : > { %p3931_p7 = pnand %p3929_p9, %p5163_p4  ;;  %s3935_s23 = scalar_lea.vmem %s3934_s12, 32 }
 0x102   : > { %p3936_p3 = scmp.lt.s32.totalorder %s409_s5, %s3934_s12  ;;  %p3937_p5 = scmp.lt.s32.totalorder %s3935_s23, %s3928_s24 }
 0x103   : > { %p3932_p10 = pneg %p3931_p7 }
 0x104   : > { %p3938_p8 = por %p3937_p5, %p3936_p3 }
 0x106   : > { %p3939_p12 = pnand %p3938_p8, %p3932_p10 }
 0x108   : > { %3942 = shalt.err (!%p3939_p12)
}
 0x109   : > { %3450 = dma.hbm_to_vmem [thread:$0]  (!%p5161_p2), %s406_s26, 16, %s409_s5, %s4496_s16  }
 0x10a   : > { %s5164_s19 = sld [smem:[#allocation41_spill]] }
 0x110   : > { %p5165_p11 = scmp.ne.s32.totalorder %s5164_s19, 0 }
 0x111   : > { %s5166_s21 = sld [smem:[#allocation31_spill]] (!%p5165_p11)  ;;  %s5167_s6 = sld [smem:[#allocation36_spill]] (!%p5165_p11) }
 0x112   : > { %417 = sbr.rel (%p5165_p11) target bundleno = 1565 (0x61d), region = 48 }
 0x117   : > { %s4633_s30 = sand.u32 (!%p5165_p11), 1, %s5166_s21   ;;  %p5168_p0 = scmp.ne.s32.totalorder (!%p5165_p11), %s5167_s6, 0 }
 0x118   : > { %s3024_s25 = sshll.u32 (!%p5165_p11), %s4633_s30, 3  ;;  %s420_s11 = scalar_lea.sflag (!%p5165_p11), [#allocation7], %s4633_s30 }
 0x119   : > { %s4637_s14 = scalar_lea.vmem [#allocation6], %s3024_s25 }
 0x11a   : > { %4056 = dma.done.wait (%p5168_p0), %s420_s11, 128  }
 0x11b   : > { %4058 = vsyncadd (%p5168_p0), %s420_s11, 4294967168  ;;  %s5169_s9 = sld [smem:[#allocation35_spill]]  ;;  %s4645_s5 = sshll.u32 %s4633_s30, 4 }
 0x11c   : > { %s4648_s1 = scalar_lea.vmem [#allocation9], %s4645_s5 }
 0x121   : > { %s428_s16 = sand.u32 1, %s5169_s9  }
 0x122   : > { %s429_s26 = scalar_lea.sflag [#allocation10], %s428_s16 }
 0x123   : > { %4060 = dma.done.wait (%p5168_p0), %s429_s26, 512  }
 0x124   : > { %4062 = vsyncadd (%p5168_p0), %s429_s26, 4294966784  ;;  %s441_s28 = scalar_lea.vmem [#allocation11], %s4645_s5  ;;  %p5170_p2 = scmp.eq.s32.totalorder %s5169_s9, 0 }
 0x126   : > { %4064 = dma.done.wait (%p5170_p2), [#allocation13], 4352   ;;  %p5171_p1 = pmov %p5170_p2 }
 0x127   : > { %s5172_s7 = sld [smem:[#allocation29_spill]]  ;;  %s5173_s15 = sld [smem:[#allocation37_spill]] }
 0x128   : > { %4066 = vsyncadd (%p5171_p1), [#allocation13], 4294962944  ;;  %s455_s27 = scalar_lea.sflag [#allocation16], %s428_s16 }
 0x12d   : > { %s456_s3 = sand.u32 1, %s5172_s7   ;;  %p5174_p13 = scmp.ne.s32.totalorder %s5173_s15, 0 }
 0x12e   : > { %s3029_s24 = sshll.u32 %s456_s3, 10 }
 0x12f   : > { %s4660_s12 = scalar_lea.vmem [#allocation15], %s3029_s24 }
 0x130   : > { %4068 = dma.done.wait (%p5174_p13), %s455_s27, 16400  }
 0x131   : > { %4070 = vsyncadd (%p5174_p13), %s455_s27, 4294950896  ;;  %s5175_s23 = sld [smem:[#allocation28_spill]]  ;;  %s4671_s6 = scalar_lea.vmem [#allocation17], %s456_s3 }
 0x132   : > { %s4675_s11 = scalar_lea.vmem [#allocation19], %s4645_s5  ;;  %s5176_s9 = sld [smem:[#allocation32_spill]] }
 0x137   : > { %s513_s19 = sand.u32 1, %s5175_s23  }
 0x138   : > { %s4669_s21 = sshll.u32 %s513_s19, 3  ;;  %p3032_p6 = scmp.ne.s32.totalorder %s5176_s9, 0 }
 0x139   : > { %s515_s25 = scalar_lea.vmem [#allocation18], %s4669_s21  ;;  %v535_v0 = vld [vmem:[%s4648_s1] sm:$0xff] (!%p3032_p6)  ;;  %v536_v1 = vld [vmem:[%s4648_s1 + $0x8] sm:$0xff] (!%p3032_p6)  ;;  %v4147_v3 = vmov (!%p3032_p6), 0   ;;  %v4148_v28 = vmov (!%p3032_p6), 839922192   ;;  %v546_v30 = vlaneseq (!%p3032_p6) }
 0x13a   : > { %532 = sbr.rel (%p3032_p6) target bundleno = 696 (0x2b8), region = 80  ;;  %v561_v2 = vld [vmem:[#allocation12] sm:$0xff] (!%p3032_p6)  ;;  %3594 = vset.pattern.permute.xlu0 (!%p3032_p6), %v4147_v3  ;;  %v537_v4 = vpack.c.bf16 (!%p3032_p6), %v536_v1, %v535_v0  ;;  %v562_v6 = vld [vmem:[#allocation12 + $0x8] sm:$0xff] (!%p3032_p6)  ;;  %878 = vmatprep.mubr.bf16.mxu0 (!%p3032_p6), %v4147_v3  ;;  %v563_v20 = vld [vmem:[#allocation12 + $0x10] sm:$0xff] (!%p3032_p6)  ;;  %v544_v29 = vunpack.c.l.s4 (!%p3032_p6), %v4148_v28  ;;  %v4149_v31 = vmov (!%p3032_p6), 1985246804  }
 0x13b   : > { %v569_v5 = vld [vmem:[#allocation12 + $0x40] sm:$0xff] (!%p3032_p6)  ;;  %v570_v7 = vld [vmem:[#allocation12 + $0x48] sm:$0xff] (!%p3032_p6)  ;;  %921 = vmatprep.mubr.bf16.mxu1 (!%p3032_p6), %v4147_v3  ;;  %v571_v21 = vld [vmem:[#allocation12 + $0x50] sm:$0xff] (!%p3032_p6)  ;;  %v551_v32 = vunpack.c.l.s4 (!%p3032_p6), %v4149_v31  ;;  %v4683_v34 = vshrl.u32 (!%p3032_p6), %v546_v30, 7  ;;  %vm842_vm0 = vcmask (!%p3032_p6), 261120   ;;  %vm1254_vm1 = vcmask (!%p3032_p6), 7168  }
 0x13c   : > { %v3035_v8 = vcombine.high (!%p3032_p6), %v561_v2, %v569_v5  ;;  %v3037_v9 = vcombine.high (!%p3032_p6), %v562_v6, %v570_v7  ;;  %v3034_v10 = vcombine.low (!%p3032_p6), %v561_v2, %v569_v5  ;;  %v3036_v11 = vcombine.low (!%p3032_p6), %v562_v6, %v570_v7  ;;  %v577_v12 = vld [vmem:[#allocation12 + $0x80] sm:$0xff] (!%p3032_p6)  ;;  %540 = vperm.xlu0 (!%p3032_p6), %3594, %v537_v4   ;;  %v578_v14 = vld [vmem:[#allocation12 + $0x88] sm:$0xff] (!%p3032_p6)  ;;  %v564_v22 = vld [vmem:[#allocation12 + $0x18] sm:$0xff] (!%p3032_p6) }
 0x13d   : > { %v585_v13 = vld [vmem:[#allocation12 + $0xc0] sm:$0xff] (!%p3032_p6)  ;;  %v586_v15 = vld [vmem:[#allocation12 + $0xc8] sm:$0xff] (!%p3032_p6)  ;;  %v3038_v23 = vcombine.low (!%p3032_p6), %v563_v20, %v571_v21  ;;  %v3039_v24 = vcombine.high (!%p3032_p6), %v563_v20, %v571_v21  ;;  %v572_v25 = vld [vmem:[#allocation12 + $0x58] sm:$0xff] (!%p3032_p6)  ;;  %v545_v33 = vunpack.c.0.s8 (!%p3032_p6), %v544_v29  ;;  %v552_v35 = vunpack.c.0.s8 (!%p3032_p6), %v551_v32 }
 0x13e   : > { %846 = vmatprep.subr.bf16.mxu0 (!%p3032_p6), %v3035_v8  ;;  %889 = vmatprep.subr.bf16.mxu1 (!%p3032_p6), %v3037_v9  ;;  %v3051_v16 = vcombine.high (!%p3032_p6), %v577_v12, %v585_v13  ;;  %v3053_v17 = vcombine.high (!%p3032_p6), %v578_v14, %v586_v15  ;;  %v3050_v18 = vcombine.low (!%p3032_p6), %v577_v12, %v585_v13  ;;  %v533_v39 = vld [vmem:[%s4637_s14] sm:$0xf] (!%p3032_p6)  ;;  %v534_v40 = vld [vmem:[%s4637_s14 + $0x4] sm:$0xf] (!%p3032_p6)  ;;  %v565_v52 = vld [vmem:[#allocation12 + $0x20] sm:$0xff] (!%p3032_p6)  ;;  %v611_v28 = vsub.s32 (!%p3032_p6), 3, %v4683_v34 }
 0x13f   : > { %847 = vmatpush1.bf16.msra.mxu0 (!%p3032_p6), %v3034_v10  ;;  %890 = vmatpush1.bf16.msra.mxu1 (!%p3032_p6), %v3036_v11  ;;  %v3052_v19 = vcombine.low (!%p3032_p6), %v578_v14, %v586_v15  ;;  %v3040_v26 = vcombine.low (!%p3032_p6), %v564_v22, %v572_v25  ;;  %v3041_v27 = vcombine.high (!%p3032_p6), %v564_v22, %v572_v25  ;;  %v579_v43 = vld [vmem:[#allocation12 + $0x90] sm:$0xff] (!%p3032_p6)  ;;  %v580_v45 = vld [vmem:[#allocation12 + $0x98] sm:$0xff] (!%p3032_p6)  ;;  %v573_v53 = vld [vmem:[#allocation12 + $0x60] sm:$0xff] (!%p3032_p6)  ;;  %v599_v25 = vsub.s32 (!%p3032_p6), 0, %v4683_v34 }
 0x140   : > { %848 = vmatprep.subr.bf16.mxu0 (!%p3032_p6), %v3051_v16  ;;  %891 = vmatprep.subr.bf16.mxu1 (!%p3032_p6), %v3053_v17  ;;  %v548_v36 = vsub.s32 (!%p3032_p6), %v545_v33, %v4683_v34  ;;  %v555_v37 = vsub.s32 (!%p3032_p6), %v552_v35, %v4683_v34  ;;  %v587_v44 = vld [vmem:[#allocation12 + $0xd0] sm:$0xff] (!%p3032_p6)  ;;  %v588_v46 = vld [vmem:[#allocation12 + $0xd8] sm:$0xff] (!%p3032_p6)  ;;  %v566_v54 = vld [vmem:[#allocation12 + $0x28] sm:$0xff] (!%p3032_p6)  ;;  %v3043_v58 = vcombine.high (!%p3032_p6), %v565_v52, %v573_v53  ;;  %v615_v33 = vsub.s32 (!%p3032_p6), 4, %v4683_v34 }
 0x141   : > { %v3055_v50 = vcombine.high %v579_v43, %v587_v44  ;;  %v3057_v51 = vcombine.high %v580_v45, %v588_v46  ;;  %v574_v55 = vld [vmem:[#allocation12 + $0x68] sm:$0xff]  ;;  %v3054_v56 = vcombine.low %v579_v43, %v587_v44  ;;  %v3056_v57 = vcombine.low %v580_v45, %v588_v46  ;;  %v581_v60 = vld [vmem:[#allocation12 + $0xa0] sm:$0xff]  ;;  %v567_v5 = vld [vmem:[#allocation12 + $0x30] sm:$0xff] }
 0x142   : > { %v3045_v59 = vcombine.high %v566_v54, %v574_v55  ;;  %v589_v61 = vld [vmem:[#allocation12 + $0xe0] sm:$0xff]  ;;  %v582_v62 = vld [vmem:[#allocation12 + $0xa8] sm:$0xff]  ;;  %v3042_v0 = vcombine.low %v565_v52, %v573_v53  ;;  %v3044_v1 = vcombine.low %v566_v54, %v574_v55  ;;  %v575_v6 = vld [vmem:[#allocation12 + $0x70] sm:$0xff]  ;;  %v623_v35 = vsub.s32 6, %v4683_v34 }
 0x143   : > { %849 = vmatpush1.bf16.msra.mxu0 %v3050_v18  ;;  %892 = vmatpush1.bf16.msra.mxu1 %v3052_v19  ;;  %v590_v63 = vld [vmem:[#allocation12 + $0xe8] sm:$0xff]  ;;  %v3059_v2 = vcombine.high %v581_v60, %v589_v61  ;;  %v568_v7 = vld [vmem:[#allocation12 + $0x38] sm:$0xff]  ;;  %v3058_v9 = vcombine.low %v581_v60, %v589_v61  ;;  %v3047_v11 = vcombine.high %v567_v5, %v575_v6  ;;  %v583_v13 = vld [vmem:[#allocation12 + $0xb0] sm:$0xff] }
 0x144   : > { %932 = vmatprep.subr.bf16.mxu0 %v3039_v24  ;;  %975 = vmatprep.subr.bf16.mxu1 %v3041_v27  ;;  %v3061_v4 = vcombine.high %v582_v62, %v590_v63  ;;  %v576_v8 = vld [vmem:[#allocation12 + $0x78] sm:$0xff]  ;;  %v3060_v10 = vcombine.low %v582_v62, %v590_v63  ;;  %v591_v14 = vld [vmem:[#allocation12 + $0xf0] sm:$0xff]  ;;  %v3046_v17 = vcombine.low %v567_v5, %v575_v6  ;;  %v4151_v24 = vmov 0.0  }
 0x145   : > { %v3049_v12 = vcombine.high %v568_v7, %v576_v8  ;;  %v584_v15 = vld [vmem:[#allocation12 + $0xb8] sm:$0xff]  ;;  %v3048_v18 = vcombine.low %v568_v7, %v576_v8  ;;  %v3063_v19 = vcombine.high %v583_v13, %v591_v14  ;;  %v3062_v21 = vcombine.low %v583_v13, %v591_v14  ;;  %1257 = vst.msk [vmem:[#allocation4] sm:$0xff] %vm1254_vm1, %v4151_v24 }
 0x146   : > { %v592_v16 = vld [vmem:[#allocation12 + $0xf8] sm:$0xff]  ;;  %1258 = vst.msk [vmem:[#allocation4 + $0x8] sm:$0xff] %vm1254_vm1, %v4151_v24  ;;  %1259 = vst.msk [vmem:[#allocation5] sm:$0xff] %vm1254_vm1, %v4151_v24  ;;  %v603_v27 = vsub.s32 1, %v4683_v34 }
 0x147   : > { %v3065_v20 = vcombine.high %v584_v15, %v592_v16  ;;  %v3064_v22 = vcombine.low %v584_v15, %v592_v16  ;;  %1260 = vst.msk [vmem:[#allocation5 + $0x8] sm:$0xff] %vm1254_vm1, %v4151_v24 }
 0x1bb   : > { %v541_v38 = vpop.permute.xlu0 %540 }
 0x1bc   : > { %v549_v41 = vrot.slane %v541_v38, %v548_v36  ;;  %v556_v42 = vrot.slane %v541_v38, %v555_v37  ;;  %v619_v38 = vsub.s32 5, %v4683_v34 }
 0x1be   : > { %v559_v47 = vmul.bf16 %v549_v41, %v533_v39  ;;  %v560_v48 = vmul.bf16 %v556_v42, %v534_v40  ;;  %v627_v39 = vsub.s32 7, %v4683_v34 }
 0x1c0   : > { %v4689_v49 = vcombine.low %v559_v47, %v560_v48 }
 0x1c2   : > { %3066 = vmatmul.mubr.msk.bf16.vlgmr.msra.gmra.mrb[0].mxu0 %vm842_vm0, %v4689_v49  ;;  %3067 = vmatmul.mubr.msk.bf16.vlgmr.msra.gmra.mrb[0].mxu1 %vm842_vm0, %v4689_v49 }
 0x1c3   : > { %933 = vmatpush1.bf16.msra.mxu0 %v3038_v23  ;;  %976 = vmatpush1.bf16.msra.mxu1 %v3040_v26  ;;  %v4150_v23 = vmov -inf   ;;  %v593_v26 = vld [vmem:[#allocation14] sm:$0xff] }
 0x1c4   : > { %934 = vmatprep.subr.bf16.mxu0 %v3055_v50  ;;  %977 = vmatprep.subr.bf16.mxu1 %v3057_v51  ;;  %1255 = vst.msk [vmem:[#allocation3] sm:$0xff] %vm1254_vm1, %v4150_v23  ;;  %1256 = vst.msk [vmem:[#allocation3 + $0x8] sm:$0xff] %vm1254_vm1, %v4150_v23  ;;  %v600_v29 = vrot.slane %v593_v26, %v599_v25  ;;  %v604_v31 = vrot.slane %v593_v26, %v603_v27 }
 0x1c5   : > { %964 = vmatprep.mubr.bf16.mxu0 %v4147_v3  ;;  %1007 = vmatprep.mubr.bf16.mxu1 %v4147_v3  ;;  %v612_v32 = vrot.slane %v593_v26, %v611_v28  ;;  %v616_v52 = vrot.slane %v593_v26, %v615_v33  ;;  %v624_v53 = vrot.slane %v593_v26, %v623_v35 }
 0x1c7   : > { %935 = vmatpush1.bf16.msra.mxu0 %v3054_v56  ;;  %978 = vmatpush1.bf16.msra.mxu1 %v3056_v57  ;;  %v620_v56 = vrot.slane %v593_v26, %v619_v38  ;;  %v628_v57 = vrot.slane %v593_v26, %v627_v39 }
 0x1c8   : > { %1018 = vmatprep.subr.bf16.mxu0 %v3043_v58  ;;  %1061 = vmatprep.subr.bf16.mxu1 %v3045_v59 }
 0x1ca   : > { %3068 = vmatmul.mubr.msk.bf16.vlgmr.msra.gmra.mrb[4].mxu0 %vm842_vm0, %v4689_v49  ;;  %3069 = vmatmul.mubr.msk.bf16.vlgmr.msra.gmra.mrb[4].mxu1 %vm842_vm0, %v4689_v49 }
 0x1cb   : > { %1019 = vmatpush1.bf16.msra.mxu0 %v3042_v0  ;;  %1062 = vmatpush1.bf16.msra.mxu1 %v3044_v1 }
 0x1cc   : > { %1020 = vmatprep.subr.bf16.mxu0 %v3059_v2  ;;  %1063 = vmatprep.subr.bf16.mxu1 %v3061_v4 }
 0x1cd   : > { %1050 = vmatprep.mubr.bf16.mxu0 %v4147_v3  ;;  %1093 = vmatprep.mubr.bf16.mxu1 %v4147_v3 }
 0x1cf   : > { %1021 = vmatpush1.bf16.msra.mxu0 %v3058_v9  ;;  %1064 = vmatpush1.bf16.msra.mxu1 %v3060_v10  ;;  %v594_v9 = vld [vmem:[#allocation14 + $0x8] sm:$0xff] }
 0x1d0   : > { %1104 = vmatprep.subr.bf16.mxu0 %v3047_v11  ;;  %1147 = vmatprep.subr.bf16.mxu1 %v3049_v12 }
 0x1d2   : > { %3070 = vmatmul.mubr.msk.bf16.vlgmr.msra.gmra.mrb[8].mxu0 %vm842_vm0, %v4689_v49  ;;  %3071 = vmatmul.mubr.msk.bf16.vlgmr.msra.gmra.mrb[8].mxu1 %vm842_vm0, %v4689_v49 }
 0x1d3   : > { %1105 = vmatpush1.bf16.msra.mxu0 %v3046_v17  ;;  %1148 = vmatpush1.bf16.msra.mxu1 %v3048_v18 }
 0x1d4   : > { %1106 = vmatprep.subr.bf16.mxu0 %v3063_v19  ;;  %1149 = vmatprep.subr.bf16.mxu1 %v3065_v20 }
 0x1d5   : > { %1136 = vmatprep.mubr.bf16.mxu0 %v4147_v3  ;;  %1179 = vmatprep.mubr.bf16.mxu1 %v4147_v3  ;;  %v607_v3 = vsub.s32 2, %v4683_v34 }
 0x1d7   : > { %1107 = vmatpush1.bf16.msra.mxu0 %v3062_v21  ;;  %1150 = vmatpush1.bf16.msra.mxu1 %v3064_v22  ;;  %v608_v30 = vrot.slane %v593_v26, %v607_v3  ;;  %v632_v22 = vrot.slane %v594_v9, %v599_v25  ;;  %v640_v23 = vrot.slane %v594_v9, %v607_v3 }
 0x1da   : > { %3072 = vmatmul.mubr.msk.bf16.vlgmr.msra.gmra.mrb[12].mxu0 %vm842_vm0, %v4689_v49  ;;  %3073 = vmatmul.mubr.msk.bf16.vlgmr.msra.gmra.mrb[12].mxu1 %vm842_vm0, %v4689_v49 }
 0x295   : > { %v880_v36 = vpop.f32.mrb[0].mxu0  ;;  %v923_v37 = vpop.f32.mrb[0].mxu1 }
 0x296   : > { %v881_v40 = vadd.f32 %v880_v36, %v600_v29  ;;  %v924_v41 = vadd.f32 %v923_v37, %v608_v30  ;;  %v882_v42 = vpop.f32.mrb[1].mxu0  ;;  %v925_v43 = vpop.f32.mrb[1].mxu1 }
 0x297   : > { %v883_v44 = vadd.f32 %v882_v42, %v604_v31  ;;  %v926_v45 = vadd.f32 %v925_v43, %v612_v32  ;;  %v884_v46 = vpop.f32.mrb[2].mxu0  ;;  %v927_v47 = vpop.f32.mrb[2].mxu1 }
 0x298   : > { %v885_v48 = vadd.f32 %v884_v46, %v600_v29  ;;  %v928_v49 = vadd.f32 %v927_v47, %v608_v30  ;;  %v886_v50 = vpop.f32.mrb[3].mxu0  ;;  %v929_v51 = vpop.f32.mrb[3].mxu1  ;;  %v1190_v58 = vmax.f32 %v881_v40, 0.0  ;;  %v1192_v59 = vmax.f32 %v924_v41, 0.0 }
 0x299   : > { %v887_v54 = vadd.f32 %v886_v50, %v604_v31  ;;  %v930_v55 = vadd.f32 %v929_v51, %v612_v32  ;;  %v1191_v62 = vmax.f32 %v883_v44, 0.0  ;;  %v1193_v63 = vmax.f32 %v926_v45, 0.0 }
 0x29a   : > { %v1206_v60 = vmax.f32 %v885_v48, 0.0  ;;  %v1208_v61 = vmax.f32 %v928_v49, 0.0  ;;  %v636_v29 = vrot.slane %v594_v9, %v603_v27  ;;  %v644_v30 = vrot.slane %v594_v9, %v611_v28 }
 0x29b   : > { %v1207_v0 = vmax.f32 %v887_v54, 0.0  ;;  %v1209_v1 = vmax.f32 %v930_v55, 0.0 }
 0x29c   : > { %v1222_v2 = vpack.c.bf16 %v1206_v60, %v1190_v58  ;;  %v1224_v4 = vpack.c.bf16 %v1208_v61, %v1192_v59  ;;  %v648_v58 = vrot.slane %v594_v9, %v615_v33  ;;  %v656_v59 = vrot.slane %v594_v9, %v623_v35 }
 0x29d   : > { %v1223_v5 = vpack.c.bf16 %v1207_v0, %v1191_v62  ;;  %v1225_v6 = vpack.c.bf16 %v1209_v1, %v1193_v63  ;;  %v966_v7 = vpop.f32.mrb[4].mxu0  ;;  %v1009_v8 = vpop.f32.mrb[4].mxu1  ;;  %v652_v62 = vrot.slane %v594_v9, %v619_v38  ;;  %v660_v63 = vrot.slane %v594_v9, %v627_v39 }
 0x29e   : > { %1238 = vst [vmem:[#allocation2] sm:$0xff] %v1222_v2  ;;  %1240 = vst [vmem:[#allocation2 + $0x10] sm:$0xff] %v1224_v4  ;;  %v967_v10 = vadd.f32 %v966_v7, %v616_v52  ;;  %v1010_v11 = vadd.f32 %v1009_v8, %v624_v53  ;;  %v968_v12 = vpop.f32.mrb[5].mxu0  ;;  %v1011_v13 = vpop.f32.mrb[5].mxu1 }
 0x29f   : > { %1239 = vst [vmem:[#allocation2 + $0x8] sm:$0xff] %v1223_v5  ;;  %1241 = vst [vmem:[#allocation2 + $0x18] sm:$0xff] %v1225_v6  ;;  %v969_v14 = vadd.f32 %v968_v12, %v620_v56  ;;  %v1012_v15 = vadd.f32 %v1011_v13, %v628_v57  ;;  %v970_v16 = vpop.f32.mrb[6].mxu0  ;;  %v1013_v17 = vpop.f32.mrb[6].mxu1 }
 0x2a0   : > { %v971_v18 = vadd.f32 %v970_v16, %v616_v52  ;;  %v1014_v19 = vadd.f32 %v1013_v17, %v624_v53  ;;  %v972_v20 = vpop.f32.mrb[7].mxu0  ;;  %v1015_v21 = vpop.f32.mrb[7].mxu1  ;;  %v1194_v31 = vmax.f32 %v967_v10, 0.0  ;;  %v1196_v32 = vmax.f32 %v1010_v11, 0.0 }
 0x2a1   : > { %v973_v24 = vadd.f32 %v972_v20, %v620_v56  ;;  %v1016_v26 = vadd.f32 %v1015_v21, %v628_v57  ;;  %v1195_v40 = vmax.f32 %v969_v14, 0.0  ;;  %v1197_v41 = vmax.f32 %v1012_v15, 0.0 }
 0x2a2   : > { %v1210_v36 = vmax.f32 %v971_v18, 0.0  ;;  %v1212_v37 = vmax.f32 %v1014_v19, 0.0 }
 0x2a3   : > { %v1211_v42 = vmax.f32 %v973_v24, 0.0  ;;  %v1213_v43 = vmax.f32 %v1016_v26, 0.0 }
 0x2a4   : > { %v1226_v25 = vpack.c.bf16 %v1210_v36, %v1194_v31  ;;  %v1228_v44 = vpack.c.bf16 %v1212_v37, %v1196_v32 }
 0x2a5   : > { %v1227_v45 = vpack.c.bf16 %v1211_v42, %v1195_v40  ;;  %v1229_v3 = vpack.c.bf16 %v1213_v43, %v1197_v41  ;;  %v1052_v46 = vpop.f32.mrb[8].mxu0  ;;  %v1095_v47 = vpop.f32.mrb[8].mxu1 }
 0x2a6   : > { %1242 = vst [vmem:[#allocation2 + $0x20] sm:$0xff] %v1226_v25  ;;  %1244 = vst [vmem:[#allocation2 + $0x30] sm:$0xff] %v1228_v44  ;;  %v1053_v27 = vadd.f32 %v1052_v46, %v632_v22  ;;  %v1096_v48 = vadd.f32 %v1095_v47, %v640_v23  ;;  %v1054_v49 = vpop.f32.mrb[9].mxu0  ;;  %v1097_v28 = vpop.f32.mrb[9].mxu1 }
 0x2a7   : > { %1243 = vst [vmem:[#allocation2 + $0x28] sm:$0xff] %v1227_v45  ;;  %1245 = vst [vmem:[#allocation2 + $0x38] sm:$0xff] %v1229_v3  ;;  %v1055_v50 = vadd.f32 %v1054_v49, %v636_v29  ;;  %v1098_v51 = vadd.f32 %v1097_v28, %v644_v30  ;;  %v1056_v52 = vpop.f32.mrb[10].mxu0  ;;  %v1099_v53 = vpop.f32.mrb[10].mxu1 }
 0x2a8   : > { %v1057_v54 = vadd.f32 %v1056_v52, %v632_v22  ;;  %v1100_v55 = vadd.f32 %v1099_v53, %v640_v23  ;;  %v1058_v56 = vpop.f32.mrb[11].mxu0  ;;  %v1101_v57 = vpop.f32.mrb[11].mxu1  ;;  %v1198_v0 = vmax.f32 %v1053_v27, 0.0  ;;  %v1200_v1 = vmax.f32 %v1096_v48, 0.0 }
 0x2a9   : > { %v1059_v60 = vadd.f32 %v1058_v56, %v636_v29  ;;  %v1102_v61 = vadd.f32 %v1101_v57, %v644_v30  ;;  %v1199_v5 = vmax.f32 %v1055_v50, 0.0  ;;  %v1201_v6 = vmax.f32 %v1098_v51, 0.0 }
 0x2aa   : > { %v1214_v2 = vmax.f32 %v1057_v54, 0.0  ;;  %v1216_v4 = vmax.f32 %v1100_v55, 0.0 }
 0x2ab   : > { %v1215_v7 = vmax.f32 %v1059_v60, 0.0  ;;  %v1217_v8 = vmax.f32 %v1102_v61, 0.0 }
 0x2ac   : > { %v1230_v33 = vpack.c.bf16 %v1214_v2, %v1198_v0  ;;  %v1232_v10 = vpack.c.bf16 %v1216_v4, %v1200_v1 }
 0x2ad   : > { %v1231_v11 = vpack.c.bf16 %v1215_v7, %v1199_v5  ;;  %v1233_v35 = vpack.c.bf16 %v1217_v8, %v1201_v6  ;;  %v1138_v12 = vpop.f32.mrb[12].mxu0  ;;  %v1181_v13 = vpop.f32.mrb[12].mxu1 }
 0x2ae   : > { %1246 = vst [vmem:[#allocation2 + $0x40] sm:$0xff] %v1230_v33  ;;  %1248 = vst [vmem:[#allocation2 + $0x50] sm:$0xff] %v1232_v10  ;;  %v1139_v38 = vadd.f32 %v1138_v12, %v648_v58  ;;  %v1182_v14 = vadd.f32 %v1181_v13, %v656_v59  ;;  %v1140_v34 = vpop.f32.mrb[13].mxu0  ;;  %v1183_v39 = vpop.f32.mrb[13].mxu1 }
 0x2af   : > { %1247 = vst [vmem:[#allocation2 + $0x48] sm:$0xff] %v1231_v11  ;;  %1249 = vst [vmem:[#allocation2 + $0x58] sm:$0xff] %v1233_v35  ;;  %v1141_v9 = vadd.f32 %v1140_v34, %v652_v62  ;;  %v1184_v15 = vadd.f32 %v1183_v39, %v660_v63  ;;  %v1142_v16 = vpop.f32.mrb[14].mxu0  ;;  %v1185_v17 = vpop.f32.mrb[14].mxu1 }
 0x2b0   : > { %v1143_v18 = vadd.f32 %v1142_v16, %v648_v58  ;;  %v1186_v19 = vadd.f32 %v1185_v17, %v656_v59  ;;  %v1144_v20 = vpop.f32.mrb[15].mxu0  ;;  %v1187_v21 = vpop.f32.mrb[15].mxu1  ;;  %v1202_v24 = vmax.f32 %v1139_v38, 0.0  ;;  %v1204_v26 = vmax.f32 %v1182_v14, 0.0 }
 0x2b1   : > { %v1145_v22 = vadd.f32 %v1144_v20, %v652_v62  ;;  %v1188_v23 = vadd.f32 %v1187_v21, %v660_v63  ;;  %v1203_v31 = vmax.f32 %v1141_v9, 0.0  ;;  %v1205_v32 = vmax.f32 %v1184_v15, 0.0 }
 0x2b2   : > { %v1218_v29 = vmax.f32 %v1143_v18, 0.0  ;;  %v1220_v30 = vmax.f32 %v1186_v19, 0.0 }
 0x2b3   : > { %v1219_v36 = vmax.f32 %v1145_v22, 0.0  ;;  %v1221_v37 = vmax.f32 %v1188_v23, 0.0 }
 0x2b4   : > { %v1234_v40 = vpack.c.bf16 %v1218_v29, %v1202_v24  ;;  %v1236_v41 = vpack.c.bf16 %v1220_v30, %v1204_v26 }
 0x2b5   : > { %v1235_v42 = vpack.c.bf16 %v1219_v36, %v1203_v31  ;;  %v1237_v43 = vpack.c.bf16 %v1221_v37, %v1205_v32 }
 0x2b6   : > { %1250 = vst [vmem:[#allocation2 + $0x60] sm:$0xff] %v1234_v40  ;;  %1252 = vst [vmem:[#allocation2 + $0x70] sm:$0xff] %v1236_v41 }
 0x2b7   : > { %1251 = vst [vmem:[#allocation2 + $0x68] sm:$0xff] %v1235_v42  ;;  %1253 = vst [vmem:[#allocation2 + $0x78] sm:$0xff] %v1237_v43 }
 0x2b8 PF: > { %v3597_v25 = vld [vmem:[%s4660_s12 + $0x40] sm:$0xff]   ;;  %v3601_v46 = vld [vmem:[%s4660_s12 + $0x48] sm:$0xff]   ;;  %v3605_v49 = vld [vmem:[%s4660_s12 + $0x50] sm:$0xff]   ;;  %s5177_s14 = sld [smem:[#allocation32_spill]]  ;;  %vm2686_vm2 = vcmask 7168  }
 0x2b9   : > { %v3598_v44 = vld [vmem:[%s4660_s12 + $0xc0] sm:$0xff]   ;;  %3230 = vmatprep.subr.bf16.mxu0 %v3597_v25  ;;  %v3602_v47 = vld [vmem:[%s4660_s12 + $0xc8] sm:$0xff]   ;;  %v3606_v28 = vld [vmem:[%s4660_s12 + $0xd0] sm:$0xff]  }
 0x2ba   : > { %v3599_v45 = vld [vmem:[%s4660_s12] sm:$0xff]   ;;  %3252 = vmatprep.subr.bf16.mxu1 %v3598_v44  ;;  %v3603_v27 = vld [vmem:[%s4660_s12 + $0x8] sm:$0xff]   ;;  %v3607_v50 = vld [vmem:[%s4660_s12 + $0x10] sm:$0xff]  }
 0x2bb   : > { %v3600_v3 = vld [vmem:[%s4660_s12 + $0x80] sm:$0xff]   ;;  %3231 = vmatpush3.bf16.msra.mxu0 %v3599_v45  ;;  %v3604_v48 = vld [vmem:[%s4660_s12 + $0x88] sm:$0xff]   ;;  %v3608_v51 = vld [vmem:[%s4660_s12 + $0x90] sm:$0xff]  }
 0x2bc   : > { %3253 = vmatpush3.bf16.msra.mxu1 %v3600_v3  ;;  %3232 = vmatprep.subr.bf16.mxu0 %v3601_v46  ;;  %v3609_v52 = vld [vmem:[%s4660_s12 + $0x58] sm:$0xff]   ;;  %v3613_v56 = vld [vmem:[%s4660_s12 + $0x60] sm:$0xff]   ;;  %v3617_v60 = vld [vmem:[%s4660_s12 + $0x68] sm:$0xff]  }
 0x2bd   : > { %3254 = vmatprep.subr.bf16.mxu1 %v3602_v47  ;;  %v3610_v53 = vld [vmem:[%s4660_s12 + $0xd8] sm:$0xff]   ;;  %v3614_v57 = vld [vmem:[%s4660_s12 + $0xe0] sm:$0xff]   ;;  %v3618_v61 = vld [vmem:[%s4660_s12 + $0xe8] sm:$0xff]  }
 0x2be   : > { %v3611_v54 = vld [vmem:[%s4660_s12 + $0x18] sm:$0xff]   ;;  %v3615_v58 = vld [vmem:[%s4660_s12 + $0x20] sm:$0xff]   ;;  %v3619_v62 = vld [vmem:[%s4660_s12 + $0x28] sm:$0xff]   ;;  %s3205_s16 = sshll.u32 %s5177_s14, 7  ;;  %p3206_p9 = scmp.ne.s32.totalorder %s5177_s14, 1 }
 0x2bf   : > { %3233 = vmatpush3.bf16.msra.mxu0 %v3603_v27  ;;  %v3612_v55 = vld [vmem:[%s4660_s12 + $0x98] sm:$0xff]   ;;  %v3616_v59 = vld [vmem:[%s4660_s12 + $0xa0] sm:$0xff]   ;;  %v3620_v63 = vld [vmem:[%s4660_s12 + $0xa8] sm:$0xff]  }
 0x2c0   : > { %3255 = vmatpush3.bf16.msra.mxu1 %v3604_v48  ;;  %3234 = vmatprep.subr.bf16.mxu0 %v3605_v49  ;;  %v3621_v0 = vld [vmem:[%s4660_s12 + $0x70] sm:$0xff]   ;;  %v3625_v5 = vld [vmem:[%s4660_s12 + $0x78] sm:$0xff]   ;;  %v1264_v10 = vld [vmem:[#allocation2 + $0x18] sm:$0xff] }
 0x2c1   : > { %3256 = vmatprep.subr.bf16.mxu1 %v3606_v28  ;;  %v3622_v1 = vld [vmem:[%s4660_s12 + $0xf0] sm:$0xff]   ;;  %v3626_v6 = vld [vmem:[%s4660_s12 + $0xf8] sm:$0xff]   ;;  %v1263_v35 = vld [vmem:[#allocation2 + $0x10] sm:$0xff]  ;;  %2381 = vmatprep.mubr.bf16.mxu1 %v1264_v10 }
 0x2c2   : > { %v3623_v2 = vld [vmem:[%s4660_s12 + $0x30] sm:$0xff]   ;;  %v3627_v7 = vld [vmem:[%s4660_s12 + $0x38] sm:$0xff]   ;;  %v3629_v12 = vld [vmem:[%s4660_s12 + $0x140] sm:$0xff]  }
 0x2c3   : > { %3235 = vmatpush3.bf16.msra.mxu0 %v3607_v50  ;;  %v3624_v4 = vld [vmem:[%s4660_s12 + $0xb0] sm:$0xff]   ;;  %v3628_v8 = vld [vmem:[%s4660_s12 + $0xb8] sm:$0xff]   ;;  %v3630_v13 = vld [vmem:[%s4660_s12 + $0x1c0] sm:$0xff]  }
 0x2c4   : > { %3257 = vmatpush3.bf16.msra.mxu1 %v3608_v51  ;;  %3236 = vmatprep.subr.bf16.mxu0 %v3609_v52  ;;  %v1262_v33 = vld [vmem:[#allocation2 + $0x8] sm:$0xff]  ;;  %v1261_v11 = vld [vmem:[#allocation2] sm:$0xff]  ;;  %v3631_v38 = vld [vmem:[%s4660_s12 + $0x100] sm:$0xff]  }
 0x2c5   : > { %3258 = vmatprep.subr.bf16.mxu1 %v3610_v53  ;;  %2340 = vmatprep.mubr.bf16.mxu0 %v1262_v33  ;;  %v3632_v14 = vld [vmem:[%s4660_s12 + $0x180] sm:$0xff]   ;;  %v3633_v34 = vld [vmem:[%s4660_s12 + $0x148] sm:$0xff]   ;;  %v3637_v16 = vld [vmem:[%s4660_s12 + $0x150] sm:$0xff]  }
 0x2c6   : > { %v3634_v39 = vld [vmem:[%s4660_s12 + $0x1c8] sm:$0xff]   ;;  %v3638_v17 = vld [vmem:[%s4660_s12 + $0x1d0] sm:$0xff]   ;;  %v3641_v20 = vld [vmem:[%s4660_s12 + $0x158] sm:$0xff]  }
 0x2c7   : > { %3237 = vmatpush3.bf16.msra.mxu0 %v3611_v54  ;;  %v3635_v9 = vld [vmem:[%s4660_s12 + $0x108] sm:$0xff]   ;;  %v3639_v18 = vld [vmem:[%s4660_s12 + $0x110] sm:$0xff]   ;;  %v3642_v21 = vld [vmem:[%s4660_s12 + $0x1d8] sm:$0xff]  }
 0x2c8   : > { %3259 = vmatpush3.bf16.msra.mxu1 %v3612_v55  ;;  %3238 = vmatprep.subr.bf16.mxu0 %v3613_v56  ;;  %v3636_v15 = vld [vmem:[%s4660_s12 + $0x188] sm:$0xff]   ;;  %v3640_v19 = vld [vmem:[%s4660_s12 + $0x190] sm:$0xff]   ;;  %v3643_v22 = vld [vmem:[%s4660_s12 + $0x118] sm:$0xff]  }
 0x2c9   : > { %3260 = vmatprep.subr.bf16.mxu1 %v3614_v57  ;;  %v3644_v23 = vld [vmem:[%s4660_s12 + $0x198] sm:$0xff]   ;;  %v3645_v24 = vld [vmem:[%s4660_s12 + $0x160] sm:$0xff]   ;;  %v3649_v31 = vld [vmem:[%s4660_s12 + $0x168] sm:$0xff]  }
 0x2ca   : > { %v3646_v26 = vld [vmem:[%s4660_s12 + $0x1e0] sm:$0xff]   ;;  %v3650_v32 = vld [vmem:[%s4660_s12 + $0x1e8] sm:$0xff]   ;;  %v3653_v40 = vld [vmem:[%s4660_s12 + $0x170] sm:$0xff]  }
 0x2cb   : > { %3239 = vmatpush3.bf16.msra.mxu0 %v3615_v58  ;;  %v3647_v29 = vld [vmem:[%s4660_s12 + $0x120] sm:$0xff]   ;;  %v3651_v36 = vld [vmem:[%s4660_s12 + $0x128] sm:$0xff]   ;;  %v3654_v41 = vld [vmem:[%s4660_s12 + $0x1f0] sm:$0xff]  }
 0x2cc   : > { %3261 = vmatpush3.bf16.msra.mxu1 %v3616_v59  ;;  %3240 = vmatprep.subr.bf16.mxu0 %v3617_v60  ;;  %v3648_v30 = vld [vmem:[%s4660_s12 + $0x1a0] sm:$0xff]   ;;  %v3652_v37 = vld [vmem:[%s4660_s12 + $0x1a8] sm:$0xff]   ;;  %v3655_v42 = vld [vmem:[%s4660_s12 + $0x130] sm:$0xff]  }
 0x2cd   : > { %3262 = vmatprep.subr.bf16.mxu1 %v3618_v61  ;;  %v3656_v43 = vld [vmem:[%s4660_s12 + $0x1b0] sm:$0xff]   ;;  %v3657_v25 = vld [vmem:[%s4660_s12 + $0x178] sm:$0xff]   ;;  %v1268_v47 = vld [vmem:[#allocation2 + $0x38] sm:$0xff] }
 0x2ce   : > { %v3658_v44 = vld [vmem:[%s4660_s12 + $0x1f8] sm:$0xff]   ;;  %v1265_v27 = vld [vmem:[#allocation2 + $0x20] sm:$0xff]  ;;  %v1267_v48 = vld [vmem:[#allocation2 + $0x30] sm:$0xff] }
 0x2cf   : > { %3241 = vmatpush3.bf16.msra.mxu0 %v3619_v62  ;;  %v3659_v45 = vld [vmem:[%s4660_s12 + $0x138] sm:$0xff]   ;;  %v3661_v49 = vld [vmem:[%s4660_s12 + $0x240] sm:$0xff]   ;;  %v3665_v52 = vld [vmem:[%s4660_s12 + $0x248] sm:$0xff]  }
 0x2d0   : > { %3263 = vmatpush3.bf16.msra.mxu1 %v3620_v63  ;;  %3242 = vmatprep.subr.bf16.mxu0 %v3621_v0  ;;  %v3660_v3 = vld [vmem:[%s4660_s12 + $0x1b8] sm:$0xff]   ;;  %v3662_v28 = vld [vmem:[%s4660_s12 + $0x2c0] sm:$0xff]   ;;  %v3666_v53 = vld [vmem:[%s4660_s12 + $0x2c8] sm:$0xff]  }
 0x2d1   : > { %3264 = vmatprep.subr.bf16.mxu1 %v3622_v1  ;;  %v1266_v46 = vld [vmem:[#allocation2 + $0x28] sm:$0xff]  ;;  %v3663_v50 = vld [vmem:[%s4660_s12 + $0x200] sm:$0xff]   ;;  %v3667_v54 = vld [vmem:[%s4660_s12 + $0x208] sm:$0xff]  }
 0x2d2   : > { %v3664_v51 = vld [vmem:[%s4660_s12 + $0x280] sm:$0xff]   ;;  %v3668_v55 = vld [vmem:[%s4660_s12 + $0x288] sm:$0xff]   ;;  %v3669_v56 = vld [vmem:[%s4660_s12 + $0x250] sm:$0xff]  }
 0x2d3   : > { %3243 = vmatpush3.bf16.msra.mxu0 %v3623_v2  ;;  %v3670_v57 = vld [vmem:[%s4660_s12 + $0x2d0] sm:$0xff]   ;;  %v3673_v60 = vld [vmem:[%s4660_s12 + $0x258] sm:$0xff]   ;;  %v3677_v0 = vld [vmem:[%s4660_s12 + $0x260] sm:$0xff]  }
 0x2d4   : > { %3265 = vmatpush3.bf16.msra.mxu1 %v3624_v4  ;;  %3244 = vmatprep.subr.bf16.mxu0 %v3625_v5  ;;  %v3671_v58 = vld [vmem:[%s4660_s12 + $0x210] sm:$0xff]   ;;  %v3674_v61 = vld [vmem:[%s4660_s12 + $0x2d8] sm:$0xff]   ;;  %v3678_v1 = vld [vmem:[%s4660_s12 + $0x2e0] sm:$0xff]  }
 0x2d5   : > { %3266 = vmatprep.subr.bf16.mxu1 %v3626_v6  ;;  %v3672_v59 = vld [vmem:[%s4660_s12 + $0x290] sm:$0xff]   ;;  %v3675_v62 = vld [vmem:[%s4660_s12 + $0x218] sm:$0xff]   ;;  %v3679_v2 = vld [vmem:[%s4660_s12 + $0x220] sm:$0xff]  }
 0x2d6   : > { %v3676_v63 = vld [vmem:[%s4660_s12 + $0x298] sm:$0xff]   ;;  %v3680_v4 = vld [vmem:[%s4660_s12 + $0x2a0] sm:$0xff]   ;;  %v3681_v5 = vld [vmem:[%s4660_s12 + $0x268] sm:$0xff]  }
 0x2d7   : > { %3245 = vmatpush3.bf16.msra.mxu0 %v3627_v7  ;;  %v3682_v6 = vld [vmem:[%s4660_s12 + $0x2e8] sm:$0xff]   ;;  %v3685_v33 = vld [vmem:[%s4660_s12 + $0x270] sm:$0xff]  }
 0x2d8   : > { %3267 = vmatpush3.bf16.msra.mxu1 %v3628_v8  ;;  %3274 = vmatprep.subr.bf16.mxu0 %v3629_v12  ;;  %v3683_v7 = vld [vmem:[%s4660_s12 + $0x228] sm:$0xff]   ;;  %v3686_v10 = vld [vmem:[%s4660_s12 + $0x2f0] sm:$0xff]   ;;  %v3689_v12 = vld [vmem:[%s4660_s12 + $0x278] sm:$0xff]  }
 0x2d9   : > { %3296 = vmatprep.subr.bf16.mxu1 %v3630_v13  ;;  %v3684_v8 = vld [vmem:[%s4660_s12 + $0x2a8] sm:$0xff]   ;;  %v3690_v13 = vld [vmem:[%s4660_s12 + $0x2f8] sm:$0xff]  }
 0x2da   : > { %2341 = vmatmul.mubr.bf16.vlgmr.msra.gmra.mrb[0].mxu0 %v1261_v11  ;;  %v3687_v11 = vld [vmem:[%s4660_s12 + $0x230] sm:$0xff]  }
 0x2db   : > { %2382 = vmatmul.mubr.bf16.vlgmr.msra.gmra.mrb[0].mxu1 %v1263_v35  ;;  %3275 = vmatpush3.bf16.msra.mxu0 %v3631_v38  ;;  %v3688_v35 = vld [vmem:[%s4660_s12 + $0x2b0] sm:$0xff]   ;;  %v3691_v38 = vld [vmem:[%s4660_s12 + $0x238] sm:$0xff]  }
 0x2dc   : > { %3297 = vmatpush3.bf16.msra.mxu1 %v3632_v14  ;;  %3276 = vmatprep.subr.bf16.mxu0 %v3633_v34  ;;  %v3692_v14 = vld [vmem:[%s4660_s12 + $0x2b8] sm:$0xff]  }
 0x2dd   : > { %3298 = vmatprep.subr.bf16.mxu1 %v3634_v39  ;;  %2422 = vmatprep.mubr.bf16.mxu0 %v1266_v46  ;;  %v1270_v34 = vld [vmem:[#allocation2 + $0x48] sm:$0xff]  ;;  %v1272_v39 = vld [vmem:[#allocation2 + $0x58] sm:$0xff]  ;;  %v3717_v46 = vld [vmem:[%s4660_s12 + $0x370] sm:$0xff]  }
 0x2de   : > { %2463 = vmatprep.mubr.bf16.mxu1 %v1268_v47  ;;  %v3718_v47 = vld [vmem:[%s4660_s12 + $0x3f0] sm:$0xff]  }
 0x2df   : > { %3277 = vmatpush3.bf16.msra.mxu0 %v3635_v9  ;;  %v1269_v9 = vld [vmem:[#allocation2 + $0x40] sm:$0xff] }
 0x2e0   : > { %3299 = vmatpush3.bf16.msra.mxu1 %v3636_v15  ;;  %3278 = vmatprep.subr.bf16.mxu0 %v3637_v16  ;;  %v1271_v15 = vld [vmem:[#allocation2 + $0x50] sm:$0xff] }
 0x2e1   : > { %3300 = vmatprep.subr.bf16.mxu1 %v3638_v17  ;;  %v3693_v16 = vld [vmem:[%s4660_s12 + $0x340] sm:$0xff]  }
 0x2e2   : > { %v3694_v17 = vld [vmem:[%s4660_s12 + $0x3c0] sm:$0xff]  }
 0x2e3   : > { %3279 = vmatpush3.bf16.msra.mxu0 %v3639_v18  ;;  %v3695_v18 = vld [vmem:[%s4660_s12 + $0x300] sm:$0xff]  }
 0x2e4   : > { %3301 = vmatpush3.bf16.msra.mxu1 %v3640_v19  ;;  %3280 = vmatprep.subr.bf16.mxu0 %v3641_v20  ;;  %v3696_v19 = vld [vmem:[%s4660_s12 + $0x380] sm:$0xff]   ;;  %v3697_v20 = vld [vmem:[%s4660_s12 + $0x348] sm:$0xff]  }
 0x2e5   : > { %3302 = vmatprep.subr.bf16.mxu1 %v3642_v21  ;;  %v3698_v21 = vld [vmem:[%s4660_s12 + $0x3c8] sm:$0xff]  }
 0x2e7   : > { %3281 = vmatpush3.bf16.msra.mxu0 %v3643_v22  ;;  %v3699_v22 = vld [vmem:[%s4660_s12 + $0x308] sm:$0xff]  }
 0x2e8   : > { %3303 = vmatpush3.bf16.msra.mxu1 %v3644_v23  ;;  %3282 = vmatprep.subr.bf16.mxu0 %v3645_v24  ;;  %v3700_v23 = vld [vmem:[%s4660_s12 + $0x388] sm:$0xff]   ;;  %v3701_v24 = vld [vmem:[%s4660_s12 + $0x350] sm:$0xff]  }
 0x2e9   : > { %3304 = vmatprep.subr.bf16.mxu1 %v3646_v26  ;;  %v3702_v26 = vld [vmem:[%s4660_s12 + $0x3d0] sm:$0xff]  }
 0x2eb   : > { %3283 = vmatpush3.bf16.msra.mxu0 %v3647_v29  ;;  %v3703_v29 = vld [vmem:[%s4660_s12 + $0x310] sm:$0xff]  }
 0x2ec   : > { %3305 = vmatpush3.bf16.msra.mxu1 %v3648_v30  ;;  %3284 = vmatprep.subr.bf16.mxu0 %v3649_v31  ;;  %v3704_v30 = vld [vmem:[%s4660_s12 + $0x390] sm:$0xff]   ;;  %v3705_v31 = vld [vmem:[%s4660_s12 + $0x358] sm:$0xff]  }
 0x2ed   : > { %3306 = vmatprep.subr.bf16.mxu1 %v3650_v32  ;;  %v3706_v32 = vld [vmem:[%s4660_s12 + $0x3d8] sm:$0xff]  }
 0x2ef   : > { %3285 = vmatpush3.bf16.msra.mxu0 %v3651_v36  ;;  %v3707_v36 = vld [vmem:[%s4660_s12 + $0x318] sm:$0xff]  }
 0x2f0   : > { %3307 = vmatpush3.bf16.msra.mxu1 %v3652_v37  ;;  %3286 = vmatprep.subr.bf16.mxu0 %v3653_v40  ;;  %v3708_v37 = vld [vmem:[%s4660_s12 + $0x398] sm:$0xff]   ;;  %v3709_v40 = vld [vmem:[%s4660_s12 + $0x360] sm:$0xff]  }
 0x2f1   : > { %3308 = vmatprep.subr.bf16.mxu1 %v3654_v41  ;;  %v3710_v41 = vld [vmem:[%s4660_s12 + $0x3e0] sm:$0xff]  }
 0x2f3   : > { %3287 = vmatpush3.bf16.msra.mxu0 %v3655_v42  ;;  %v3711_v42 = vld [vmem:[%s4660_s12 + $0x320] sm:$0xff]  }
 0x2f4   : > { %3309 = vmatpush3.bf16.msra.mxu1 %v3656_v43  ;;  %3288 = vmatprep.subr.bf16.mxu0 %v3657_v25  ;;  %v3712_v43 = vld [vmem:[%s4660_s12 + $0x3a0] sm:$0xff]   ;;  %v3713_v25 = vld [vmem:[%s4660_s12 + $0x368] sm:$0xff]  }
 0x2f5   : > { %3310 = vmatprep.subr.bf16.mxu1 %v3658_v44  ;;  %v3714_v44 = vld [vmem:[%s4660_s12 + $0x3e8] sm:$0xff]  }
 0x2f7   : > { %3289 = vmatpush3.bf16.msra.mxu0 %v3659_v45  ;;  %v3715_v45 = vld [vmem:[%s4660_s12 + $0x328] sm:$0xff]  }
 0x2f8   : > { %3311 = vmatpush3.bf16.msra.mxu1 %v3660_v3  ;;  %3318 = vmatprep.subr.bf16.mxu0 %v3661_v49  ;;  %v3716_v3 = vld [vmem:[%s4660_s12 + $0x3a8] sm:$0xff]   ;;  %v3721_v49 = vld [vmem:[%s4660_s12 + $0x378] sm:$0xff]  }
 0x2f9   : > { %3340 = vmatprep.subr.bf16.mxu1 %v3662_v28  ;;  %v3722_v28 = vld [vmem:[%s4660_s12 + $0x3f8] sm:$0xff]  }
 0x2fa   : > { %2423 = vmatmul.mubr.bf16.vlgmr.msra.gmra.mrb[4].mxu0 %v1265_v27  ;;  %v3719_v27 = vld [vmem:[%s4660_s12 + $0x330] sm:$0xff]  }
 0x2fb   : > { %2464 = vmatmul.mubr.bf16.vlgmr.msra.gmra.mrb[4].mxu1 %v1267_v48  ;;  %3319 = vmatpush3.bf16.msra.mxu0 %v3663_v50  ;;  %v3720_v48 = vld [vmem:[%s4660_s12 + $0x3b0] sm:$0xff]   ;;  %v3723_v50 = vld [vmem:[%s4660_s12 + $0x338] sm:$0xff]  }
 0x2fc   : > { %3341 = vmatpush3.bf16.msra.mxu1 %v3664_v51  ;;  %3320 = vmatprep.subr.bf16.mxu0 %v3665_v52  ;;  %v3724_v51 = vld [vmem:[%s4660_s12 + $0x3b8] sm:$0xff]  }
 0x2fd   : > { %3342 = vmatprep.subr.bf16.mxu1 %v3666_v53  ;;  %2504 = vmatprep.mubr.bf16.mxu0 %v1270_v34  ;;  %v1274_v52 = vld [vmem:[#allocation2 + $0x68] sm:$0xff]  ;;  %v1276_v53 = vld [vmem:[#allocation2 + $0x78] sm:$0xff] }
 0x2fe   : > { %2545 = vmatprep.mubr.bf16.mxu1 %v1272_v39 }
 0x2ff   : > { %3321 = vmatpush3.bf16.msra.mxu0 %v3667_v54  ;;  %v1273_v54 = vld [vmem:[#allocation2 + $0x60] sm:$0xff] }
 0x300   : > { %3343 = vmatpush3.bf16.msra.mxu1 %v3668_v55  ;;  %3322 = vmatprep.subr.bf16.mxu0 %v3669_v56  ;;  %v1275_v55 = vld [vmem:[#allocation2 + $0x70] sm:$0xff]  ;;  %v4152_v56 = vmov 0  }
 0x301   : > { %3344 = vmatprep.subr.bf16.mxu1 %v3670_v57  ;;  %3596 = vset.pattern.permute.xlu0 %v4152_v56 }
 0x302   : > { %3595 = vset.pattern.permute.xlu1 %v4152_v56 }
 0x303   : > { %3323 = vmatpush3.bf16.msra.mxu0 %v3671_v58 }
 0x304   : > { %3345 = vmatpush3.bf16.msra.mxu1 %v3672_v59  ;;  %3324 = vmatprep.subr.bf16.mxu0 %v3673_v60  ;;  %v3074_v59 = vld [vmem:[%s4671_s6] ss:$0 sm:$0xff] }
 0x305   : > { %3346 = vmatprep.subr.bf16.mxu1 %v3674_v61 }
 0x307   : > { %3325 = vmatpush3.bf16.msra.mxu0 %v3675_v62 }
 0x308   : > { %3347 = vmatpush3.bf16.msra.mxu1 %v3676_v63  ;;  %3326 = vmatprep.subr.bf16.mxu0 %v3677_v0 }
 0x309   : > { %3348 = vmatprep.subr.bf16.mxu1 %v3678_v1 }
 0x30b   : > { %3327 = vmatpush3.bf16.msra.mxu0 %v3679_v2 }
 0x30c   : > { %3349 = vmatpush3.bf16.msra.mxu1 %v3680_v4  ;;  %3328 = vmatprep.subr.bf16.mxu0 %v3681_v5 }
 0x30d   : > { %3350 = vmatprep.subr.bf16.mxu1 %v3682_v6 }
 0x30f   : > { %3329 = vmatpush3.bf16.msra.mxu0 %v3683_v7 }
 0x310   : > { %3351 = vmatpush3.bf16.msra.mxu1 %v3684_v8  ;;  %3330 = vmatprep.subr.bf16.mxu0 %v3685_v33 }
 0x311   : > { %3352 = vmatprep.subr.bf16.mxu1 %v3686_v10 }
 0x313   : > { %3331 = vmatpush3.bf16.msra.mxu0 %v3687_v11 }
 0x314   : > { %3353 = vmatpush3.bf16.msra.mxu1 %v3688_v35  ;;  %3332 = vmatprep.subr.bf16.mxu0 %v3689_v12 }
 0x315   : > { %3354 = vmatprep.subr.bf16.mxu1 %v3690_v13 }
 0x317   : > { %3333 = vmatpush3.bf16.msra.mxu0 %v3691_v38 }
 0x318   : > { %3355 = vmatpush3.bf16.msra.mxu1 %v3692_v14  ;;  %3362 = vmatprep.subr.bf16.mxu0 %v3693_v16 }
 0x319   : > { %3384 = vmatprep.subr.bf16.mxu1 %v3694_v17 }
 0x31a   : > { %2505 = vmatmul.mubr.bf16.vlgmr.msra.gmra.mrb[8].mxu0 %v1269_v9 }
 0x31b   : > { %2546 = vmatmul.mubr.bf16.vlgmr.msra.gmra.mrb[8].mxu1 %v1271_v15  ;;  %3363 = vmatpush3.bf16.msra.mxu0 %v3695_v18 }
 0x31c   : > { %3385 = vmatpush3.bf16.msra.mxu1 %v3696_v19  ;;  %3364 = vmatprep.subr.bf16.mxu0 %v3697_v20 }
 0x31d   : > { %3386 = vmatprep.subr.bf16.mxu1 %v3698_v21  ;;  %2586 = vmatprep.mubr.bf16.mxu0 %v1274_v52 }
 0x31e   : > { %2627 = vmatprep.mubr.bf16.mxu1 %v1276_v53 }
 0x31f   : > { %3365 = vmatpush3.bf16.msra.mxu0 %v3699_v22 }
 0x320   : > { %3387 = vmatpush3.bf16.msra.mxu1 %v3700_v23  ;;  %3366 = vmatprep.subr.bf16.mxu0 %v3701_v24 }
 0x321   : > { %3388 = vmatprep.subr.bf16.mxu1 %v3702_v26 }
 0x323   : > { %3367 = vmatpush3.bf16.msra.mxu0 %v3703_v29 }
 0x324   : > { %3389 = vmatpush3.bf16.msra.mxu1 %v3704_v30  ;;  %3368 = vmatprep.subr.bf16.mxu0 %v3705_v31 }
 0x325   : > { %3390 = vmatprep.subr.bf16.mxu1 %v3706_v32 }
 0x327   : > { %3369 = vmatpush3.bf16.msra.mxu0 %v3707_v36 }
 0x328   : > { %3391 = vmatpush3.bf16.msra.mxu1 %v3708_v37  ;;  %3370 = vmatprep.subr.bf16.mxu0 %v3709_v40 }
 0x329   : > { %3392 = vmatprep.subr.bf16.mxu1 %v3710_v41 }
 0x32b   : > { %3371 = vmatpush3.bf16.msra.mxu0 %v3711_v42 }
 0x32c   : > { %3393 = vmatpush3.bf16.msra.mxu1 %v3712_v43  ;;  %3372 = vmatprep.subr.bf16.mxu0 %v3713_v25 }
 0x32d   : > { %3394 = vmatprep.subr.bf16.mxu1 %v3714_v44 }
 0x32f   : > { %3373 = vmatpush3.bf16.msra.mxu0 %v3715_v45 }
 0x330   : > { %3395 = vmatpush3.bf16.msra.mxu1 %v3716_v3  ;;  %3374 = vmatprep.subr.bf16.mxu0 %v3717_v46 }
 0x331   : > { %3396 = vmatprep.subr.bf16.mxu1 %v3718_v47 }
 0x333   : > { %3375 = vmatpush3.bf16.msra.mxu0 %v3719_v27 }
 0x334   : > { %3397 = vmatpush3.bf16.msra.mxu1 %v3720_v48  ;;  %3376 = vmatprep.subr.bf16.mxu0 %v3721_v49 }
 0x335   : > { %3398 = vmatprep.subr.bf16.mxu1 %v3722_v28 }
 0x337   : > { %3377 = vmatpush3.bf16.msra.mxu0 %v3723_v50 }
 0x338   : > { %3399 = vmatpush3.bf16.msra.mxu1 %v3724_v51 }
 0x33a   : > { %2587 = vmatmul.mubr.bf16.vlgmr.msra.gmra.mrb[12].mxu0 %v1273_v54 }
 0x33b   : > { %2628 = vmatmul.mubr.bf16.vlgmr.msra.gmra.mrb[12].mxu1 %v1275_v55 }
 0x3ad   : > { %v3246_v57 = vpop.f32.mrb[0].mxu0 }
 0x3ae   : > { %v3268_v58 = vpop.f32.mrb[0].mxu1  ;;  %v3247_v60 = vpop.f32.mrb[1].mxu0 }
 0x3af   : > { %v3248_v61 = vadd.f32 %v3247_v60, %v3246_v57  ;;  %v3269_v62 = vpop.f32.mrb[1].mxu1  ;;  %v3249_v63 = vpop.f32.mrb[2].mxu0  ;;  %v2646_v60 = vld [vmem:[#allocation3] sm:$0xff] }
 0x3b0   : > { %v3270_v0 = vadd.f32 %v3269_v62, %v3268_v58  ;;  %v3271_v1 = vpop.f32.mrb[2].mxu1  ;;  %v3250_v2 = vpop.f32.mrb[3].mxu0 }
 0x3b1   : > { %v2343_v4 = vadd.f32 %v3248_v61, %v3074_v59  ;;  %v3251_v5 = vadd.f32 %v3250_v2, %v3249_v63  ;;  %v3272_v6 = vpop.f32.mrb[3].mxu1  ;;  %v2691_v63 = vlaneseq }
 0x3b2   : > { %v3273_v7 = vadd.f32 %v3272_v6, %v3271_v1  ;;  %v2694_v6 = vstv %s3205_s16 }
 0x3b3   : > { %v2384_v8 = vadd.f32 %v3270_v0, %v2343_v4  ;;  %v2346_v33 = vadd.f32 %v3251_v5, %v3074_v59  ;;  %v2698_v59 = vld [vmem:[%s441_s28] sm:$0xff]  ;;  %v2647_v0 = vld [vmem:[#allocation3 + $0x8] sm:$0xff]  ;;  %v2692_v5 = vand.u32 127, %v2691_v63 }
 0x3b5   : > { %v2387_v10 = vadd.f32 %v3273_v7, %v2346_v33  ;;  %v2695_v33 = vadd.s32 %v2694_v6, %v2692_v5 }
 0x3cd   : > { %v3290_v11 = vpop.f32.mrb[4].mxu0 }
 0x3ce   : > { %v3312_v35 = vpop.f32.mrb[4].mxu1  ;;  %v3291_v12 = vpop.f32.mrb[5].mxu0 }
 0x3cf   : > { %v3292_v13 = vadd.f32 %v3291_v12, %v3290_v11  ;;  %v3313_v38 = vpop.f32.mrb[5].mxu1  ;;  %v3293_v14 = vpop.f32.mrb[6].mxu0 }
 0x3d0   : > { %v3314_v34 = vadd.f32 %v3313_v38, %v3312_v35  ;;  %v3315_v39 = vpop.f32.mrb[6].mxu1  ;;  %v3294_v9 = vpop.f32.mrb[7].mxu0 }
 0x3d1   : > { %v2425_v15 = vadd.f32 %v3292_v13, %v2384_v8  ;;  %v3295_v16 = vadd.f32 %v3294_v9, %v3293_v14  ;;  %v3316_v17 = vpop.f32.mrb[7].mxu1  ;;  %v2699_v8 = vld [vmem:[%s441_s28 + $0x8] sm:$0xff] }
 0x3d2   : > { %v3317_v18 = vadd.f32 %v3316_v17, %v3315_v39  ;;  %v2696_v17 = vld [vmem:[#allocation5] sm:$0xff] }
 0x3d3   : > { %v2466_v19 = vadd.f32 %v3314_v34, %v2425_v15  ;;  %v2428_v20 = vadd.f32 %v3295_v16, %v2387_v10 }
 0x3d5   : > { %v2469_v21 = vadd.f32 %v3317_v18, %v2428_v20 }
 0x3ed   : > { %v3334_v22 = vpop.f32.mrb[8].mxu0 }
 0x3ee   : > { %v3356_v23 = vpop.f32.mrb[8].mxu1  ;;  %v3335_v24 = vpop.f32.mrb[9].mxu0 }
 0x3ef   : > { %v3336_v26 = vadd.f32 %v3335_v24, %v3334_v22  ;;  %v3357_v29 = vpop.f32.mrb[9].mxu1  ;;  %v3337_v30 = vpop.f32.mrb[10].mxu0 }
 0x3f0   : > { %v3358_v31 = vadd.f32 %v3357_v29, %v3356_v23  ;;  %v3359_v32 = vpop.f32.mrb[10].mxu1  ;;  %v3338_v36 = vpop.f32.mrb[11].mxu0  ;;  %v2660_v23 = vld [vmem:[#allocation4] sm:$0xff] }
 0x3f1   : > { %v2507_v37 = vadd.f32 %v3336_v26, %v2466_v19  ;;  %v3339_v40 = vadd.f32 %v3338_v36, %v3337_v30  ;;  %v3360_v41 = vpop.f32.mrb[11].mxu1  ;;  %v2661_v30 = vld [vmem:[#allocation4 + $0x8] sm:$0xff] }
 0x3f2   : > { %v3361_v42 = vadd.f32 %v3360_v41, %v3359_v32 }
 0x3f3   : > { %v2548_v43 = vadd.f32 %v3358_v31, %v2507_v37  ;;  %v2510_v25 = vadd.f32 %v3339_v40, %v2469_v21  ;;  %v2697_v40 = vld [vmem:[#allocation5 + $0x8] sm:$0xff] }
 0x3f5   : > { %v2551_v44 = vadd.f32 %v3361_v42, %v2510_v25 }
 0x40d   : > { %v3378_v45 = vpop.f32.mrb[12].mxu0 }
 0x40e   : > { %v3400_v3 = vpop.f32.mrb[12].mxu1  ;;  %v3379_v46 = vpop.f32.mrb[13].mxu0 }
 0x40f   : > { %v3380_v47 = vadd.f32 %v3379_v46, %v3378_v45  ;;  %v3401_v27 = vpop.f32.mrb[13].mxu1  ;;  %v3381_v48 = vpop.f32.mrb[14].mxu0  ;;  %v2733_v45 = vld [vmem:[%s4648_s1 + $0x8] sm:$0xff] (!%p3206_p9) }
 0x410   : > { %v3402_v49 = vadd.f32 %v3401_v27, %v3400_v3  ;;  %v3403_v28 = vpop.f32.mrb[14].mxu1  ;;  %v3382_v50 = vpop.f32.mrb[15].mxu0  ;;  %vm2735_vm6 = vcmp.gt.f32.partialorder (!%p3206_p9), %v2733_v45, 0.5 }
 0x411   : > { %v2589_v51 = vadd.f32 %v3380_v47, %v2548_v43  ;;  %v3383_v52 = vadd.f32 %v3382_v50, %v3381_v48  ;;  %v3404_v53 = vpop.f32.mrb[15].mxu1 }
 0x412   : > { %v3405_v54 = vadd.f32 %v3404_v53, %v3403_v28 }
 0x413   : > { %v2630_v55 = vadd.f32 %v3402_v49, %v2589_v51  ;;  %v2592_v56 = vadd.f32 %v3383_v52, %v2551_v44  ;;  %v2732_v44 = vld [vmem:[%s4648_s1] sm:$0xff] (!%p3206_p9)  ;;  %v4153_v52 = vmov (!%p3206_p9), 0.0  }
 0x414   : > { %vm2734_vm5 = vcmp.gt.f32.partialorder (!%p3206_p9), %v2732_v44, 0.5 }
 0x415   : > { %v2633_v57 = vadd.f32 %v3405_v54, %v2592_v56  ;;  %2648 = vmax.xlane.f32.xlu0 %v2630_v55  ;;  %v3207_v53 = vsel (!%p3206_p9), %vm2734_vm5, 1.0, %v4153_v52  ;;  %v3208_v56 = vsel (!%p3206_p9), %vm2735_vm6, 1.0, %v4153_v52 }
 0x417   : > { %v3228_v58 = vpack.c.bf16 %v2633_v57, %v2630_v55 }
 0x419   : > { %3229 = vst [vmem:[%s515_s25] sm:$0xff] %v3228_v58   ;;  %2650 = vmax.xlane.f32.xlu0 %v2633_v57 }
 0x42f   : > { %2701 = vperm.xlu0 %3596, %v2698_v59  }
 0x4a2   : > { %v2649_v61 = vpop.xlane.xlu0 %2648 }
 0x4a3   : > { %v2652_v62 = vmax.f32 %v2646_v60, %v2649_v61 }
 0x4a5   : > { %v2654_v1 = vsub.f32 %v2646_v60, %v2652_v62  ;;  %2689 = vst.msk [vmem:[#allocation3] sm:$0xff] %vm2686_vm2, %v2652_v62  ;;  %2666 = vperm.xlu1 %3595, %v2652_v62  }
 0x4a6   : > { %v2651_v2 = vpop.xlane.xlu0 %2650 }
 0x4a7   : > { %v2653_v4 = vmax.f32 %v2647_v0, %v2651_v2  ;;  %v2656_v20 = vmul.f32 1.442695, %v2654_v1 }
 0x4a9   : > { %v2655_v7 = vsub.f32 %v2647_v0, %v2653_v4  ;;  %2690 = vst.msk [vmem:[#allocation3 + $0x8] sm:$0xff] %vm2686_vm2, %v2653_v4  ;;  %2671 = vperm.xlu1 %3595, %v2653_v4  }
 0x4ab   : > { %v2658_v21 = vmul.f32 1.442695, %v2655_v7 }
 0x4ac   : > { %v2722_v46 = vld [vmem:[#allocation3] sm:$0xff] (!%p3206_p9) }
 0x4ad   : > { %2704 = vperm.xlu1 %3595, %v2699_v8  }
 0x4ae   : > { %v2702_v10 = vpop.permute.xlu0 %2701 }
 0x4af   : > { %vm2706_vm3 = vcmp.eq.s32.totalorder %v2695_v33, %v2702_v10 }
 0x4b0   : > { %v2708_v11 = vsel %vm2706_vm3, %v2630_v55, 0.0  ;;  %v2723_v48 = vld [vmem:[#allocation3 + $0x8] sm:$0xff] (!%p3206_p9) }
 0x4b1   : > { %2710 = vadd.xlane.f32.xlu0 %v2708_v11 }
 0x524   : > { %v2667_v35 = vpop.permute.xlu1 %2666 }
 0x525   : > { %v2674_v12 = vsub.f32 %v2630_v55, %v2667_v35 }
 0x527   : > { %v2676_v13 = vmul.f32 1.442695, %v2674_v12 }
 0x528   : > { %v2672_v38 = vpop.permute.xlu1 %2671 }
 0x529   : > { %3725 = vpow2.f32 %v2676_v13  ;;  %v2675_v14 = vsub.f32 %v2633_v57, %v2672_v38 }
 0x52b   : > { %v2678_v34 = vmul.f32 1.442695, %v2675_v14 }
 0x52c   : > { %v2705_v9 = vpop.permute.xlu1 %2704 }
 0x52d   : > { %3727 = vpow2.f32 %v2678_v34  ;;  %vm2707_vm4 = vcmp.eq.s32.totalorder %v2695_v33, %v2705_v9 }
 0x52e   : > { %v2709_v16 = vsel %vm2707_vm4, %v2633_v57, 0.0  ;;  %3729 = vpow2.f32 %v2656_v20 }
 0x52f   : > { %3731 = vpow2.f32 %v2658_v21 }
 0x533   : > { %v3726_v39 = vpop.eup %3725 }
 0x534   : > { %2680 = vadd.xlane.f32.xlu1 %v3726_v39 }
 0x537   : > { %v3728_v15 = vpop.eup %3727 }
 0x538   : > { %2682 = vadd.xlane.f32.xlu1 %v3728_v15  ;;  %v3730_v22 = vpop.eup %3729 }
 0x539   : > { %v2662_v24 = vmul.f32 %v3730_v22, %v2660_v23  ;;  %v3732_v26 = vpop.eup %3731 }
 0x53a   : > { %v2663_v32 = vmul.f32 %v3732_v26, %v2661_v30 }
 0x53c   : > { %2712 = vadd.xlane.f32.xlu1 %v2709_v16 }
 0x53e   : > { %v2711_v18 = vpop.xlane.xlu0 %2710 }
 0x53f   : > { %v2714_v19 = vadd.f32 %v2711_v18, %v2696_v17 }
 0x541   : > { %2716 = vst.msk [vmem:[#allocation5] sm:$0xff] %vm2686_vm2, %v2714_v19 }
 0x548   : > { %v2740_v49 = vld [vmem:[#allocation5] sm:$0xff] (!%p3206_p9) }
 0x5c1   : > { %v2681_v29 = vpop.xlane.xlu1 %2680 }
 0x5c2   : > { %v2684_v31 = vadd.f32 %v2681_v29, %v2662_v24 }
 0x5c4   : > { %2687 = vst.msk [vmem:[#allocation4] sm:$0xff] %vm2686_vm2, %v2684_v31 }
 0x5c5   : > { %v2683_v36 = vpop.xlane.xlu1 %2682 }
 0x5c6   : > { %v2685_v37 = vadd.f32 %v2683_v36, %v2663_v32  ;;  %2721 = sbr.rel (%p3206_p9) target bundleno = 1508 (0x5e4), region = 84 }
 0x5c8   : > { %2688 = vst.msk [vmem:[#allocation4 + $0x8] sm:$0xff] %vm2686_vm2, %v2685_v37 }
 0x5c9   : > { %v2713_v41 = vpop.xlane.xlu1 %2712 }
 0x5ca   : > { %v2715_v42 = vadd.f32 %v2713_v41, %v2697_v40 }
 0x5cb   : > { %v2724_v43 = vld [vmem:[#allocation4] sm:$0xff] (!%p3206_p9) }
 0x5cc   : > { %2717 = vst.msk [vmem:[#allocation5 + $0x8] sm:$0xff] %vm2686_vm2, %v2715_v42  ;;  %3733 = vlog2.f32 (!%p3206_p9), %v2724_v43 }
 0x5cf   : > { %v2725_v25 = vld [vmem:[#allocation4 + $0x8] sm:$0xff] }
 0x5d0   : > { %3735 = vlog2.f32 %v2725_v25 }
 0x5d3   : > { %v2741_v51 = vld [vmem:[#allocation5 + $0x8] sm:$0xff] }
 0x5d6   : > { %v3734_v3 = vpop.eup %3733 }
 0x5d7   : > { %v2727_v27 = vmul.f32 0.6931472, %v3734_v3 }
 0x5d9   : > { %v2730_v50 = vadd.f32 %v2727_v27, %v2722_v46 }
 0x5da   : > { %v3736_v47 = vpop.eup %3735 }
 0x5db   : > { %v2729_v28 = vmul.f32 0.6931472, %v3736_v47  ;;  %v2742_v55 = vsub.f32 %v2730_v50, %v2740_v49 }
 0x5dd   : > { %v2731_v54 = vadd.f32 %v2729_v28, %v2723_v48  ;;  %v2744_v58 = vmul.f32 %v3207_v53, %v2742_v55 }
 0x5df   : > { %v2743_v57 = vsub.f32 %v2731_v54, %v2741_v51  ;;  %2746 = vst.msk [vmem:[%s4675_s11] sm:$0xff] %vm2686_vm2, %v2744_v58 }
 0x5e1   : > { %v2745_v59 = vmul.f32 %v3208_v56, %v2743_v57 }
 0x5e3   : > { %2747 = vst.msk [vmem:[%s4675_s11 + $0x8] sm:$0xff] %vm2686_vm2, %v2745_v59 }
 0x5e4 PF: > { %s5178_s5 = sld [smem:[#allocation33_spill]]  ;;  %s5179_s26 = sld [smem:[#allocation32_spill]] }
 0x5e5   : > { %s5181_s28 = sld [smem:[#allocation38_spill]]  ;;  %s2769_s3 = sshll.u32 %s515_s25, 4  ;;  %s4906_s3 = int_to_ptr.vmem [resolvable:$true] %s2769_s3 }
 0x5e6   : > { %s5182_s23 = sld [smem:[#allocation52_spill]]  ;;  %s4915_s9 = scalar_lea.sflag [#allocation8], %s513_s19 }
 0x5e7   : > { %s3943_s14 = scalar_lea.vmem %s4906_s3, 128  ;;  %s4154_s21 = smov [#allocation18]  }
 0x5e8   : > { %p3944_p4 = scmp.ne.s32.totalorder %s4906_s3, %s3943_s14  ;;  %s3947_s25 = sshll.u32 %s4154_s21, 4  ;;  %s3948_s25 = int_to_ptr.vmem [resolvable:$false] %s3947_s25 }
 0x5e9   : > { %s3949_s16 = scalar_lea.vmem %s3948_s25, 256  ;;  %p3950_p5 = scmp.lt.s32.totalorder %s4906_s3, %s3948_s25 }
 0x5ea   : > { %s3223_s7 = sshll.u32 %s5178_s5, 2  ;;  %p3951_p8 = scmp.lt.s32.totalorder %s3949_s16, %s3943_s14 }
 0x5eb   : > { %s2766_s15 = sadd.s32 %s5179_s26, %s3223_s7  ;;  %p5183_p7 = scmp.ne.s32.totalorder %s5181_s28, 0 }
 0x5ec   : > { %s3213_s24 = sshll.u32 %s2766_s15, 6  ;;  %p3952_p12 = por %p3951_p8, %p3950_p5 }
 0x5ed   : > { %s4911_s6 = scalar_lea.hbm %s5182_s23, %s3213_s24  ;;  %p3945_p10 = pnand %p3944_p4, %p5183_p7 }
 0x5ef   : > { %p3946_p3 = pneg %p3945_p10 }
 0x5f1   : > { %p3953_p11 = pnand %p3952_p12, %p3946_p3 }
 0x5f3   : > { %3956 = shalt.err (!%p3953_p11)
}
 0x5f4   : > { %s3957_s19 = scalar_lea.hbm %s4911_s6, 128  ;;  %s3961_s7 = scalar_lea.hbm %s5182_s23, 768 }
 0x5f5   : > { %p3958_p0 = scmp.ne.s32.totalorder %s4911_s6, %s3957_s19  ;;  %p3962_p13 = scmp.lt.u32.totalorder %s4911_s6, %s5182_s23 }
 0x5f6   : > { %p3963_p6 = scmp.lt.u32.totalorder %s3961_s7, %s3957_s19  ;;  %p3965_p4 = scmp.lt.u32.totalorder %s3957_s19, %s4911_s6 }
 0x5f7   : > { %p3959_p2 = pnand %p3958_p0, %p5183_p7 }
 0x5f8   : > { %p3964_p9 = por %p3963_p6, %p3962_p13 }
 0x5f9   : > { %p3960_p1 = pneg %p3959_p2 }
 0x5fa   : > { %p3966_p10 = por %p3965_p4, %p3964_p9 }
 0x5fc   : > { %p3967_p3 = pnand %p3966_p10, %p3960_p1 }
 0x5fe   : > { %3970 = shalt.err (!%p3967_p3)
}
 0x5ff   : > { %s4155_s27 = smov 64   ;;  %s5184_s12 = sld [smem:[#allocation42_spill]] }
 0x600   : > { %s4156_s14 = smov 128   ;;  %s4157_s21 = smov 4  }
 0x601   : > { %3424 = dma.vmem_to_hbm [thread:$0]  (%p5183_p7), %s4906_s3, 128, %s4911_s6, %s4915_s9, %s4155_s27, %s4156_s14, %s4157_s21  }
 0x602   : > { %s3224_s25 = sshll.u32 %s5178_s5, 8  ;;  %s5185_s26 = sld [smem:[#allocation53_spill]] }
 0x603   : > { %s2785_s7 = sshll.u32 %s4675_s11, 4  ;;  %s2754_s15 = scalar_lea.sflag [#allocation20], %s4633_s30  ;;  %s4947_s7 = int_to_ptr.vmem [resolvable:$true] %s2785_s7 }
 0x604   : > { %s3971_s24 = scalar_lea.vmem %s4947_s7, 256  ;;  %s4158_s28 = smov [#allocation19]  }
 0x605   : > { %p3972_p5 = scmp.ne.s32.totalorder %s4947_s7, %s3971_s24  ;;  %p5186_p8 = scmp.ne.s32.totalorder %s5184_s12, 0 }
 0x606   : > { %s3975_s3 = sshll.u32 %s4158_s28, 4  ;;  %s3976_s3 = int_to_ptr.vmem [resolvable:$false] %s3975_s3 }
 0x607   : > { %p3973_p12 = pnand %p3972_p5, %p5186_p8  ;;  %s3977_s5 = scalar_lea.vmem %s3976_s3, 512 }
 0x608   : > { %s4944_s1 = scalar_lea.hbm %s5185_s26, %s3224_s25  ;;  %p3978_p7 = scmp.lt.s32.totalorder %s4947_s7, %s3976_s3 }
 0x609   : > { %p3974_p11 = pneg %p3973_p12  ;;  %p3979_p0 = scmp.lt.s32.totalorder %s3977_s5, %s3971_s24 }
 0x60b   : > { %p3980_p2 = por %p3979_p0, %p3978_p7 }
 0x60d   : > { %p3981_p1 = pnand %p3980_p2, %p3974_p11 }
 0x60f   : > { %3984 = shalt.err (!%p3981_p1)
}
 0x610   : > { %s3985_s11 = scalar_lea.hbm %s4944_s1, 256  ;;  %s3989_s27 = scalar_lea.hbm %s5185_s26, 768 }
 0x611   : > { %p3986_p13 = scmp.ne.s32.totalorder %s4944_s1, %s3985_s11  ;;  %p3990_p4 = scmp.lt.u32.totalorder %s4944_s1, %s5185_s26 }
 0x612   : > { %p3991_p10 = scmp.lt.u32.totalorder %s3989_s27, %s3985_s11  ;;  %p3993_p5 = scmp.lt.u32.totalorder %s3985_s11, %s4944_s1 }
 0x613   : > { %p3987_p6 = pnand %p3986_p13, %p5186_p8 }
 0x614   : > { %p3992_p3 = por %p3991_p10, %p3990_p4 }
 0x615   : > { %p3988_p9 = pneg %p3987_p6 }
 0x616   : > { %p3994_p12 = por %p3993_p5, %p3992_p3 }
 0x618   : > { %p3995_p11 = pnand %p3994_p12, %p3988_p9 }
 0x61a   : > { %3998 = shalt.err (!%p3995_p11)
}
 0x61b   : > { %s4159_s16 = smov 8  }
 0x61c   : > { %3425 = dma.vmem_to_hbm [thread:$0]  (%p5186_p8), %s4947_s7, 256, %s4944_s1, %s2754_s15, %s4156_s14, %s4156_s14, %s4159_s16  }
 0x61d PF: > { %s5187_s19 = sld [smem:[#allocation27_spill]]  ;;  %p3463_p7 = scmp.ge.s32.totalorder %s4133_s18, 2 }
 0x61e   : > { %s5188_s24 = sld [smem:[#allocation39_spill]] }
 0x623   : > { %s2800_s28 = sand.u32 1, %s5187_s19  }
 0x624   : > { %p5189_p0 = scmp.ne.s32.totalorder %s5188_s24, 0  ;;  %s2801_s3 = scalar_lea.sflag [#allocation8], %s2800_s28 }
 0x626   : > { %p3452_p2 = pnand %p3463_p7, %p5189_p0 }
 0x628   : > { %4072 = dma.done.wait (!%p3452_p2), %s2801_s3, 128  }
 0x629   : > { %4074 = vsyncadd (!%p3452_p2), %s2801_s3, 4294967168  ;;  %s5190_s5 = sld [smem:[#allocation30_spill]] }
 0x62a   : > { %s5191_s12 = sld [smem:[#allocation40_spill]] }
 0x62f   : > { %s2809_s11 = sand.u32 1, %s5190_s5  }
 0x630   : > { %p5192_p1 = scmp.ne.s32.totalorder %s5191_s12, 0  ;;  %s2810_s30 = scalar_lea.sflag [#allocation20], %s2809_s11 }
 0x632   : > { %p3455_p13 = pnand %p3463_p7, %p5192_p1 }
 0x634   : > { %4076 = dma.done.wait (!%p3455_p13), %s2810_s30, 256  }
 0x635   : > { %4078 = vsyncadd (!%p3455_p13), %s2810_s30, 4294967040  ;;  %s35_s18 = sadd.s32 1, %s4133_s18   ;;  %s5194_s27 = sld [smem:[#allocation28_spill]] }
 0x636   : > { %p4983_p8 = scmp.ge.s32.totalorder %s35_s18, 8   ;;  %s5195_s30 = sld [smem:[#allocation29_spill]] }
 0x637   : > { %s5196_s11 = sld [smem:[#allocation31_spill]]  ;;  %s5197_s1 = sld [smem:[#allocation47_spill]] }
 0x638   : > { %s5198_s7 = sld [smem:[#allocation34_spill]]  ;;  %s5199_s16 = sld [smem:[#allocation45_spill]] }
 0x639   : > { %s5200_s6 = sld [smem:[#allocation46_spill]]  ;;  %s5202_s28 = smov %s4089_s29 }
 0x63a   : > { %s5203_s29 = smov %s4480_s22  ;;  %s5204_s9 = smov %s4101_s10 }
 0x63b   : > { %s5205_s10 = smov %s4463_s20  ;;  %s5206_s12 = smov %s4113_s13 }
 0x63c   : > { %s5209_s15 = smov %s4129_s17  ;;  %34 = sbr.rel (!%p4983_p8) target bundleno = 24 (0x18), region = 174 }
 0x63d   : > { %s5207_s13 = smov %s5197_s1 }
 0x63e   : > { %s5208_s14 = smov %s5198_s7 }
 0x63f   : > { %s5210_s17 = smov %s5200_s6 }
 0x643   :  { %2815 = vsyncpa [#allocation7], 1 }
 0x644   :  { %2817 = vsyncpa [#allocation7 + $0x1], 1 }
 0x645   :  { %2818 = vsyncpa [#allocation10], 1 }
 0x646   :  { %2820 = vsyncpa [#allocation10 + $0x1], 1 }
 0x647   :  { %2821 = vsyncpa [#allocation13], 1 }
 0x648   :  { %2822 = vsyncpa [#allocation16], 1 }
 0x649   :  { %2824 = vsyncpa [#allocation16 + $0x1], 1 }
 0x64a   :  { %2825 = vsyncpa [#allocation8], 1 }
 0x64b   :  { %2827 = vsyncpa [#allocation8 + $0x1], 1 }
 0x64c   :  { %2828 = vsyncpa [#allocation20], 1 }
 0x64d   :  { %2830 = vsyncpa [#allocation20 + $0x1], 1 }

</bundles_post_ra>
